<compile_context>
chip_gen: v6e
topology: v6e:2x2x1
jax: 0.10.0
libtpu: 0.0.40
codegen_flags: <defaults>
</compile_context>

<pallas_src>
import functools

import jax
import jax.numpy as jnp
from jax.experimental import pallas as pl
from jax.experimental.pallas import tpu as pltpu


LANE = 128  # lane-dense padding target for the feature / class dimensions


def _round_up(v, m):
    return ((v + m - 1) // m) * m


# ---------------------------------------------------------------------------
# Fused kernel: XW = X @ W ; Y1 = S @ XW ; H = S @ Y1 + b ; out = log_softmax(H)
# Single grid step, everything VMEM-resident.
# ---------------------------------------------------------------------------
def _sgc_fused_kernel(c_out, a_ref, x_ref, w_ref, b_ref, o_ref):
    a = a_ref[...]                                                   # [N, N] bf16

    # XW = X @ W_pad  (bf16 MXU operands, f32 accumulate, requantize for next MXU op)
    xw = jnp.dot(
        x_ref[...], w_ref[...], preferred_element_type=jnp.float32
    ).astype(jnp.bfloat16)                                           # [N, Cp]

    # Y1 = S @ XW  (stays in VMEM/registers, never touches HBM)
    y1 = jnp.dot(a, xw, preferred_element_type=jnp.float32)          # [N, Cp] f32

    # H = S @ Y1 + b
    h = jnp.dot(
        a, y1.astype(jnp.bfloat16), preferred_element_type=jnp.float32
    ) + b_ref[...]                                                   # [N, Cp] f32

    # Masked log_softmax over the valid class columns.
    col = jax.lax.broadcasted_iota(jnp.int32, h.shape, 1)
    valid = col < c_out
    h = jnp.where(valid, h, jnp.float32(-1e30))
    m = jnp.max(h, axis=1, keepdims=True)
    s = h - m
    # exp(-1e30 - m) underflows to exactly 0 in the padded lanes -> no inner select needed.
    lse = jnp.log(jnp.sum(jnp.exp(s), axis=1, keepdims=True))
    o_ref[...] = jnp.where(valid, s - lse, 0.0).astype(o_ref.dtype)


# ---------------------------------------------------------------------------
# Wrapper
# ---------------------------------------------------------------------------
def sgc_forward(a_bf16, x, weight, bias):
    """log_softmax( S @ S @ (X @ W^T) + b , axis=1 ) via ONE fused Pallas call."""
    n, f = x.shape
    c_out = weight.shape[0]
    f_pad = _round_up(max(f, LANE), LANE)
    c_pad = _round_up(max(c_out, LANE), LANE)

    # Zero-padded, lane-dense operands (exact: padded columns/rows contribute zero).
    x_pad = jnp.zeros((n, f_pad), jnp.float32).at[:, :f].set(x).astype(jnp.bfloat16)
    w_pad = (
        jnp.zeros((f_pad, c_pad), jnp.float32).at[:f, :c_out].set(weight.T)
        .astype(jnp.bfloat16)
    )
    b_pad = jnp.zeros((1, c_pad), jnp.float32).at[:, :c_out].set(bias.reshape(1, c_out))

    kernel = functools.partial(_sgc_fused_kernel, c_out)

    out_pad = pl.pallas_call(
        kernel,
        out_shape=jax.ShapeDtypeStruct((n, c_pad), jnp.float32),
        grid=(1,),
        in_specs=[
            pl.BlockSpec((n, n), lambda i: (0, 0)),        # S (bf16, resident)
            pl.BlockSpec((n, f_pad), lambda i: (0, 0)),    # X
            pl.BlockSpec((f_pad, c_pad), lambda i: (0, 0)),  # W^T (padded)
            pl.BlockSpec((1, c_pad), lambda i: (0, 0)),    # bias
        ],
        out_specs=pl.BlockSpec((n, c_pad), lambda i: (0, 0)),
        compiler_params=pltpu.CompilerParams(
            dimension_semantics=("arbitrary",),
            # Explicit budget: fits all generations (v7x physical VMEM is 64 MiB).
            vmem_limit_bytes=32 * 1024 * 1024,
        ),
        cost_estimate=pl.CostEstimate(
            flops=2 * n * f_pad * c_pad + 4 * n * n * c_pad,
            transcendentals=n * c_pad,
            bytes_accessed=2 * n * n + 2 * n * f_pad + 2 * f_pad * c_pad
            + 4 * c_pad + 4 * n * c_pad,
        ),
    )(a_bf16, x_pad, w_pad, b_pad)

    return out_pad[:, :c_out]


# ---------------------------------------------------------------------------
# Glue: dense GCN normalization  S = D^{-1/2} (A + I) D^{-1/2}
# Duplicate edges are summed and self-loops added on top (PyG gcn_norm semantics).
# ---------------------------------------------------------------------------
def gcn_norm_dense(edge_index, num_nodes):
    src = edge_index[0]
    dst = edge_index[1]
    a = jnp.zeros((num_nodes, num_nodes), jnp.float32).at[dst, src].add(1.0)
    a = a + jnp.eye(num_nodes, dtype=jnp.float32)          # self-loops (weight 1)
    deg = jnp.sum(a, axis=1)
    dinv = jnp.where(deg > 0, jax.lax.rsqrt(deg), 0.0)
    s = dinv[:, None] * a * dinv[None, :]
    # Produce the bf16 MXU operand here (single cast point; no extra N^2 HBM pass later).
    return s, s.astype(jnp.bfloat16)


# Pure-JAX references
def sgc_reference_f32(a, x, weight, bias):
    h = a @ (a @ (x @ weight.T)) + bias
    return jax.nn.log_softmax(h, axis=1)


def sgc_reference_bf16(a_bf, x, weight, bias):
    # Same bf16-operand / f32-accumulate arithmetic as the fused kernel.
    w_t = weight.T.astype(jnp.bfloat16)
    xw = jnp.dot(x.astype(jnp.bfloat16), w_t,
                 preferred_element_type=jnp.float32).astype(jnp.bfloat16)
    y1 = jnp.dot(a_bf, xw, preferred_element_type=jnp.float32).astype(jnp.bfloat16)
    h = jnp.dot(a_bf, y1, preferred_element_type=jnp.float32) + bias
    return jax.nn.log_softmax(h, axis=1)


if __name__ == "__main__":
    # Deterministic problem: N nodes, F features, C classes, E directed edges.
    N, F_IN, C_OUT, E = 512, 16, 4, 2048

    key = jax.random.PRNGKey(0)
    k_x, k_e, k_w, k_b = jax.random.split(key, 4)

    x = jax.random.normal(k_x, (N, F_IN), dtype=jnp.float32)
    edge_index = jax.random.randint(k_e, (2, E), 0, N, dtype=jnp.int32)

    # PyG Linear-style init: weight [C, F], bias [C]
    lim = 1.0 / jnp.sqrt(jnp.float32(F_IN))
    weight = jax.random.uniform(k_w, (C_OUT, F_IN), jnp.float32, -lim, lim)
    bias = jax.random.uniform(k_b, (C_OUT,), jnp.float32, -lim, lim)

    a_f32, a_bf16 = gcn_norm_dense(edge_index, N)

    out = sgc_forward(a_bf16, x, weight, bias)
    out = jax.block_until_ready(out)
    assert out.shape == (N, C_OUT)

    # Tight check vs a reference with matching bf16/f32 numerics.
    ref_match = sgc_reference_bf16(a_bf16, x, weight, bias)
    assert jnp.allclose(out, ref_match, atol=1e-3, rtol=1e-3), \
        "mismatch vs bf16-matched reference"

    # Loose semantic sanity check vs pure-f32 math (bf16 MXU inputs).
    ref_f32 = sgc_reference_f32(a_f32, x, weight, bias)
    assert float(jnp.max(jnp.abs(out - ref_f32))) < 0.1, \
        "mismatch vs f32 reference beyond bf16 tolerance"

    print("KERNEL_OK")
</pallas_src>

<mosaic_0001>
module attributes {stable_mosaic.version = 11 : i64} {
  func.func @_sgc_fused_kernel(%arg0: i32, %arg1: memref<512x512xbf16, #tpu.memory_space<vmem>>, %arg2: memref<512x128xbf16, #tpu.memory_space<vmem>>, %arg3: memref<128x128xbf16, #tpu.memory_space<vmem>>, %arg4: memref<1x128xf32, #tpu.memory_space<vmem>>, %arg5: memref<512x128xf32, #tpu.memory_space<vmem>>) attributes {dimension_semantics = [#tpu.dimension_semantics<arbitrary>], iteration_bounds = array<i64: 1>, scalar_prefetch = 0 : i64, scratch_operands = 0 : i64, tpu.core_type = #tpu.core_type<tc>, window_params = [{pipeline_mode = #tpu.pipeline_mode<synchronous>, transform_indices = @transform_0, window_bounds = array<i64: 512, 512>}, {pipeline_mode = #tpu.pipeline_mode<synchronous>, transform_indices = @transform_1, window_bounds = array<i64: 512, 128>}, {pipeline_mode = #tpu.pipeline_mode<synchronous>, transform_indices = @transform_2, window_bounds = array<i64: 128, 128>}, {pipeline_mode = #tpu.pipeline_mode<synchronous>, transform_indices = @transform_3, window_bounds = array<i64: 1, 128>}, {pipeline_mode = #tpu.pipeline_mode<synchronous>, transform_indices = @transform_4, window_bounds = array<i64: 512, 128>}]} {
    %c0 = arith.constant 0 : index
    %c0_0 = arith.constant 0 : index
    %0 = vector.load %arg1[%c0, %c0_0] : memref<512x512xbf16, #tpu.memory_space<vmem>>, vector<512x512xbf16>
    %c0_1 = arith.constant 0 : index
    %c0_2 = arith.constant 0 : index
    %1 = vector.load %arg2[%c0_1, %c0_2] : memref<512x128xbf16, #tpu.memory_space<vmem>>, vector<512x128xbf16>
    %c0_3 = arith.constant 0 : index
    %c0_4 = arith.constant 0 : index
    %2 = vector.load %arg3[%c0_3, %c0_4] : memref<128x128xbf16, #tpu.memory_space<vmem>>, vector<128x128xbf16>
    %cst = arith.constant dense<0.000000e+00> : vector<512x128xf32>
    %3 = tpu.matmul %1, %2, %cst {dimension_numbers = #tpu.dot_dimension_numbers<[1], [0], [0], [1], [0, 0, 1, 1], [], []>} : vector<512x128xbf16>, vector<128x128xbf16>, vector<512x128xf32> -> vector<512x128xf32>
    %4 = arith.truncf %3 : vector<512x128xf32> to vector<512x128xbf16>
    %cst_5 = arith.constant dense<0.000000e+00> : vector<512x128xf32>
    %5 = tpu.matmul %0, %4, %cst_5 {dimension_numbers = #tpu.dot_dimension_numbers<[1], [0], [0], [1], [0, 0, 1, 1], [], []>} : vector<512x512xbf16>, vector<512x128xbf16>, vector<512x128xf32> -> vector<512x128xf32>
    %6 = arith.truncf %5 : vector<512x128xf32> to vector<512x128xbf16>
    %cst_6 = arith.constant dense<0.000000e+00> : vector<512x128xf32>
    %7 = tpu.matmul %0, %6, %cst_6 {dimension_numbers = #tpu.dot_dimension_numbers<[1], [0], [0], [1], [0, 0, 1, 1], [], []>} : vector<512x512xbf16>, vector<512x128xbf16>, vector<512x128xf32> -> vector<512x128xf32>
    %c0_7 = arith.constant 0 : index
    %c0_8 = arith.constant 0 : index
    %8 = vector.load %arg4[%c0_7, %c0_8] : memref<1x128xf32, #tpu.memory_space<vmem>>, vector<1x128xf32>
    %9 = vector.broadcast %8 : vector<1x128xf32> to vector<512x128xf32>
    %10 = arith.addf %7, %9 : vector<512x128xf32>
    %11 = tpu.iota {dimensions = array<i32: 1>} : vector<512x128xi32>
    %c4_i32 = arith.constant 4 : i32
    %12 = vector.broadcast %c4_i32 : i32 to vector<512x128xi32>
    %13 = arith.cmpi slt, %11, %12 : vector<512x128xi32>
    %cst_9 = arith.constant -1.000000e+30 : f32
    %14 = vector.broadcast %cst_9 : f32 to vector<512x128xf32>
    %15 = arith.select %13, %10, %14 : vector<512x128xi1>, vector<512x128xf32>
    %cst_10 = arith.constant dense<0xFF800000> : vector<512xf32>
    %16 = vector.multi_reduction <maximumf>, %15, %cst_10 [1] : vector<512x128xf32> to vector<512xf32>
    %17 = vector.shape_cast %16 : vector<512xf32> to vector<512x1xf32>
    %18 = vector.broadcast %17 : vector<512x1xf32> to vector<512x128xf32>
    %19 = arith.subf %15, %18 : vector<512x128xf32>
    %20 = math.exp %19 : vector<512x128xf32>
    %cst_11 = arith.constant dense<0.000000e+00> : vector<512xf32>
    %21 = vector.multi_reduction <add>, %20, %cst_11 [1] : vector<512x128xf32> to vector<512xf32>
    %22 = vector.shape_cast %21 : vector<512xf32> to vector<512x1xf32>
    %23 = math.log %22 : vector<512x1xf32>
    %24 = vector.broadcast %23 : vector<512x1xf32> to vector<512x128xf32>
    %25 = arith.subf %19, %24 : vector<512x128xf32>
    %cst_12 = arith.constant 0.000000e+00 : f32
    %26 = vector.broadcast %cst_12 : f32 to vector<512x128xf32>
    %27 = arith.select %13, %25, %26 : vector<512x128xi1>, vector<512x128xf32>
    %c0_13 = arith.constant 0 : index
    %c0_14 = arith.constant 0 : index
    %28 = vector.load %arg5[%c0_13, %c0_14] : memref<512x128xf32, #tpu.memory_space<vmem>>, vector<512x128xf32>
    tpu.vector_store %arg5[%c0_13, %c0_14], %27 {strides = array<i32>} : memref<512x128xf32, #tpu.memory_space<vmem>>, vector<512x128xf32>,
    return
  }
  func.func @transform_0(%arg0: i32) -> (i32, i32) {
    %c0_i32 = arith.constant 0 : i32
    %c0_i32_0 = arith.constant 0 : i32
    %c0_i32_1 = arith.constant 0 : i32
    return %c0_i32, %c0_i32_0 : i32, i32
  }
  func.func @transform_1(%arg0: i32) -> (i32, i32) {
    %c0_i32 = arith.constant 0 : i32
    %c0_i32_0 = arith.constant 0 : i32
    %c0_i32_1 = arith.constant 0 : i32
    return %c0_i32, %c0_i32_0 : i32, i32
  }
  func.func @transform_2(%arg0: i32) -> (i32, i32) {
    %c0_i32 = arith.constant 0 : i32
    %c0_i32_0 = arith.constant 0 : i32
    %c0_i32_1 = arith.constant 0 : i32
    return %c0_i32, %c0_i32_0 : i32, i32
  }
  func.func @transform_3(%arg0: i32) -> (i32, i32) {
    %c0_i32 = arith.constant 0 : i32
    %c0_i32_0 = arith.constant 0 : i32
    %c0_i32_1 = arith.constant 0 : i32
    return %c0_i32, %c0_i32_0 : i32, i32
  }
  func.func @transform_4(%arg0: i32) -> (i32, i32) {
    %c0_i32 = arith.constant 0 : i32
    %c0_i32_0 = arith.constant 0 : i32
    %c0_i32_1 = arith.constant 0 : i32
    return %c0_i32, %c0_i32_0 : i32, i32
  }
}

</mosaic_0001>

<bundles_post_ra>
// kernel: tpu_custom_call.1
= control target key start
LH: loop header
LB: loop body
LE: loop exit
PB: predicated region body
PF: predicated region fallthrough
CT: control target
= control target key end

     0   :  { %9 = vsyncpa [#allocation3], 0  ;;  %s6006_s0 = inlined_call_operand.hbm [shape: bf16[512,512], index: 0, kind: input, shape index: {}]   ;;  %s6007_s1 = inlined_call_operand.hbm [shape: bf16[512,128], index: 1, kind: input, shape index: {}]   ;;  %s6008_s2 = inlined_call_operand.hbm [shape: bf16[128,128], index: 2, kind: input, shape index: {}]   ;;  %s6009_s3 = inlined_call_operand.vmem [shape: f32[1,128], index: 3, kind: input, shape index: {}]   ;;  %s6010_s4 = inlined_call_operand.hbm [shape: f32[512,128], index: 4, kind: output, shape index: {}]  }
   0x1   :  { %10 = vsyncpa [#allocation6], 0 }
   0x2   :  { %11 = vsyncpa [#allocation4], 0  ;;  %s4519_s15 = smov [#allocation5]  }
   0x3   :  { %s29_s16 = sshll.u32 %s4519_s15, 4  ;;  %s30_s16 = int_to_ptr.vmem [resolvable:$true] %s29_s16 }
   0x4   :  { %s4441_s17 = scalar_lea.vmem %s30_s16, 4096  ;;  %p4446_p1 = scmp.lt.s32.totalorder %s30_s16, %s30_s16 }
   0x5   :  { %p4442_p0 = scmp.ne.s32.totalorder %s30_s16, %s4441_s17  ;;  %p4447_p2 = scmp.lt.s32.totalorder %s4441_s17, %s4441_s17 }
   0x7   :  { %p4448_p3 = por %p4447_p2, %p4446_p1 }
   0x9   :  { %p4449_p4 = pnand %p4448_p3, %p4442_p0 }
   0xb   :  { %4452 = shalt.err (!%p4449_p4)
}
   0xc   :  { %s4520_s18 = smov 64   ;;  %s4521_s19 = smov 4  }
   0xd   :  { %35 = dma.hbm_to_vmem [thread:$0]  %s6007_s1, 4096, %s30_s16, [#allocation6], %s4520_s18, %s4520_s18, %s4521_s19  }
   0xe   :  { %s4522_s22 = smov [#allocation2]  }
   0xf   :  { %s17_s23 = sshll.u32 %s4522_s22, 4  ;;  %s18_s23 = int_to_ptr.vmem [resolvable:$true] %s17_s23 }
  0x10   :  { %s4461_s24 = scalar_lea.vmem %s18_s23, 16384  ;;  %p4466_p6 = scmp.lt.s32.totalorder %s18_s23, %s18_s23 }
  0x11   :  { %p4462_p5 = scmp.ne.s32.totalorder %s18_s23, %s4461_s24  ;;  %p4467_p7 = scmp.lt.s32.totalorder %s4461_s24, %s4461_s24 }
  0x13   :  { %p4468_p8 = por %p4467_p7, %p4466_p6 }
  0x15   :  { %p4469_p9 = pnand %p4468_p8, %p4462_p5 }
  0x17   :  { %4472 = shalt.err (!%p4469_p9)
}
  0x18   :  { %s4523_s25 = smov 256   ;;  %s4524_s26 = smov 16  }
  0x19   :  { %23 = dma.hbm_to_vmem [thread:$0]  %s6006_s0, 16384, %s18_s23, [#allocation3], %s4523_s25, %s4523_s25, %s4524_s26  }
  0x1a   :  { %s4525_s29 = smov [#allocation7]  }
  0x1b   :  { %s41_s30 = sshll.u32 %s4525_s29, 4  ;;  %s42_s30 = int_to_ptr.vmem [resolvable:$true] %s41_s30 }
  0x1c   :  { %s4481_s1 = scalar_lea.vmem %s42_s30, 1024  ;;  %p4486_p11 = scmp.lt.s32.totalorder %s42_s30, %s42_s30 }
  0x1d   :  { %p4482_p10 = scmp.ne.s32.totalorder %s42_s30, %s4481_s1  ;;  %p4487_p12 = scmp.lt.s32.totalorder %s4481_s1, %s4481_s1 }
  0x1f   :  { %p4488_p13 = por %p4487_p12, %p4486_p11 }
  0x21   :  { %p4489_p0 = pnand %p4488_p13, %p4482_p10 }
  0x23   :  { %4492 = shalt.err (!%p4489_p0)
}
  0x24   :  { %47 = dma.hbm_to_vmem [thread:$0]  %s6008_s2, 1024, %s42_s30, [#allocation6], %s4520_s18, %s4520_s18, %s4521_s19  }
  0x25   :  { %4513 = dma.done.wait [#allocation3], 16384  }
  0x26   :  { %4514 = vsyncadd [#allocation3], 4294950912 }
  0x27   :  { %4515 = dma.done.wait [#allocation6], 5120  }
  0x28   :  { %4516 = vsyncadd [#allocation6], 4294962176  ;;  %v3833_v0 = vld [vmem:[#allocation7 + $0x38] sm:$0xff]   ;;  %v3834_v1 = vld [vmem:[#allocation7 + $0x30] sm:$0xff]   ;;  %v4526_v40 = vmov 0  }
  0x29   :  { %3726 = vmatprep.subr.bf16.mxu0 %v3833_v0  ;;  %3806 = vmatprep.subr.bf16.mxu1 %v3833_v0  ;;  %v3835_v2 = vld [vmem:[#allocation7 + $0x28] sm:$0xff]   ;;  %v3836_v3 = vld [vmem:[#allocation7 + $0x20] sm:$0xff]   ;;  %v3837_v6 = vld [vmem:[#allocation7 + $0x18] sm:$0xff]  }
  0x2a   :  { %3727 = vmatpush3.bf16.msra.mxu0 %v3833_v0  ;;  %3814 = vmatpush3.bf16.msra.mxu1 %v3833_v0  ;;  %v3841_v4 = vld [vmem:[#allocation5] sm:$0xff]   ;;  %v3838_v7 = vld [vmem:[#allocation7 + $0x10] sm:$0xff]   ;;  %v3839_v8 = vld [vmem:[#allocation7 + $0x8] sm:$0xff]  }
  0x2b   :  { %3728 = vmatprep.subr.bf16.mxu0 %v3834_v1  ;;  %3807 = vmatprep.subr.bf16.mxu1 %v3834_v1  ;;  %v3842_v5 = vld [vmem:[#allocation5 + $0x80] sm:$0xff]   ;;  %v3843_v10 = vld [vmem:[#allocation5 + $0x8] sm:$0xff]   ;;  %v3845_v12 = vld [vmem:[#allocation5 + $0x10] sm:$0xff]  }
  0x2c   :  { %3742 = vmatprep.mubr.bf16.mxu0 %v3841_v4  ;;  %3774 = vmatprep.mubr.bf16.mxu1 %v3842_v5  ;;  %v3840_v9 = vld [vmem:[#allocation7] sm:$0xff]   ;;  %v3844_v11 = vld [vmem:[#allocation5 + $0x88] sm:$0xff]   ;;  %v3846_v13 = vld [vmem:[#allocation5 + $0x90] sm:$0xff]  }
  0x2d   :  { %v3847_v14 = vld [vmem:[#allocation5 + $0x18] sm:$0xff]   ;;  %v3849_v16 = vld [vmem:[#allocation5 + $0x20] sm:$0xff]   ;;  %v3851_v18 = vld [vmem:[#allocation5 + $0x28] sm:$0xff]  }
  0x2e   :  { %3729 = vmatpush3.bf16.msra.mxu0 %v3834_v1  ;;  %3815 = vmatpush3.bf16.msra.mxu1 %v3834_v1  ;;  %v3848_v15 = vld [vmem:[#allocation5 + $0x98] sm:$0xff]   ;;  %v3850_v17 = vld [vmem:[#allocation5 + $0xa0] sm:$0xff]   ;;  %v3852_v19 = vld [vmem:[#allocation5 + $0xa8] sm:$0xff]  }
  0x2f   :  { %3730 = vmatprep.subr.bf16.mxu0 %v3835_v2  ;;  %3808 = vmatprep.subr.bf16.mxu1 %v3835_v2  ;;  %v3853_v20 = vld [vmem:[#allocation5 + $0x30] sm:$0xff]   ;;  %v3855_v22 = vld [vmem:[#allocation5 + $0x38] sm:$0xff]   ;;  %v3857_v24 = vld [vmem:[#allocation5 + $0x40] sm:$0xff]  }
  0x30   :  { %v3854_v21 = vld [vmem:[#allocation5 + $0xb0] sm:$0xff]   ;;  %v3856_v23 = vld [vmem:[#allocation5 + $0xb8] sm:$0xff]   ;;  %v3858_v25 = vld [vmem:[#allocation5 + $0xc0] sm:$0xff]  }
  0x31   :  { %v3859_v26 = vld [vmem:[#allocation5 + $0x48] sm:$0xff]   ;;  %v3861_v28 = vld [vmem:[#allocation5 + $0x50] sm:$0xff]   ;;  %v3863_v30 = vld [vmem:[#allocation5 + $0x58] sm:$0xff]  }
  0x32   :  { %3731 = vmatpush3.bf16.msra.mxu0 %v3835_v2  ;;  %3816 = vmatpush3.bf16.msra.mxu1 %v3835_v2  ;;  %v3860_v27 = vld [vmem:[#allocation5 + $0xc8] sm:$0xff]   ;;  %v3862_v29 = vld [vmem:[#allocation5 + $0xd0] sm:$0xff]   ;;  %v3864_v31 = vld [vmem:[#allocation5 + $0xd8] sm:$0xff]  }
  0x33   :  { %3732 = vmatprep.subr.bf16.mxu0 %v3836_v3  ;;  %3809 = vmatprep.subr.bf16.mxu1 %v3836_v3  ;;  %v3865_v32 = vld [vmem:[#allocation5 + $0x60] sm:$0xff]   ;;  %v3867_v34 = vld [vmem:[#allocation5 + $0x68] sm:$0xff]   ;;  %v3869_v36 = vld [vmem:[#allocation5 + $0x70] sm:$0xff]  }
  0x34   :  { %v3866_v33 = vld [vmem:[#allocation5 + $0xe0] sm:$0xff]   ;;  %v3868_v35 = vld [vmem:[#allocation5 + $0xe8] sm:$0xff]   ;;  %v3870_v37 = vld [vmem:[#allocation5 + $0xf0] sm:$0xff]  }
  0x35   :  { %v3871_v38 = vld [vmem:[#allocation5 + $0x78] sm:$0xff]   ;;  %v4566_v41 = vld [vmem:[#allocation2 + $0x4] ss:$16 sps:$4 sm:$0xff]  }
  0x36   :  { %3733 = vmatpush3.bf16.msra.mxu0 %v3836_v3  ;;  %3817 = vmatpush3.bf16.msra.mxu1 %v3836_v3  ;;  %v3872_v39 = vld [vmem:[#allocation5 + $0xf8] sm:$0xff]  }
  0x37   :  { %3734 = vmatprep.subr.bf16.mxu0 %v3837_v6  ;;  %3810 = vmatprep.subr.bf16.mxu1 %v3837_v6  ;;  %v4568_v42 = vld [vmem:[#allocation2 + $0xc] ss:$16 sps:$4 sm:$0xff]  }
  0x3a   :  { %3735 = vmatpush3.bf16.msra.mxu0 %v3837_v6  ;;  %3818 = vmatpush3.bf16.msra.mxu1 %v3837_v6 }
  0x3b   :  { %3736 = vmatprep.subr.bf16.mxu0 %v3838_v7  ;;  %3811 = vmatprep.subr.bf16.mxu1 %v3838_v7 }
  0x3e   :  { %3737 = vmatpush3.bf16.msra.mxu0 %v3838_v7  ;;  %3819 = vmatpush3.bf16.msra.mxu1 %v3838_v7 }
  0x3f   :  { %3738 = vmatprep.subr.bf16.mxu0 %v3839_v8  ;;  %3812 = vmatprep.subr.bf16.mxu1 %v3839_v8 }
  0x42   :  { %3739 = vmatpush3.bf16.msra.mxu0 %v3839_v8  ;;  %3820 = vmatpush3.bf16.msra.mxu1 %v3839_v8 }
  0x43   :  { %3740 = vmatprep.subr.bf16.mxu0 %v3840_v9  ;;  %3813 = vmatprep.subr.bf16.mxu1 %v3840_v9 }
  0x46   :  { %3741 = vmatpush3.bf16.msra.mxu0 %v3840_v9  ;;  %3821 = vmatpush3.bf16.msra.mxu1 %v3840_v9 }
  0x47   :  { %1469 = vmatprep.subr.bf16.mxu1 %v4526_v40  ;;  %1758 = vmatprep.subr.bf16.mxu0 %v4526_v40 }
  0x49   :  { %3743 = vmatmul.mubr.bf16.vlgmr.msra.gmra.mxu0 %v3843_v10  ;;  %3775 = vmatmul.mubr.bf16.vlgmr.msra.gmra.mxu1 %v3844_v11 }
  0x4a   :  { %3746 = vmatprep.mubr.bf16.mxu0 %v3845_v12  ;;  %3778 = vmatprep.mubr.bf16.mxu1 %v3846_v13 }
  0x51   :  { %3747 = vmatmul.mubr.bf16.gmra.mxu0 %v3847_v14  ;;  %3779 = vmatmul.mubr.bf16.gmra.mxu1 %v3848_v15 }
  0x52   :  { %3750 = vmatprep.mubr.bf16.mxu0 %v3849_v16  ;;  %3782 = vmatprep.mubr.bf16.mxu1 %v3850_v17 }
  0x59   :  { %3751 = vmatmul.mubr.bf16.gmra.mxu0 %v3851_v18  ;;  %3783 = vmatmul.mubr.bf16.gmra.mxu1 %v3852_v19 }
  0x5a   :  { %3754 = vmatprep.mubr.bf16.mxu0 %v3853_v20  ;;  %3786 = vmatprep.mubr.bf16.mxu1 %v3854_v21 }
  0x61   :  { %3755 = vmatmul.mubr.bf16.gmra.mxu0 %v3855_v22  ;;  %3787 = vmatmul.mubr.bf16.gmra.mxu1 %v3856_v23 }
  0x62   :  { %3758 = vmatprep.mubr.bf16.mxu0 %v3857_v24  ;;  %3790 = vmatprep.mubr.bf16.mxu1 %v3858_v25 }
  0x69   :  { %3759 = vmatmul.mubr.bf16.gmra.mxu0 %v3859_v26  ;;  %3791 = vmatmul.mubr.bf16.gmra.mxu1 %v3860_v27 }
  0x6a   :  { %3762 = vmatprep.mubr.bf16.mxu0 %v3861_v28  ;;  %3794 = vmatprep.mubr.bf16.mxu1 %v3862_v29 }
  0x71   :  { %3763 = vmatmul.mubr.bf16.gmra.mxu0 %v3863_v30  ;;  %3795 = vmatmul.mubr.bf16.gmra.mxu1 %v3864_v31 }
  0x72   :  { %3766 = vmatprep.mubr.bf16.mxu0 %v3865_v32  ;;  %3798 = vmatprep.mubr.bf16.mxu1 %v3866_v33 }
  0x79   :  { %3767 = vmatmul.mubr.bf16.gmra.mxu0 %v3867_v34  ;;  %3799 = vmatmul.mubr.bf16.gmra.mxu1 %v3868_v35 }
  0x7a   :  { %3770 = vmatprep.mubr.bf16.mxu0 %v3869_v36  ;;  %3802 = vmatprep.mubr.bf16.mxu1 %v3870_v37 }
  0x81   :  { %3771 = vmatmul.mubr.bf16.gmra.mxu0 %v3871_v38  ;;  %3803 = vmatmul.mubr.bf16.gmra.mxu1 %v3872_v39 }
  0x82   :  { %1501 = vmatprep.mubr.bf16.mxu1 %v4566_v41  ;;  %1790 = vmatprep.mubr.bf16.mxu0 %v4568_v42 }
 0x109   :  { %v4572_v43 = vpop.f32.mrf.mxu0  ;;  %v4574_v44 = vpop.f32.mrf.mxu1 }
 0x10b   :  { %v4576_v45 = vpop.f32.mrf.mxu0  ;;  %v4578_v46 = vpop.f32.mrf.mxu1 }
 0x10d   :  { %v4580_v47 = vpop.f32.mrf.mxu0  ;;  %v4582_v48 = vpop.f32.mrf.mxu1 }
 0x10f   :  { %v4584_v49 = vpop.f32.mrf.mxu0  ;;  %v4586_v50 = vpop.f32.mrf.mxu1 }
 0x111   :  { %v4588_v51 = vpop.f32.mrf.mxu0  ;;  %v4590_v52 = vpop.f32.mrf.mxu1 }
 0x113   :  { %v4592_v53 = vpop.f32.mrf.mxu0  ;;  %v4594_v54 = vpop.f32.mrf.mxu1 }
 0x115   :  { %v3749_v55 = vpop.f32.mrf.mxu0  ;;  %v3781_v56 = vpop.f32.mrf.mxu1 }
 0x116   :  { %v800_v33 = vpack.c.bf16 %v3749_v55, %v4588_v51  ;;  %v816_v34 = vpack.c.bf16 %v3781_v56, %v4590_v52 }
 0x117   :  { %v4596_v57 = vpop.f32.mrf.mxu0  ;;  %v4598_v58 = vpop.f32.mrf.mxu1 }
 0x118   :  { %v799_v39 = vpack.c.bf16 %v4596_v57, %v4592_v53  ;;  %v815_v51 = vpack.c.bf16 %v4598_v58, %v4594_v54 }
 0x119   :  { %v3752_v59 = vpop.f32.mrf.mxu0  ;;  %v3784_v60 = vpop.f32.mrf.mxu1 }
 0x11b   :  { %v574_v61 = vpop.f32.mrf.mxu0  ;;  %v702_v62 = vpop.f32.mrf.mxu1 }
 0x11d   :  { %v3753_v63 = vpop.f32.mrf.mxu0  ;;  %v3785_v0 = vpop.f32.mrf.mxu1 }
 0x11e   :  { %v802_v21 = vpack.c.bf16 %v3753_v63, %v3752_v59  ;;  %v818_v22 = vpack.c.bf16 %v3785_v0, %v3784_v60  ;;  %v798_v60 = vpack.c.bf16 %v4580_v47, %v4572_v43  ;;  %v813_v63 = vpack.c.bf16 %v4586_v50, %v4578_v46 }
 0x11f   :  { %v577_v1 = vpop.f32.mrf.mxu0  ;;  %v705_v2 = vpop.f32.mrf.mxu1 }
 0x120   :  { %v801_v27 = vpack.c.bf16 %v577_v1, %v574_v61  ;;  %v817_v28 = vpack.c.bf16 %v705_v2, %v702_v62  ;;  %v814_v61 = vpack.c.bf16 %v4582_v48, %v4574_v44  ;;  %v797_v62 = vpack.c.bf16 %v4584_v49, %v4576_v45 }
 0x121   :  { %v3756_v3 = vpop.f32.mrf.mxu0  ;;  %v3788_v4 = vpop.f32.mrf.mxu1 }
 0x123   :  { %v590_v5 = vpop.f32.mrf.mxu0  ;;  %v718_v6 = vpop.f32.mrf.mxu1 }
 0x125   :  { %v3757_v7 = vpop.f32.mrf.mxu0  ;;  %v3789_v8 = vpop.f32.mrf.mxu1 }
 0x126   :  { %v804_v9 = vpack.c.bf16 %v3757_v7, %v3756_v3  ;;  %v820_v10 = vpack.c.bf16 %v3789_v8, %v3788_v4 }
 0x127   :  { %v593_v11 = vpop.f32.mrf.mxu0  ;;  %v721_v12 = vpop.f32.mrf.mxu1 }
 0x128   :  { %1470 = vmatpush1.bf16.msra.mxu1 %v804_v9  ;;  %1759 = vmatpush1.bf16.msra.mxu0 %v820_v10  ;;  %v803_v15 = vpack.c.bf16 %v593_v11, %v590_v5  ;;  %v819_v16 = vpack.c.bf16 %v721_v12, %v718_v6 }
 0x129   :  { %v4600_v13 = vpop.f32.mrf.mxu0  ;;  %v4602_v14 = vpop.f32.mrf.mxu1  ;;  %1471 = vmatprep.subr.bf16.mxu1 %v4526_v40  ;;  %1760 = vmatprep.subr.bf16.mxu0 %v4526_v40 }
 0x12b   :  { %v4606_v17 = vpop.f32.mrf.mxu0  ;;  %v4608_v18 = vpop.f32.mrf.mxu1 }
 0x12c   :  { %1472 = vmatpush1.bf16.msra.mxu1 %v803_v15  ;;  %1761 = vmatpush1.bf16.msra.mxu0 %v819_v16  ;;  %v4692_v16 = vld [vmem:[#allocation2] ss:$16 sps:$4 sm:$0xff]  }
 0x12d   :  { %v4610_v19 = vpop.f32.mrf.mxu0  ;;  %v4612_v20 = vpop.f32.mrf.mxu1  ;;  %1473 = vmatprep.subr.bf16.mxu1 %v4526_v40  ;;  %1762 = vmatprep.subr.bf16.mxu0 %v4526_v40 }
 0x12e   :  { %v806_v10 = vpack.c.bf16 %v4610_v19, %v4600_v13  ;;  %v822_v11 = vpack.c.bf16 %v4612_v20, %v4602_v14  ;;  %v4694_v13 = vld [vmem:[#allocation2 + $0x24] ss:$16 sps:$4 sm:$0xff]   ;;  %v3881_v14 = vld [vmem:[#allocation2 + $0x2c] ss:$16 sps:$4 sm:$0xff]  }
 0x12f   :  { %v4616_v23 = vpop.f32.mrf.mxu0  ;;  %v4618_v24 = vpop.f32.mrf.mxu1  ;;  %v4702_v19 = vld [vmem:[#allocation2 + $0x44] ss:$16 sps:$4 sm:$0xff]   ;;  %v3887_v20 = vld [vmem:[#allocation2 + $0x4c] ss:$16 sps:$4 sm:$0xff]  }
 0x130   :  { %1474 = vmatpush1.bf16.msra.mxu1 %v802_v21  ;;  %1763 = vmatpush1.bf16.msra.mxu0 %v818_v22  ;;  %v805_v12 = vpack.c.bf16 %v4616_v23, %v4606_v17  ;;  %v821_v15 = vpack.c.bf16 %v4618_v24, %v4608_v18  ;;  %v3876_v21 = vld [vmem:[#allocation2 + $0x8] ss:$16 sps:$4 sm:$0xff]   ;;  %v4700_v17 = vld [vmem:[#allocation2 + $0x20] ss:$16 sps:$4 sm:$0xff]   ;;  %v4708_v24 = vld [vmem:[#allocation2 + $0x64] ss:$16 sps:$4 sm:$0xff]  }
 0x131   :  { %v4620_v25 = vpop.f32.mrf.mxu0  ;;  %v4622_v26 = vpop.f32.mrf.mxu1  ;;  %1475 = vmatprep.subr.bf16.mxu1 %v4526_v40  ;;  %1764 = vmatprep.subr.bf16.mxu0 %v4526_v40  ;;  %v3884_v18 = vld [vmem:[#allocation2 + $0x28] ss:$16 sps:$4 sm:$0xff]   ;;  %v4706_v22 = vld [vmem:[#allocation2 + $0x40] ss:$16 sps:$4 sm:$0xff]  }
 0x132   :  { %v3890_v23 = vld [vmem:[#allocation2 + $0x48] ss:$16 sps:$4 sm:$0xff]  }
 0x133   :  { %v4626_v29 = vpop.f32.mrf.mxu0  ;;  %v4628_v30 = vpop.f32.mrf.mxu1 }
 0x134   :  { %1476 = vmatpush1.bf16.msra.mxu1 %v801_v27  ;;  %1765 = vmatpush1.bf16.msra.mxu0 %v817_v28  ;;  %v3896_v27 = vld [vmem:[#allocation2 + $0x68] ss:$16 sps:$4 sm:$0xff]   ;;  %v4714_v28 = vld [vmem:[#allocation2 + $0x84] ss:$16 sps:$4 sm:$0xff]  }
 0x135   :  { %v4630_v31 = vpop.f32.mrf.mxu0  ;;  %v4632_v32 = vpop.f32.mrf.mxu1  ;;  %1477 = vmatprep.subr.bf16.mxu1 %v4526_v40  ;;  %1766 = vmatprep.subr.bf16.mxu0 %v4526_v40 }
 0x136   :  { %v808_v6 = vpack.c.bf16 %v4630_v31, %v4620_v25  ;;  %v824_v7 = vpack.c.bf16 %v4632_v32, %v4622_v26  ;;  %v3893_v25 = vld [vmem:[#allocation2 + $0x6c] ss:$16 sps:$4 sm:$0xff]   ;;  %v4712_v26 = vld [vmem:[#allocation2 + $0x60] ss:$16 sps:$4 sm:$0xff]   ;;  %v3902_v31 = vld [vmem:[#allocation2 + $0x88] ss:$16 sps:$4 sm:$0xff]  }
 0x137   :  { %v4638_v35 = vpop.f32.mrf.mxu0  ;;  %v4640_v36 = vpop.f32.mrf.mxu1  ;;  %v3903_v32 = vld [vmem:[#allocation2 + $0xa4] ss:$16 sps:$4 sm:$0xff]  }
 0x138   :  { %1478 = vmatpush1.bf16.msra.mxu1 %v800_v33  ;;  %1767 = vmatpush1.bf16.msra.mxu0 %v816_v34  ;;  %v807_v8 = vpack.c.bf16 %v4638_v35, %v4626_v29  ;;  %v823_v9 = vpack.c.bf16 %v4640_v36, %v4628_v30  ;;  %v3899_v29 = vld [vmem:[#allocation2 + $0x8c] ss:$16 sps:$4 sm:$0xff]   ;;  %v3901_v30 = vld [vmem:[#allocation2 + $0x80] ss:$16 sps:$4 sm:$0xff]   ;;  %v3908_v35 = vld [vmem:[#allocation2 + $0xa8] ss:$16 sps:$4 sm:$0xff]  }
 0x139   :  { %v3768_v37 = vpop.f32.mrf.mxu0  ;;  %v3800_v38 = vpop.f32.mrf.mxu1  ;;  %1479 = vmatprep.subr.bf16.mxu1 %v4526_v40  ;;  %1768 = vmatprep.subr.bf16.mxu0 %v4526_v40  ;;  %v3905_v33 = vld [vmem:[#allocation2 + $0xac] ss:$16 sps:$4 sm:$0xff]   ;;  %v3907_v34 = vld [vmem:[#allocation2 + $0xa0] ss:$16 sps:$4 sm:$0xff]   ;;  %v3909_v36 = vld [vmem:[#allocation2 + $0xc4] ss:$16 sps:$4 sm:$0xff]  }
 0x13b   :  { %v638_v55 = vpop.f32.mrf.mxu0  ;;  %v766_v52 = vpop.f32.mrf.mxu1 }
 0x13c   :  { %1480 = vmatpush1.bf16.msra.mxu1 %v799_v39  ;;  %1769 = vmatpush1.bf16.msra.mxu0 %v815_v51  ;;  %v3914_v39 = vld [vmem:[#allocation2 + $0xc8] ss:$16 sps:$4 sm:$0xff]   ;;  %v3915_v51 = vld [vmem:[#allocation2 + $0xe4] ss:$16 sps:$4 sm:$0xff]  }
 0x13d   :  { %v3769_v56 = vpop.f32.mrf.mxu0  ;;  %v3801_v59 = vpop.f32.mrf.mxu1  ;;  %1481 = vmatprep.subr.bf16.mxu1 %v4526_v40  ;;  %1770 = vmatprep.subr.bf16.mxu0 %v4526_v40 }
 0x13e   :  { %v810_v49 = vpack.c.bf16 %v3769_v56, %v3768_v37  ;;  %v826_v50 = vpack.c.bf16 %v3801_v59, %v3800_v38  ;;  %v3911_v37 = vld [vmem:[#allocation2 + $0xcc] ss:$16 sps:$4 sm:$0xff]   ;;  %v3913_v38 = vld [vmem:[#allocation2 + $0xc0] ss:$16 sps:$4 sm:$0xff]   ;;  %v3920_v56 = vld [vmem:[#allocation2 + $0xe8] ss:$16 sps:$4 sm:$0xff]  }
 0x13f   :  { %v641_v53 = vpop.f32.mrf.mxu0  ;;  %v769_v57 = vpop.f32.mrf.mxu1  ;;  %v3921_v59 = vld [vmem:[#allocation2 + $0x104] ss:$16 sps:$4 sm:$0xff]  }
 0x140   :  { %1482 = vmatpush1.bf16.msra.mxu1 %v798_v60  ;;  %1771 = vmatpush1.bf16.msra.mxu0 %v814_v61  ;;  %v809_v4 = vpack.c.bf16 %v641_v53, %v638_v55  ;;  %v825_v5 = vpack.c.bf16 %v769_v57, %v766_v52  ;;  %v3917_v55 = vld [vmem:[#allocation2 + $0xec] ss:$16 sps:$4 sm:$0xff]   ;;  %v3919_v52 = vld [vmem:[#allocation2 + $0xe0] ss:$16 sps:$4 sm:$0xff]   ;;  %v3926_v53 = vld [vmem:[#allocation2 + $0x108] ss:$16 sps:$4 sm:$0xff]  }
 0x141   :  { %v3772_v54 = vpop.f32.mrf.mxu0  ;;  %v3804_v58 = vpop.f32.mrf.mxu1  ;;  %1483 = vmatprep.subr.bf16.mxu1 %v4526_v40  ;;  %1772 = vmatprep.subr.bf16.mxu0 %v4526_v40  ;;  %v3923_v60 = vld [vmem:[#allocation2 + $0x10c] ss:$16 sps:$4 sm:$0xff]   ;;  %v3925_v61 = vld [vmem:[#allocation2 + $0x100] ss:$16 sps:$4 sm:$0xff]   ;;  %v3927_v57 = vld [vmem:[#allocation2 + $0x124] ss:$16 sps:$4 sm:$0xff]  }
 0x143   :  { %v654_v43 = vpop.f32.mrf.mxu0  ;;  %v782_v47 = vpop.f32.mrf.mxu1 }
 0x144   :  { %1484 = vmatpush1.bf16.msra.mxu1 %v797_v62  ;;  %1773 = vmatpush1.bf16.msra.mxu0 %v813_v63  ;;  %v3932_v62 = vld [vmem:[#allocation2 + $0x128] ss:$16 sps:$4 sm:$0xff]   ;;  %v3933_v63 = vld [vmem:[#allocation2 + $0x144] ss:$16 sps:$4 sm:$0xff]  }
 0x145   :  { %v3773_v44 = vpop.f32.mrf.mxu0  ;;  %v3805_v48 = vpop.f32.mrf.mxu1  ;;  %1485 = vmatprep.subr.bf16.mxu1 %v4526_v40  ;;  %1774 = vmatprep.subr.bf16.mxu0 %v4526_v40 }
 0x146   :  { %v812_v0 = vpack.c.bf16 %v3773_v44, %v3772_v54  ;;  %v828_v1 = vpack.c.bf16 %v3805_v48, %v3804_v58  ;;  %v3929_v54 = vld [vmem:[#allocation2 + $0x12c] ss:$16 sps:$4 sm:$0xff]   ;;  %v3931_v58 = vld [vmem:[#allocation2 + $0x120] ss:$16 sps:$4 sm:$0xff]   ;;  %v3938_v44 = vld [vmem:[#allocation2 + $0x148] ss:$16 sps:$4 sm:$0xff]  }
 0x147   :  { %v657_v2 = vpop.f32.mrf.mxu0  ;;  %v785_v3 = vpop.f32.mrf.mxu1  ;;  %v3939_v48 = vld [vmem:[#allocation2 + $0x164] ss:$16 sps:$4 sm:$0xff]  }
 0x148   :  { %1486 = vmatpush2.bf16.msra.mxu1 %v812_v0  ;;  %1775 = vmatpush2.bf16.msra.mxu0 %v828_v1  ;;  %v811_v45 = vpack.c.bf16 %v657_v2, %v654_v43  ;;  %v827_v46 = vpack.c.bf16 %v785_v3, %v782_v47  ;;  %v3935_v43 = vld [vmem:[#allocation2 + $0x14c] ss:$16 sps:$4 sm:$0xff]   ;;  %v3937_v47 = vld [vmem:[#allocation2 + $0x140] ss:$16 sps:$4 sm:$0xff]   ;;  %v3944_v2 = vld [vmem:[#allocation2 + $0x168] ss:$16 sps:$4 sm:$0xff]  }
 0x149   :  { %1487 = vmatprep.subr.bf16.mxu1 %v4526_v40  ;;  %1776 = vmatprep.subr.bf16.mxu0 %v4526_v40  ;;  %v3941_v0 = vld [vmem:[#allocation2 + $0x16c] ss:$16 sps:$4 sm:$0xff]   ;;  %v3943_v1 = vld [vmem:[#allocation2 + $0x160] ss:$16 sps:$4 sm:$0xff]   ;;  %v3945_v3 = vld [vmem:[#allocation2 + $0x184] ss:$16 sps:$4 sm:$0xff]  }
 0x14c   :  { %1488 = vmatpush2.bf16.msra.mxu1 %v811_v45  ;;  %1777 = vmatpush2.bf16.msra.mxu0 %v827_v46  ;;  %v3947_v45 = vld [vmem:[#allocation2 + $0x18c] ss:$16 sps:$4 sm:$0xff]   ;;  %v3949_v46 = vld [vmem:[#allocation2 + $0x180] ss:$16 sps:$4 sm:$0xff]  }
 0x14d   :  { %1489 = vmatprep.subr.bf16.mxu1 %v4526_v40  ;;  %1778 = vmatprep.subr.bf16.mxu0 %v4526_v40 }
 0x150   :  { %1490 = vmatpush2.bf16.msra.mxu1 %v810_v49  ;;  %1779 = vmatpush2.bf16.msra.mxu0 %v826_v50  ;;  %v3950_v49 = vld [vmem:[#allocation2 + $0x188] ss:$16 sps:$4 sm:$0xff]   ;;  %v3951_v50 = vld [vmem:[#allocation2 + $0x1a4] ss:$16 sps:$4 sm:$0xff]  }
 0x151   :  { %1491 = vmatprep.subr.bf16.mxu1 %v4526_v40  ;;  %1780 = vmatprep.subr.bf16.mxu0 %v4526_v40 }
 0x154   :  { %1492 = vmatpush2.bf16.msra.mxu1 %v809_v4  ;;  %1781 = vmatpush2.bf16.msra.mxu0 %v825_v5  ;;  %v3953_v4 = vld [vmem:[#allocation2 + $0x1ac] ss:$16 sps:$4 sm:$0xff]   ;;  %v3955_v5 = vld [vmem:[#allocation2 + $0x1a0] ss:$16 sps:$4 sm:$0xff]  }
 0x155   :  { %1493 = vmatprep.subr.bf16.mxu1 %v4526_v40  ;;  %1782 = vmatprep.subr.bf16.mxu0 %v4526_v40 }
 0x158   :  { %1494 = vmatpush2.bf16.msra.mxu1 %v808_v6  ;;  %1783 = vmatpush2.bf16.msra.mxu0 %v824_v7  ;;  %v3956_v6 = vld [vmem:[#allocation2 + $0x1a8] ss:$16 sps:$4 sm:$0xff]   ;;  %v3957_v7 = vld [vmem:[#allocation2 + $0x1c4] ss:$16 sps:$4 sm:$0xff]  }
 0x159   :  { %1495 = vmatprep.subr.bf16.mxu1 %v4526_v40  ;;  %1784 = vmatprep.subr.bf16.mxu0 %v4526_v40 }
 0x15c   :  { %1496 = vmatpush2.bf16.msra.mxu1 %v807_v8  ;;  %1785 = vmatpush2.bf16.msra.mxu0 %v823_v9  ;;  %v3959_v8 = vld [vmem:[#allocation2 + $0x1cc] ss:$16 sps:$4 sm:$0xff]   ;;  %v3961_v9 = vld [vmem:[#allocation2 + $0x1c0] ss:$16 sps:$4 sm:$0xff]  }
 0x15d   :  { %1497 = vmatprep.subr.bf16.mxu1 %v4526_v40  ;;  %1786 = vmatprep.subr.bf16.mxu0 %v4526_v40 }
 0x160   :  { %1498 = vmatpush2.bf16.msra.mxu1 %v806_v10  ;;  %1787 = vmatpush2.bf16.msra.mxu0 %v822_v11  ;;  %v3962_v10 = vld [vmem:[#allocation2 + $0x1c8] ss:$16 sps:$4 sm:$0xff]   ;;  %v3963_v11 = vld [vmem:[#allocation2 + $0x1e4] ss:$16 sps:$4 sm:$0xff]  }
 0x161   :  { %1499 = vmatprep.subr.bf16.mxu1 %v4526_v40  ;;  %1788 = vmatprep.subr.bf16.mxu0 %v4526_v40 }
 0x164   :  { %1500 = vmatpush2.bf16.msra.mxu1 %v805_v12  ;;  %1789 = vmatpush2.bf16.msra.mxu0 %v821_v15  ;;  %v3965_v12 = vld [vmem:[#allocation2 + $0x1ec] ss:$16 sps:$4 sm:$0xff]   ;;  %v3967_v15 = vld [vmem:[#allocation2 + $0x1e0] ss:$16 sps:$4 sm:$0xff]  }
 0x165   :  { %2086 = vmatprep.subr.bf16.mxu1 %v4526_v40  ;;  %2375 = vmatprep.subr.bf16.mxu0 %v4526_v40 }
 0x167   :  { %1502 = vmatmul.mubr.bf16.vlgmr.msra.gmra.mxu1 %v4692_v16  ;;  %1791 = vmatmul.mubr.bf16.vlgmr.msra.gmra.mxu0 %v3876_v21  ;;  %v3968_v21 = vld [vmem:[#allocation2 + $0x1e8] ss:$16 sps:$4 sm:$0xff]  }
 0x168   :  { %1509 = vmatprep.mubr.bf16.mxu1 %v4694_v13  ;;  %1798 = vmatprep.mubr.bf16.mxu0 %v3881_v14  ;;  %v3969_v14 = vld [vmem:[#allocation2 + $0x204] ss:$16 sps:$4 sm:$0xff]  }
 0x16f   :  { %1510 = vmatmul.mubr.bf16.gmra.mxu1 %v4700_v17  ;;  %1799 = vmatmul.mubr.bf16.gmra.mxu0 %v3884_v18  ;;  %v3971_v18 = vld [vmem:[#allocation2 + $0x20c] ss:$16 sps:$4 sm:$0xff]  }
 0x170   :  { %1517 = vmatprep.mubr.bf16.mxu1 %v4702_v19  ;;  %1806 = vmatprep.mubr.bf16.mxu0 %v3887_v20  ;;  %v3973_v20 = vld [vmem:[#allocation2 + $0x200] ss:$16 sps:$4 sm:$0xff]  }
 0x177   :  { %1518 = vmatmul.mubr.bf16.gmra.mxu1 %v4706_v22  ;;  %1807 = vmatmul.mubr.bf16.gmra.mxu0 %v3890_v23  ;;  %v3974_v23 = vld [vmem:[#allocation2 + $0x208] ss:$16 sps:$4 sm:$0xff]  }
 0x178   :  { %1525 = vmatprep.mubr.bf16.mxu1 %v4708_v24  ;;  %1814 = vmatprep.mubr.bf16.mxu0 %v3893_v25  ;;  %v3975_v25 = vld [vmem:[#allocation2 + $0x224] ss:$16 sps:$4 sm:$0xff]  }
 0x17f   :  { %1526 = vmatmul.mubr.bf16.gmra.mxu1 %v4712_v26  ;;  %1815 = vmatmul.mubr.bf16.gmra.mxu0 %v3896_v27  ;;  %v3977_v27 = vld [vmem:[#allocation2 + $0x22c] ss:$16 sps:$4 sm:$0xff]  }
 0x180   :  { %1533 = vmatprep.mubr.bf16.mxu1 %v4714_v28  ;;  %1822 = vmatprep.mubr.bf16.mxu0 %v3899_v29  ;;  %v3979_v29 = vld [vmem:[#allocation2 + $0x220] ss:$16 sps:$4 sm:$0xff]  }
 0x187   :  { %1534 = vmatmul.mubr.bf16.gmra.mxu1 %v3901_v30  ;;  %1823 = vmatmul.mubr.bf16.gmra.mxu0 %v3902_v31  ;;  %v3980_v30 = vld [vmem:[#allocation2 + $0x228] ss:$16 sps:$4 sm:$0xff]   ;;  %v3981_v31 = vld [vmem:[#allocation2 + $0x244] ss:$16 sps:$4 sm:$0xff]  }
 0x188   :  { %1541 = vmatprep.mubr.bf16.mxu1 %v3903_v32  ;;  %1830 = vmatprep.mubr.bf16.mxu0 %v3905_v33  ;;  %v3983_v32 = vld [vmem:[#allocation2 + $0x24c] ss:$16 sps:$4 sm:$0xff]   ;;  %v3985_v33 = vld [vmem:[#allocation2 + $0x240] ss:$16 sps:$4 sm:$0xff]  }
 0x18f   :  { %1542 = vmatmul.mubr.bf16.gmra.mxu1 %v3907_v34  ;;  %1831 = vmatmul.mubr.bf16.gmra.mxu0 %v3908_v35  ;;  %v3986_v34 = vld [vmem:[#allocation2 + $0x248] ss:$16 sps:$4 sm:$0xff]   ;;  %v3987_v35 = vld [vmem:[#allocation2 + $0x264] ss:$16 sps:$4 sm:$0xff]  }
 0x190   :  { %1549 = vmatprep.mubr.bf16.mxu1 %v3909_v36  ;;  %1838 = vmatprep.mubr.bf16.mxu0 %v3911_v37  ;;  %v3989_v36 = vld [vmem:[#allocation2 + $0x26c] ss:$16 sps:$4 sm:$0xff]   ;;  %v3991_v37 = vld [vmem:[#allocation2 + $0x260] ss:$16 sps:$4 sm:$0xff]  }
 0x197   :  { %1550 = vmatmul.mubr.bf16.gmra.mxu1 %v3913_v38  ;;  %1839 = vmatmul.mubr.bf16.gmra.mxu0 %v3914_v39  ;;  %v3992_v38 = vld [vmem:[#allocation2 + $0x268] ss:$16 sps:$4 sm:$0xff]   ;;  %v3995_v39 = vld [vmem:[#allocation2 + $0x284] ss:$16 sps:$4 sm:$0xff]  }
 0x198   :  { %1557 = vmatprep.mubr.bf16.mxu1 %v3915_v51  ;;  %1846 = vmatprep.mubr.bf16.mxu0 %v3917_v55  ;;  %v3998_v51 = vld [vmem:[#allocation2 + $0x28c] ss:$16 sps:$4 sm:$0xff]   ;;  %v3993_v55 = vld [vmem:[#allocation2 + $0x280] ss:$16 sps:$4 sm:$0xff]  }
 0x19f   :  { %1558 = vmatmul.mubr.bf16.gmra.mxu1 %v3919_v52  ;;  %1847 = vmatmul.mubr.bf16.gmra.mxu0 %v3920_v56  ;;  %v3996_v52 = vld [vmem:[#allocation2 + $0x288] ss:$16 sps:$4 sm:$0xff]   ;;  %v4001_v56 = vld [vmem:[#allocation2 + $0x2a4] ss:$16 sps:$4 sm:$0xff]  }
 0x1a0   :  { %1565 = vmatprep.mubr.bf16.mxu1 %v3921_v59  ;;  %1854 = vmatprep.mubr.bf16.mxu0 %v3923_v60  ;;  %v4004_v59 = vld [vmem:[#allocation2 + $0x2ac] ss:$16 sps:$4 sm:$0xff]   ;;  %v3999_v60 = vld [vmem:[#allocation2 + $0x2a0] ss:$16 sps:$4 sm:$0xff]  }
 0x1a7   :  { %1566 = vmatmul.mubr.bf16.gmra.mxu1 %v3925_v61  ;;  %1855 = vmatmul.mubr.bf16.gmra.mxu0 %v3926_v53  ;;  %v4002_v61 = vld [vmem:[#allocation2 + $0x2a8] ss:$16 sps:$4 sm:$0xff]   ;;  %v4007_v53 = vld [vmem:[#allocation2 + $0x2c4] ss:$16 sps:$4 sm:$0xff]  }
 0x1a8   :  { %1573 = vmatprep.mubr.bf16.mxu1 %v3927_v57  ;;  %1862 = vmatprep.mubr.bf16.mxu0 %v3929_v54  ;;  %v4010_v57 = vld [vmem:[#allocation2 + $0x2cc] ss:$16 sps:$4 sm:$0xff]   ;;  %v4005_v54 = vld [vmem:[#allocation2 + $0x2c0] ss:$16 sps:$4 sm:$0xff]  }
 0x1af   :  { %1574 = vmatmul.mubr.bf16.gmra.mxu1 %v3931_v58  ;;  %1863 = vmatmul.mubr.bf16.gmra.mxu0 %v3932_v62  ;;  %v4008_v58 = vld [vmem:[#allocation2 + $0x2c8] ss:$16 sps:$4 sm:$0xff]   ;;  %v4013_v62 = vld [vmem:[#allocation2 + $0x2e4] ss:$16 sps:$4 sm:$0xff]  }
 0x1b0   :  { %1581 = vmatprep.mubr.bf16.mxu1 %v3933_v63  ;;  %1870 = vmatprep.mubr.bf16.mxu0 %v3935_v43  ;;  %v4016_v63 = vld [vmem:[#allocation2 + $0x2ec] ss:$16 sps:$4 sm:$0xff]   ;;  %v4011_v43 = vld [vmem:[#allocation2 + $0x2e0] ss:$16 sps:$4 sm:$0xff]  }
 0x1b7   :  { %1582 = vmatmul.mubr.bf16.gmra.mxu1 %v3937_v47  ;;  %1871 = vmatmul.mubr.bf16.gmra.mxu0 %v3938_v44  ;;  %v4014_v47 = vld [vmem:[#allocation2 + $0x2e8] ss:$16 sps:$4 sm:$0xff]   ;;  %v4019_v44 = vld [vmem:[#allocation2 + $0x304] ss:$16 sps:$4 sm:$0xff]  }
 0x1b8   :  { %1589 = vmatprep.mubr.bf16.mxu1 %v3939_v48  ;;  %1878 = vmatprep.mubr.bf16.mxu0 %v3941_v0  ;;  %v4022_v48 = vld [vmem:[#allocation2 + $0x30c] ss:$16 sps:$4 sm:$0xff]   ;;  %v4017_v0 = vld [vmem:[#allocation2 + $0x300] ss:$16 sps:$4 sm:$0xff]  }
 0x1bf   :  { %1590 = vmatmul.mubr.bf16.gmra.mxu1 %v3943_v1  ;;  %1879 = vmatmul.mubr.bf16.gmra.mxu0 %v3944_v2  ;;  %v4020_v1 = vld [vmem:[#allocation2 + $0x308] ss:$16 sps:$4 sm:$0xff]   ;;  %v4025_v2 = vld [vmem:[#allocation2 + $0x324] ss:$16 sps:$4 sm:$0xff]  }
 0x1c0   :  { %1597 = vmatprep.mubr.bf16.mxu1 %v3945_v3  ;;  %1886 = vmatprep.mubr.bf16.mxu0 %v3947_v45  ;;  %v4028_v3 = vld [vmem:[#allocation2 + $0x32c] ss:$16 sps:$4 sm:$0xff]  }
 0x1c7   :  { %1598 = vmatmul.mubr.bf16.gmra.mxu1 %v3949_v46  ;;  %1887 = vmatmul.mubr.bf16.gmra.mxu0 %v3950_v49 }
 0x1c8   :  { %1605 = vmatprep.mubr.bf16.mxu1 %v3951_v50  ;;  %1894 = vmatprep.mubr.bf16.mxu0 %v3953_v4 }
 0x1cf   :  { %1606 = vmatmul.mubr.bf16.gmra.mxu1 %v3955_v5  ;;  %1895 = vmatmul.mubr.bf16.gmra.mxu0 %v3956_v6 }
 0x1d0   :  { %1613 = vmatprep.mubr.bf16.mxu1 %v3957_v7  ;;  %1902 = vmatprep.mubr.bf16.mxu0 %v3959_v8  ;;  %v4023_v7 = vld [vmem:[#allocation2 + $0x320] ss:$16 sps:$4 sm:$0xff]   ;;  %v4026_v8 = vld [vmem:[#allocation2 + $0x328] ss:$16 sps:$4 sm:$0xff]  }
 0x1d7   :  { %1614 = vmatmul.mubr.bf16.gmra.mxu1 %v3961_v9  ;;  %1903 = vmatmul.mubr.bf16.gmra.mxu0 %v3962_v10  ;;  %v4031_v10 = vld [vmem:[#allocation2 + $0x344] ss:$16 sps:$4 sm:$0xff]  }
 0x1d8   :  { %1621 = vmatprep.mubr.bf16.mxu1 %v3963_v11  ;;  %1910 = vmatprep.mubr.bf16.mxu0 %v3965_v12  ;;  %v4034_v11 = vld [vmem:[#allocation2 + $0x34c] ss:$16 sps:$4 sm:$0xff]  }
 0x1df   :  { %1622 = vmatmul.mubr.bf16.gmra.mxu1 %v3967_v15  ;;  %1911 = vmatmul.mubr.bf16.gmra.mxu0 %v3968_v21 }
 0x1e0   :  { %1629 = vmatprep.mubr.bf16.mxu1 %v3969_v14  ;;  %1918 = vmatprep.mubr.bf16.mxu0 %v3971_v18 }
 0x1e7   :  { %1630 = vmatmul.mubr.bf16.gmra.mxu1 %v3973_v20  ;;  %1919 = vmatmul.mubr.bf16.gmra.mxu0 %v3974_v23 }
 0x1e8   :  { %1637 = vmatprep.mubr.bf16.mxu1 %v3975_v25  ;;  %1926 = vmatprep.mubr.bf16.mxu0 %v3977_v27 }
 0x1ef   :  { %1638 = vmatmul.mubr.bf16.gmra.mxu1 %v3979_v29  ;;  %1927 = vmatmul.mubr.bf16.gmra.mxu0 %v3980_v30  ;;  %v4029_v30 = vld [vmem:[#allocation2 + $0x340] ss:$16 sps:$4 sm:$0xff]  }
 0x1f0   :  { %1645 = vmatprep.mubr.bf16.mxu1 %v3981_v31  ;;  %1934 = vmatprep.mubr.bf16.mxu0 %v3983_v32  ;;  %v4032_v31 = vld [vmem:[#allocation2 + $0x348] ss:$16 sps:$4 sm:$0xff]  }
 0x1f7   :  { %1646 = vmatmul.mubr.bf16.gmra.mxu1 %v3985_v33  ;;  %1935 = vmatmul.mubr.bf16.gmra.mxu0 %v3986_v34  ;;  %v4037_v33 = vld [vmem:[#allocation2 + $0x364] ss:$16 sps:$4 sm:$0xff]   ;;  %v4040_v34 = vld [vmem:[#allocation2 + $0x36c] ss:$16 sps:$4 sm:$0xff]  }
 0x1f8   :  { %1653 = vmatprep.mubr.bf16.mxu1 %v3987_v35  ;;  %1942 = vmatprep.mubr.bf16.mxu0 %v3989_v36 }
 0x1ff   :  { %1654 = vmatmul.mubr.bf16.gmra.mxu1 %v3991_v37  ;;  %1943 = vmatmul.mubr.bf16.gmra.mxu0 %v3992_v38 }
 0x200   :  { %1661 = vmatprep.mubr.bf16.mxu1 %v3995_v39  ;;  %1950 = vmatprep.mubr.bf16.mxu0 %v3998_v51 }
 0x207   :  { %1662 = vmatmul.mubr.bf16.gmra.mxu1 %v3993_v55  ;;  %1951 = vmatmul.mubr.bf16.gmra.mxu0 %v3996_v52 }
 0x208   :  { %1669 = vmatprep.mubr.bf16.mxu1 %v4001_v56  ;;  %1958 = vmatprep.mubr.bf16.mxu0 %v4004_v59 }
 0x20f   :  { %1670 = vmatmul.mubr.bf16.gmra.mxu1 %v3999_v60  ;;  %1959 = vmatmul.mubr.bf16.gmra.mxu0 %v4002_v61  ;;  %v4035_v60 = vld [vmem:[#allocation2 + $0x360] ss:$16 sps:$4 sm:$0xff]   ;;  %v4038_v61 = vld [vmem:[#allocation2 + $0x368] ss:$16 sps:$4 sm:$0xff]  }
 0x210   :  { %1677 = vmatprep.mubr.bf16.mxu1 %v4007_v53  ;;  %1966 = vmatprep.mubr.bf16.mxu0 %v4010_v57  ;;  %v4043_v53 = vld [vmem:[#allocation2 + $0x384] ss:$16 sps:$4 sm:$0xff]   ;;  %v4046_v57 = vld [vmem:[#allocation2 + $0x38c] ss:$16 sps:$4 sm:$0xff]  }
 0x217   :  { %1678 = vmatmul.mubr.bf16.gmra.mxu1 %v4005_v54  ;;  %1967 = vmatmul.mubr.bf16.gmra.mxu0 %v4008_v58 }
 0x218   :  { %1685 = vmatprep.mubr.bf16.mxu1 %v4013_v62  ;;  %1974 = vmatprep.mubr.bf16.mxu0 %v4016_v63 }
 0x21f   :  { %1686 = vmatmul.mubr.bf16.gmra.mxu1 %v4011_v43  ;;  %1975 = vmatmul.mubr.bf16.gmra.mxu0 %v4014_v47 }
 0x220   :  { %1693 = vmatprep.mubr.bf16.mxu1 %v4019_v44  ;;  %1982 = vmatprep.mubr.bf16.mxu0 %v4022_v48 }
 0x227   :  { %v1503_v45 = vpop.f32.mrf.mxu1  ;;  %1694 = vmatmul.mubr.bf16.gmra.mxu1 %v4017_v0  ;;  %v1792_v46 = vpop.f32.mrf.mxu0  ;;  %1983 = vmatmul.mubr.bf16.gmra.mxu0 %v4020_v1  ;;  %v4744_v0 = vld [vmem:[#allocation2 + $0x380] ss:$16 sps:$4 sm:$0xff]   ;;  %v4044_v1 = vld [vmem:[#allocation2 + $0x388] ss:$16 sps:$4 sm:$0xff]  }
 0x228   :  { %v4718_v49 = vadd.f32 %v1792_v46, %v1503_v45  ;;  %1701 = vmatprep.mubr.bf16.mxu1 %v4025_v2  ;;  %1990 = vmatprep.mubr.bf16.mxu0 %v4028_v3  ;;  %v4746_v2 = vld [vmem:[#allocation2 + $0x3a4] ss:$16 sps:$4 sm:$0xff]   ;;  %v4052_v3 = vld [vmem:[#allocation2 + $0x3ac] ss:$16 sps:$4 sm:$0xff]  }
 0x229   :  { %v1505_v50 = vpop.f32.mrf.mxu1  ;;  %v1794_v4 = vpop.f32.mrf.mxu0 }
 0x22b   :  { %v1506_v5 = vpop.f32.mrf.mxu1  ;;  %v1795_v6 = vpop.f32.mrf.mxu0 }
 0x22c   :  { %v4720_v9 = vadd.f32 %v1795_v6, %v1506_v5 }
 0x22d   :  { %v1508_v12 = vpop.f32.mrf.mxu1  ;;  %v1797_v15 = vpop.f32.mrf.mxu0 }
 0x22e   :  { %v2047_v21 = vpack.c.bf16 %v4720_v9, %v4718_v49  ;;  %v4760_v12 = vld [vmem:[#allocation2 + $0x3c4] ss:$16 sps:$4 sm:$0xff]   ;;  %v4058_v15 = vld [vmem:[#allocation2 + $0x3cc] ss:$16 sps:$4 sm:$0xff]  }
 0x22f   :  { %v1511_v14 = vpop.f32.mrf.mxu1  ;;  %1702 = vmatmul.mubr.bf16.gmra.mxu1 %v4023_v7  ;;  %v1800_v18 = vpop.f32.mrf.mxu0  ;;  %1991 = vmatmul.mubr.bf16.gmra.mxu0 %v4026_v8 }
 0x230   :  { %v4724_v20 = vadd.f32 %v1800_v18, %v1511_v14  ;;  %1709 = vmatprep.mubr.bf16.mxu1 %v4031_v10  ;;  %1998 = vmatprep.mubr.bf16.mxu0 %v4034_v11  ;;  %v4758_v10 = vld [vmem:[#allocation2 + $0x3a0] ss:$16 sps:$4 sm:$0xff]   ;;  %v4050_v11 = vld [vmem:[#allocation2 + $0x3a8] ss:$16 sps:$4 sm:$0xff]  }
 0x231   :  { %v1513_v23 = vpop.f32.mrf.mxu1  ;;  %v1802_v25 = vpop.f32.mrf.mxu0 }
 0x233   :  { %v1514_v27 = vpop.f32.mrf.mxu1  ;;  %v1803_v29 = vpop.f32.mrf.mxu0 }
 0x234   :  { %v4726_v32 = vadd.f32 %v1803_v29, %v1514_v27 }
 0x235   :  { %v1516_v35 = vpop.f32.mrf.mxu1  ;;  %v1805_v36 = vpop.f32.mrf.mxu0 }
 0x236   :  { %v2048_v37 = vpack.c.bf16 %v4726_v32, %v4724_v20  ;;  %v4766_v35 = vld [vmem:[#allocation2 + $0x3e4] ss:$16 sps:$4 sm:$0xff]   ;;  %v4064_v36 = vld [vmem:[#allocation2 + $0x3ec] ss:$16 sps:$4 sm:$0xff]  }
 0x237   :  { %v1519_v38 = vpop.f32.mrf.mxu1  ;;  %1710 = vmatmul.mubr.bf16.gmra.mxu1 %v4029_v30  ;;  %v1808_v39 = vpop.f32.mrf.mxu0  ;;  %1999 = vmatmul.mubr.bf16.gmra.mxu0 %v4032_v31 }
 0x238   :  { %v4730_v51 = vadd.f32 %v1808_v39, %v1519_v38  ;;  %1717 = vmatprep.mubr.bf16.mxu1 %v4037_v33  ;;  %2006 = vmatprep.mubr.bf16.mxu0 %v4040_v34  ;;  %v4764_v33 = vld [vmem:[#allocation2 + $0x3c0] ss:$16 sps:$4 sm:$0xff]   ;;  %v4056_v34 = vld [vmem:[#allocation2 + $0x3c8] ss:$16 sps:$4 sm:$0xff]  }
 0x239   :  { %v1521_v55 = vpop.f32.mrf.mxu1  ;;  %v1810_v52 = vpop.f32.mrf.mxu0 }
 0x23b   :  { %v4732_v56 = vpop.f32.mrf.mxu1  ;;  %v4734_v59 = vpop.f32.mrf.mxu0 }
 0x23d   :  { %v1524_v54 = vpop.f32.mrf.mxu1  ;;  %v1813_v58 = vpop.f32.mrf.mxu0 }
 0x23e   :  { %v4770_v54 = vld [vmem:[#allocation2 + $0x3e0] ss:$16 sps:$4 sm:$0xff]   ;;  %v4062_v58 = vld [vmem:[#allocation2 + $0x3e8] ss:$16 sps:$4 sm:$0xff]  }
 0x23f   :  { %v4736_v62 = vpop.f32.mrf.mxu1  ;;  %1718 = vmatmul.mubr.bf16.gmra.mxu1 %v4035_v60  ;;  %v4738_v63 = vpop.f32.mrf.mxu0  ;;  %2007 = vmatmul.mubr.bf16.gmra.mxu0 %v4038_v61 }
 0x240   :  { %1725 = vmatprep.mubr.bf16.mxu1 %v4043_v53  ;;  %2014 = vmatprep.mubr.bf16.mxu0 %v4046_v57 }
 0x241   :  { %v1529_v43 = vpop.f32.mrf.mxu1  ;;  %v1818_v47 = vpop.f32.mrf.mxu0 }
 0x243   :  { %v4740_v44 = vpop.f32.mrf.mxu1  ;;  %v4742_v48 = vpop.f32.mrf.mxu0 }
 0x245   :  { %v1532_v45 = vpop.f32.mrf.mxu1  ;;  %v1821_v46 = vpop.f32.mrf.mxu0 }
 0x247   :  { %v4748_v50 = vpop.f32.mrf.mxu1  ;;  %1726 = vmatmul.mubr.bf16.gmra.mxu1 %v4744_v0  ;;  %v4751_v4 = vpop.f32.mrf.mxu0  ;;  %2015 = vmatmul.mubr.bf16.gmra.mxu0 %v4044_v1 }
 0x248   :  { %1733 = vmatprep.mubr.bf16.mxu1 %v4746_v2  ;;  %2022 = vmatprep.mubr.bf16.mxu0 %v4052_v3 }
 0x249   :  { %v1537_v5 = vpop.f32.mrf.mxu1  ;;  %v1826_v6 = vpop.f32.mrf.mxu0 }
 0x24b   :  { %v4754_v7 = vpop.f32.mrf.mxu1  ;;  %v4756_v8 = vpop.f32.mrf.mxu0 }
 0x24d   :  { %v1540_v14 = vpop.f32.mrf.mxu1  ;;  %v1829_v18 = vpop.f32.mrf.mxu0 }
 0x24f   :  { %v1543_v23 = vpop.f32.mrf.mxu1  ;;  %1734 = vmatmul.mubr.bf16.gmra.mxu1 %v4758_v10  ;;  %v1832_v25 = vpop.f32.mrf.mxu0  ;;  %2023 = vmatmul.mubr.bf16.gmra.mxu0 %v4050_v11 }
 0x250   :  { %1741 = vmatprep.mubr.bf16.mxu1 %v4760_v12  ;;  %2030 = vmatprep.mubr.bf16.mxu0 %v4058_v15 }
 0x251   :  { %v1545_v27 = vpop.f32.mrf.mxu1  ;;  %v1834_v29 = vpop.f32.mrf.mxu0 }
 0x253   :  { %v1546_v30 = vpop.f32.mrf.mxu1  ;;  %v1835_v31 = vpop.f32.mrf.mxu0 }
 0x255   :  { %v1548_v38 = vpop.f32.mrf.mxu1  ;;  %v1837_v39 = vpop.f32.mrf.mxu0 }
 0x257   :  { %v1551_v55 = vpop.f32.mrf.mxu1  ;;  %1742 = vmatmul.mubr.bf16.gmra.mxu1 %v4764_v33  ;;  %v1840_v52 = vpop.f32.mrf.mxu0  ;;  %2031 = vmatmul.mubr.bf16.gmra.mxu0 %v4056_v34 }
 0x258   :  { %1749 = vmatprep.mubr.bf16.mxu1 %v4766_v35  ;;  %2038 = vmatprep.mubr.bf16.mxu0 %v4064_v36  ;;  %v1841_v38 = vadd.f32 %v1840_v52, %v1551_v55  ;;  %v1828_v55 = vadd.f32 %v4756_v8, %v4754_v7 }
 0x259   :  { %v1553_v60 = vpop.f32.mrf.mxu1  ;;  %v1842_v61 = vpop.f32.mrf.mxu0 }
 0x25b   :  { %v1554_v53 = vpop.f32.mrf.mxu1  ;;  %v1843_v57 = vpop.f32.mrf.mxu0 }
 0x25c   :  { %v1844_v27 = vadd.f32 %v1843_v57, %v1554_v53 }
 0x25d   :  { %v1556_v43 = vpop.f32.mrf.mxu1  ;;  %v1845_v47 = vpop.f32.mrf.mxu0 }
 0x25e   :  { %v2053_v61 = vpack.c.bf16 %v1844_v27, %v1841_v38  ;;  %v1833_v47 = vadd.f32 %v1832_v25, %v1543_v23 }
 0x25f   :  { %v1559_v1 = vpop.f32.mrf.mxu1  ;;  %1750 = vmatmul.mubr.bf16.gmra.mxu1 %v4770_v54  ;;  %v1848_v3 = vpop.f32.mrf.mxu0  ;;  %2039 = vmatmul.mubr.bf16.gmra.mxu0 %v4062_v58 }
 0x260   :  { %2118 = vmatprep.mubr.bf16.mxu1 %v4566_v41  ;;  %2407 = vmatprep.mubr.bf16.mxu0 %v4568_v42  ;;  %v1849_v11 = vadd.f32 %v1848_v3, %v1559_v1  ;;  %v1836_v42 = vadd.f32 %v1835_v31, %v1546_v30  ;;  %v1825_v31 = vadd.f32 %v4751_v4, %v4748_v50 }
 0x261   :  { %v1561_v45 = vpop.f32.mrf.mxu1  ;;  %v1850_v46 = vpop.f32.mrf.mxu0 }
 0x262   :  { %v2052_v52 = vpack.c.bf16 %v1836_v42, %v1833_v47  ;;  %v2051_v7 = vpack.c.bf16 %v1828_v55, %v1825_v31 }
 0x263   :  { %v1562_v5 = vpop.f32.mrf.mxu1  ;;  %v1851_v6 = vpop.f32.mrf.mxu0 }
 0x264   :  { %v1852_v15 = vadd.f32 %v1851_v6, %v1562_v5  ;;  %v1820_v5 = vadd.f32 %v4742_v48, %v4740_v44 }
 0x265   :  { %v1564_v14 = vpop.f32.mrf.mxu1  ;;  %v1853_v18 = vpop.f32.mrf.mxu0 }
 0x266   :  { %v2054_v29 = vpack.c.bf16 %v1852_v15, %v1849_v11  ;;  %v1817_v11 = vadd.f32 %v4738_v63, %v4736_v62  ;;  %v1812_v14 = vadd.f32 %v4734_v59, %v4732_v56 }
 0x267   :  { %v1567_v34 = vpop.f32.mrf.mxu1  ;;  %v1856_v36 = vpop.f32.mrf.mxu0 }
 0x268   :  { %v4775_v39 = vadd.f32 %v1856_v36, %v1567_v34  ;;  %2087 = vmatpush1.bf16.msra.mxu1 %v2054_v29  ;;  %v2050_v18 = vpack.c.bf16 %v1820_v5, %v1817_v11  ;;  %v2049_v34 = vpack.c.bf16 %v1812_v14, %v4730_v51 }
 0x269   :  { %v1569_v60 = vpop.f32.mrf.mxu1  ;;  %v1858_v41 = vpop.f32.mrf.mxu0  ;;  %2088 = vmatprep.subr.bf16.mxu1 %v4526_v40 }
 0x26b   :  { %v1570_v58 = vpop.f32.mrf.mxu1  ;;  %v1859_v43 = vpop.f32.mrf.mxu0 }
 0x26c   :  { %v4778_v1 = vadd.f32 %v1859_v43, %v1570_v58  ;;  %2089 = vmatpush1.bf16.msra.mxu1 %v2053_v61 }
 0x26d   :  { %v1572_v53 = vpop.f32.mrf.mxu1  ;;  %v1861_v57 = vpop.f32.mrf.mxu0  ;;  %2090 = vmatprep.subr.bf16.mxu1 %v4526_v40 }
 0x26e   :  { %v2055_v3 = vpack.c.bf16 %v4778_v1, %v4775_v39 }
 0x26f   :  { %v1575_v45 = vpop.f32.mrf.mxu1  ;;  %v1864_v30 = vpop.f32.mrf.mxu0 }
 0x270   :  { %v4787_v23 = vadd.f32 %v1864_v30, %v1575_v45  ;;  %2091 = vmatpush1.bf16.msra.mxu1 %v2052_v52 }
 0x271   :  { %v1577_v25 = vpop.f32.mrf.mxu1  ;;  %v1866_v46 = vpop.f32.mrf.mxu0  ;;  %2092 = vmatprep.subr.bf16.mxu1 %v4526_v40 }
 0x273   :  { %v1578_v8 = vpop.f32.mrf.mxu1  ;;  %v1867_v6 = vpop.f32.mrf.mxu0 }
 0x274   :  { %v4794_v15 = vadd.f32 %v1867_v6, %v1578_v8  ;;  %2093 = vmatpush1.bf16.msra.mxu1 %v2051_v7 }
 0x275   :  { %v1580_v50 = vpop.f32.mrf.mxu1  ;;  %v1869_v4 = vpop.f32.mrf.mxu0  ;;  %2094 = vmatprep.subr.bf16.mxu1 %v4526_v40 }
 0x276   :  { %v2056_v44 = vpack.c.bf16 %v4794_v15, %v4787_v23 }
 0x277   :  { %v1583_v48 = vpop.f32.mrf.mxu1  ;;  %v1872_v27 = vpop.f32.mrf.mxu0 }
 0x278   :  { %v4801_v29 = vadd.f32 %v1872_v27, %v1583_v48  ;;  %2095 = vmatpush1.bf16.msra.mxu1 %v2050_v18 }
 0x279   :  { %v1585_v62 = vpop.f32.mrf.mxu1  ;;  %v1874_v63 = vpop.f32.mrf.mxu0  ;;  %2096 = vmatprep.subr.bf16.mxu1 %v4526_v40 }
 0x27b   :  { %v4805_v36 = vpop.f32.mrf.mxu1  ;;  %v4807_v38 = vpop.f32.mrf.mxu0 }
 0x27c   :  { %2097 = vmatpush1.bf16.msra.mxu1 %v2049_v34 }
 0x27d   :  { %v1588_v56 = vpop.f32.mrf.mxu1  ;;  %v1877_v59 = vpop.f32.mrf.mxu0  ;;  %2098 = vmatprep.subr.bf16.mxu1 %v4526_v40 }
 0x27f   :  { %v4810_v60 = vpop.f32.mrf.mxu1  ;;  %v4812_v41 = vpop.f32.mrf.mxu0 }
 0x280   :  { %2099 = vmatpush1.bf16.msra.mxu1 %v2048_v37 }
 0x281   :  { %v1593_v42 = vpop.f32.mrf.mxu1  ;;  %v1882_v61 = vpop.f32.mrf.mxu0  ;;  %2100 = vmatprep.subr.bf16.mxu1 %v4526_v40 }
 0x283   :  { %v4818_v51 = vpop.f32.mrf.mxu1  ;;  %v4820_v58 = vpop.f32.mrf.mxu0 }
 0x284   :  { %2101 = vmatpush1.bf16.msra.mxu1 %v2047_v21 }
 0x285   :  { %v1596_v43 = vpop.f32.mrf.mxu1  ;;  %v1885_v47 = vpop.f32.mrf.mxu0  ;;  %2102 = vmatprep.subr.bf16.mxu1 %v4526_v40 }
 0x287   :  { %v1599_v53 = vpop.f32.mrf.mxu1  ;;  %v1888_v57 = vpop.f32.mrf.mxu0 }
 0x289   :  { %v1601_v20 = vpop.f32.mrf.mxu1  ;;  %v1890_v32 = vpop.f32.mrf.mxu0 }
 0x28b   :  { %v1602_v37 = vpop.f32.mrf.mxu1  ;;  %v1891_v55 = vpop.f32.mrf.mxu0 }
 0x28d   :  { %v1604_v52 = vpop.f32.mrf.mxu1  ;;  %v1893_v45 = vpop.f32.mrf.mxu0 }
 0x28f   :  { %v1607_v30 = vpop.f32.mrf.mxu1  ;;  %v1896_v31 = vpop.f32.mrf.mxu0 }
 0x291   :  { %v1609_v25 = vpop.f32.mrf.mxu1  ;;  %v1898_v46 = vpop.f32.mrf.mxu0 }
 0x293   :  { %v1610_v5 = vpop.f32.mrf.mxu1  ;;  %v1899_v7 = vpop.f32.mrf.mxu0 }
 0x295   :  { %v1612_v49 = vpop.f32.mrf.mxu1  ;;  %v1901_v9 = vpop.f32.mrf.mxu0 }
 0x296   :  { %v1900_v9 = vadd.f32 %v1899_v7, %v1610_v5 }
 0x297   :  { %v1615_v21 = vpop.f32.mrf.mxu1  ;;  %v1904_v8 = vpop.f32.mrf.mxu0 }
 0x298   :  { %v1905_v45 = vadd.f32 %v1904_v8, %v1615_v21  ;;  %v1892_v21 = vadd.f32 %v1891_v55, %v1602_v37  ;;  %v1881_v55 = vadd.f32 %v4812_v41, %v4810_v60 }
 0x299   :  { %v1617_v6 = vpop.f32.mrf.mxu1  ;;  %v1906_v11 = vpop.f32.mrf.mxu0 }
 0x29b   :  { %v1618_v50 = vpop.f32.mrf.mxu1  ;;  %v1907_v4 = vpop.f32.mrf.mxu0 }
 0x29c   :  { %v1908_v47 = vadd.f32 %v1907_v4, %v1618_v50 }
 0x29d   :  { %v1620_v14 = vpop.f32.mrf.mxu1  ;;  %v1909_v18 = vpop.f32.mrf.mxu0 }
 0x29e   :  { %v2061_v6 = vpack.c.bf16 %v1908_v47, %v1905_v45  ;;  %v1897_v18 = vadd.f32 %v1896_v31, %v1607_v30  ;;  %v1884_v31 = vadd.f32 %v4820_v58, %v4818_v51 }
 0x29f   :  { %v1623_v48 = vpop.f32.mrf.mxu1  ;;  %v1912_v27 = vpop.f32.mrf.mxu0 }
 0x2a0   :  { %v1913_v59 = vadd.f32 %v1912_v27, %v1623_v48  ;;  %v2060_v8 = vpack.c.bf16 %v1900_v9, %v1897_v18 }
 0x2a1   :  { %v1625_v62 = vpop.f32.mrf.mxu1  ;;  %v1914_v63 = vpop.f32.mrf.mxu0 }
 0x2a3   :  { %v1626_v34 = vpop.f32.mrf.mxu1  ;;  %v1915_v56 = vpop.f32.mrf.mxu0 }
 0x2a4   :  { %v1916_v42 = vadd.f32 %v1915_v56, %v1626_v34  ;;  %v1889_v34 = vadd.f32 %v1888_v57, %v1599_v53 }
 0x2a5   :  { %v1628_v61 = vpop.f32.mrf.mxu1  ;;  %v1917_v43 = vpop.f32.mrf.mxu0 }
 0x2a6   :  { %v2062_v20 = vpack.c.bf16 %v1916_v42, %v1913_v59  ;;  %v2059_v56 = vpack.c.bf16 %v1892_v21, %v1889_v34  ;;  %v1876_v61 = vadd.f32 %v4807_v38, %v4805_v36  ;;  %v2058_v43 = vpack.c.bf16 %v1884_v31, %v1881_v55 }
 0x2a7   :  { %v1631_v32 = vpop.f32.mrf.mxu1  ;;  %v1920_v52 = vpop.f32.mrf.mxu0 }
 0x2a8   :  { %v4826_v25 = vadd.f32 %v1920_v52, %v1631_v32  ;;  %2103 = vmatpush2.bf16.msra.mxu1 %v2062_v20  ;;  %v2057_v32 = vpack.c.bf16 %v1876_v61, %v4801_v29 }
 0x2a9   :  { %v1633_v46 = vpop.f32.mrf.mxu1  ;;  %v1922_v49 = vpop.f32.mrf.mxu0  ;;  %2104 = vmatprep.subr.bf16.mxu1 %v4526_v40 }
 0x2ab   :  { %v1634_v11 = vpop.f32.mrf.mxu1  ;;  %v1923_v14 = vpop.f32.mrf.mxu0 }
 0x2ac   :  { %v4829_v48 = vadd.f32 %v1923_v14, %v1634_v11  ;;  %2105 = vmatpush2.bf16.msra.mxu1 %v2061_v6 }
 0x2ad   :  { %v1636_v50 = vpop.f32.mrf.mxu1  ;;  %v1925_v4 = vpop.f32.mrf.mxu0  ;;  %2106 = vmatprep.subr.bf16.mxu1 %v4526_v40 }
 0x2ae   :  { %v2063_v27 = vpack.c.bf16 %v4829_v48, %v4826_v25 }
 0x2af   :  { %v1639_v62 = vpop.f32.mrf.mxu1  ;;  %v1928_v63 = vpop.f32.mrf.mxu0 }
 0x2b0   :  { %v4834_v5 = vadd.f32 %v1928_v63, %v1639_v62  ;;  %2107 = vmatpush2.bf16.msra.mxu1 %v2060_v8 }
 0x2b1   :  { %v1641_v7 = vpop.f32.mrf.mxu1  ;;  %v1930_v30 = vpop.f32.mrf.mxu0  ;;  %2108 = vmatprep.subr.bf16.mxu1 %v4526_v40 }
 0x2b3   :  { %v1642_v59 = vpop.f32.mrf.mxu1  ;;  %v1931_v37 = vpop.f32.mrf.mxu0 }
 0x2b4   :  { %v4841_v42 = vadd.f32 %v1931_v37, %v1642_v59  ;;  %2109 = vmatpush2.bf16.msra.mxu1 %v2059_v56 }
 0x2b5   :  { %v1644_v53 = vpop.f32.mrf.mxu1  ;;  %v1933_v57 = vpop.f32.mrf.mxu0  ;;  %2110 = vmatprep.subr.bf16.mxu1 %v4526_v40 }
 0x2b6   :  { %v2064_v51 = vpack.c.bf16 %v4841_v42, %v4834_v5 }
 0x2b7   :  { %v1647_v58 = vpop.f32.mrf.mxu1  ;;  %v1936_v47 = vpop.f32.mrf.mxu0 }
 0x2b8   :  { %v4848_v20 = vadd.f32 %v1936_v47, %v1647_v58  ;;  %2111 = vmatpush2.bf16.msra.mxu1 %v2058_v43 }
 0x2b9   :  { %v1649_v60 = vpop.f32.mrf.mxu1  ;;  %v1938_v41 = vpop.f32.mrf.mxu0  ;;  %2112 = vmatprep.subr.bf16.mxu1 %v4526_v40 }
 0x2bb   :  { %v4852_v52 = vpop.f32.mrf.mxu1  ;;  %v4854_v45 = vpop.f32.mrf.mxu0 }
 0x2bc   :  { %2113 = vmatpush2.bf16.msra.mxu1 %v2057_v32 }
 0x2bd   :  { %v1652_v36 = vpop.f32.mrf.mxu1  ;;  %v1941_v38 = vpop.f32.mrf.mxu0  ;;  %2114 = vmatprep.subr.bf16.mxu1 %v4526_v40 }
 0x2bf   :  { %v4857_v46 = vpop.f32.mrf.mxu1  ;;  %v4859_v49 = vpop.f32.mrf.mxu0 }
 0x2c0   :  { %2115 = vmatpush2.bf16.msra.mxu1 %v2056_v44 }
 0x2c1   :  { %v1657_v9 = vpop.f32.mrf.mxu1  ;;  %v1946_v6 = vpop.f32.mrf.mxu0  ;;  %2116 = vmatprep.subr.bf16.mxu1 %v4526_v40 }
 0x2c2   :  { %v4321_v6 = vld [vmem:[#allocation2 + $0x80] ss:$16 sps:$4 sm:$0xff]  }
 0x2c3   :  { %v4865_v29 = vpop.f32.mrf.mxu1  ;;  %v4867_v11 = vpop.f32.mrf.mxu0 }
 0x2c4   :  { %2117 = vmatpush2.bf16.msra.mxu1 %v2055_v3 }
 0x2c5   :  { %v1660_v14 = vpop.f32.mrf.mxu1  ;;  %v1949_v18 = vpop.f32.mrf.mxu0 }
 0x2c7   :  { %v4872_v50 = vpop.f32.mrf.mxu1  ;;  %v4874_v4 = vpop.f32.mrf.mxu0  ;;  %2119 = vmatmul.mubr.bf16.vlgmr.msra.gmra.mxu1 %v4692_v16 }
 0x2c8   :  { %2126 = vmatprep.mubr.bf16.mxu1 %v4694_v13 }
 0x2c9   :  { %v1665_v23 = vpop.f32.mrf.mxu1  ;;  %v1954_v15 = vpop.f32.mrf.mxu0 }
 0x2cb   :  { %v1666_v44 = vpop.f32.mrf.mxu1  ;;  %v1955_v21 = vpop.f32.mrf.mxu0 }
 0x2cd   :  { %v1668_v8 = vpop.f32.mrf.mxu1  ;;  %v1957_v62 = vpop.f32.mrf.mxu0 }
 0x2cf   :  { %v1671_v63 = vpop.f32.mrf.mxu1  ;;  %v1960_v34 = vpop.f32.mrf.mxu0  ;;  %2127 = vmatmul.mubr.bf16.gmra.mxu1 %v4700_v17 }
 0x2d0   :  { %2134 = vmatprep.mubr.bf16.mxu1 %v4702_v19 }
 0x2d1   :  { %v1673_v39 = vpop.f32.mrf.mxu1  ;;  %v1962_v1 = vpop.f32.mrf.mxu0 }
 0x2d2   :  { %v1961_v1 = vadd.f32 %v1960_v34, %v1671_v63  ;;  %v4324_v34 = vld [vmem:[#allocation2 + $0xc4] ss:$16 sps:$4 sm:$0xff]  }
 0x2d3   :  { %v1674_v3 = vpop.f32.mrf.mxu1  ;;  %v1963_v7 = vpop.f32.mrf.mxu0 }
 0x2d4   :  { %v1964_v15 = vadd.f32 %v1963_v7, %v1674_v3  ;;  %v1953_v3 = vadd.f32 %v4874_v4, %v4872_v50 }
 0x2d5   :  { %v1676_v30 = vpop.f32.mrf.mxu1  ;;  %v1965_v16 = vpop.f32.mrf.mxu0 }
 0x2d7   :  { %v1679_v31 = vpop.f32.mrf.mxu1  ;;  %v1968_v13 = vpop.f32.mrf.mxu0  ;;  %2135 = vmatmul.mubr.bf16.gmra.mxu1 %v4706_v22 }
 0x2d8   :  { %2142 = vmatprep.mubr.bf16.mxu1 %v4708_v24  ;;  %v1969_v14 = vadd.f32 %v1968_v13, %v1679_v31  ;;  %v1956_v31 = vadd.f32 %v1955_v21, %v1666_v44  ;;  %v2068_v13 = vpack.c.bf16 %v1964_v15, %v1961_v1  ;;  %v1948_v44 = vadd.f32 %v4867_v11, %v4865_v29 }
 0x2d9   :  { %v1681_v56 = vpop.f32.mrf.mxu1  ;;  %v1970_v59 = vpop.f32.mrf.mxu0 }
 0x2da   :  { %v2067_v21 = vpack.c.bf16 %v1956_v31, %v1953_v3 }
 0x2db   :  { %v1682_v37 = vpop.f32.mrf.mxu1  ;;  %v1971_v55 = vpop.f32.mrf.mxu0 }
 0x2dc   :  { %v1972_v32 = vadd.f32 %v1971_v55, %v1682_v37 }
 0x2dd   :  { %v1684_v53 = vpop.f32.mrf.mxu1  ;;  %v1973_v17 = vpop.f32.mrf.mxu0 }
 0x2de   :  { %v2069_v8 = vpack.c.bf16 %v1972_v32, %v1969_v14  ;;  %v4323_v53 = vld [vmem:[#allocation2 + $0xa0] ss:$16 sps:$4 sm:$0xff]  }
 0x2df   :  { %v1687_v57 = vpop.f32.mrf.mxu1  ;;  %v1976_v19 = vpop.f32.mrf.mxu0  ;;  %2143 = vmatmul.mubr.bf16.gmra.mxu1 %v4712_v26  ;;  %v4322_v26 = vld [vmem:[#allocation2 + $0xa4] ss:$16 sps:$4 sm:$0xff]   ;;  %v4327_v14 = vld [vmem:[#allocation2 + $0xe0] ss:$16 sps:$4 sm:$0xff]  }
 0x2e0   :  { %2150 = vmatprep.mubr.bf16.mxu1 %v4714_v28  ;;  %v1977_v60 = vadd.f32 %v1976_v19, %v1687_v57 }
 0x2e1   :  { %v1689_v61 = vpop.f32.mrf.mxu1  ;;  %v1978_v43 = vpop.f32.mrf.mxu0 }
 0x2e2   :  { %v1945_v61 = vadd.f32 %v4859_v49, %v4857_v46  ;;  %v4326_v46 = vld [vmem:[#allocation2 + $0xe4] ss:$16 sps:$4 sm:$0xff]  }
 0x2e3   :  { %v1690_v58 = vpop.f32.mrf.mxu1  ;;  %v1979_v47 = vpop.f32.mrf.mxu0 }
 0x2e4   :  { %v1980_v22 = vadd.f32 %v1979_v47, %v1690_v58  ;;  %v1940_v58 = vadd.f32 %v4854_v45, %v4852_v52  ;;  %v2066_v47 = vpack.c.bf16 %v1948_v44, %v1945_v61  ;;  %v4334_v61 = vld [vmem:[#allocation2 + $0x164] ss:$16 sps:$4 sm:$0xff]  }
 0x2e5   :  { %v1692_v41 = vpop.f32.mrf.mxu1  ;;  %v1981_v24 = vpop.f32.mrf.mxu0 }
 0x2e6   :  { %v2070_v36 = vpack.c.bf16 %v1980_v22, %v1977_v60  ;;  %v4325_v22 = vld [vmem:[#allocation2 + $0xc0] ss:$16 sps:$4 sm:$0xff]   ;;  %v2065_v32 = vpack.c.bf16 %v1940_v58, %v4848_v20  ;;  %v4328_v20 = vld [vmem:[#allocation2 + $0x104] ss:$16 sps:$4 sm:$0xff]  }
 0x2e7   :  { %v1695_v38 = vpop.f32.mrf.mxu1  ;;  %v1984_v9 = vpop.f32.mrf.mxu0  ;;  %2151 = vmatmul.mubr.bf16.gmra.mxu1 %v4321_v6 }
 0x2e8   :  { %v4884_v18 = vadd.f32 %v1984_v9, %v1695_v38  ;;  %2376 = vmatpush1.bf16.msra.mxu0 %v2070_v36  ;;  %2158 = vmatprep.mubr.bf16.mxu1 %v4322_v26 }
 0x2e9   :  { %v1697_v28 = vpop.f32.mrf.mxu1  ;;  %v1986_v23 = vpop.f32.mrf.mxu0  ;;  %2377 = vmatprep.subr.bf16.mxu0 %v4526_v40 }
 0x2eb   :  { %v1698_v62 = vpop.f32.mrf.mxu1  ;;  %v1987_v39 = vpop.f32.mrf.mxu0 }
 0x2ec   :  { %v4887_v30 = vadd.f32 %v1987_v39, %v1698_v62  ;;  %2378 = vmatpush1.bf16.msra.mxu0 %v2069_v8  ;;  %v4330_v39 = vld [vmem:[#allocation2 + $0x124] ss:$16 sps:$4 sm:$0xff]  }
 0x2ed   :  { %v1700_v16 = vpop.f32.mrf.mxu1  ;;  %v1989_v56 = vpop.f32.mrf.mxu0  ;;  %2379 = vmatprep.subr.bf16.mxu0 %v4526_v40 }
 0x2ee   :  { %v2071_v59 = vpack.c.bf16 %v4887_v30, %v4884_v18  ;;  %v4354_v18 = vld [vmem:[#allocation2 + $0x240] ss:$16 sps:$4 sm:$0xff]   ;;  %v4355_v30 = vld [vmem:[#allocation2 + $0x6c] ss:$16 sps:$4 sm:$0xff]  }
 0x2ef   :  { %v1703_v37 = vpop.f32.mrf.mxu1  ;;  %v1992_v55 = vpop.f32.mrf.mxu0  ;;  %2159 = vmatmul.mubr.bf16.gmra.mxu1 %v4323_v53 }
 0x2f0   :  { %v4894_v63 = vadd.f32 %v1992_v55, %v1703_v37  ;;  %2380 = vmatpush1.bf16.msra.mxu0 %v2068_v13  ;;  %2166 = vmatprep.mubr.bf16.mxu1 %v4324_v34  ;;  %v4332_v55 = vld [vmem:[#allocation2 + $0x144] ss:$16 sps:$4 sm:$0xff]  }
 0x2f1   :  { %v1705_v7 = vpop.f32.mrf.mxu1  ;;  %v1994_v17 = vpop.f32.mrf.mxu0  ;;  %2381 = vmatprep.subr.bf16.mxu0 %v4526_v40 }
 0x2f3   :  { %v1706_v57 = vpop.f32.mrf.mxu1  ;;  %v1995_v19 = vpop.f32.mrf.mxu0 }
 0x2f4   :  { %v4901_v43 = vadd.f32 %v1995_v19, %v1706_v57  ;;  %2382 = vmatpush1.bf16.msra.mxu0 %v2067_v21  ;;  %v4333_v19 = vld [vmem:[#allocation2 + $0x140] ss:$16 sps:$4 sm:$0xff]  }
 0x2f5   :  { %v1708_v50 = vpop.f32.mrf.mxu1  ;;  %v1997_v4 = vpop.f32.mrf.mxu0  ;;  %2383 = vmatprep.subr.bf16.mxu0 %v4526_v40 }
 0x2f6   :  { %v2072_v29 = vpack.c.bf16 %v4901_v43, %v4894_v63  ;;  %v4350_v63 = vld [vmem:[#allocation2 + $0x220] ss:$16 sps:$4 sm:$0xff]   ;;  %v4351_v43 = vld [vmem:[#allocation2 + $0x4c] ss:$16 sps:$4 sm:$0xff]  }
 0x2f7   :  { %v1711_v11 = vpop.f32.mrf.mxu1  ;;  %v2000_v60 = vpop.f32.mrf.mxu0  ;;  %2167 = vmatmul.mubr.bf16.gmra.mxu1 %v4325_v22 }
 0x2f8   :  { %v4908_v41 = vadd.f32 %v2000_v60, %v1711_v11  ;;  %2384 = vmatpush1.bf16.msra.mxu0 %v2066_v47  ;;  %2174 = vmatprep.mubr.bf16.mxu1 %v4326_v46 }
 0x2f9   :  { %v1713_v49 = vpop.f32.mrf.mxu1  ;;  %v2002_v24 = vpop.f32.mrf.mxu0  ;;  %2385 = vmatprep.subr.bf16.mxu0 %v4526_v40 }
 0x2fa   :  { %v4335_v49 = vld [vmem:[#allocation2 + $0x160] ss:$16 sps:$4 sm:$0xff]   ;;  %v4336_v24 = vld [vmem:[#allocation2 + $0x184] ss:$16 sps:$4 sm:$0xff]  }
 0x2fb   :  { %v4912_v52 = vpop.f32.mrf.mxu1  ;;  %v4914_v45 = vpop.f32.mrf.mxu0 }
 0x2fc   :  { %2386 = vmatpush1.bf16.msra.mxu0 %v2065_v32 }
 0x2fd   :  { %v1716_v36 = vpop.f32.mrf.mxu1  ;;  %v2005_v38 = vpop.f32.mrf.mxu0  ;;  %2387 = vmatprep.subr.bf16.mxu0 %v4526_v40 }
 0x2ff   :  { %v4917_v9 = vpop.f32.mrf.mxu1  ;;  %v4919_v6 = vpop.f32.mrf.mxu0  ;;  %2175 = vmatmul.mubr.bf16.gmra.mxu1 %v4327_v14 }
 0x300   :  { %2388 = vmatpush1.bf16.msra.mxu0 %v2064_v51  ;;  %2182 = vmatprep.mubr.bf16.mxu1 %v4328_v20  ;;  %v4329_v51 = vld [vmem:[#allocation2 + $0x100] ss:$16 sps:$4 sm:$0xff]  }
 0x301   :  { %v1721_v26 = vpop.f32.mrf.mxu1  ;;  %v2010_v28 = vpop.f32.mrf.mxu0  ;;  %2389 = vmatprep.subr.bf16.mxu0 %v4526_v40 }
 0x303   :  { %v4925_v23 = vpop.f32.mrf.mxu1  ;;  %v4927_v15 = vpop.f32.mrf.mxu0 }
 0x304   :  { %2390 = vmatpush1.bf16.msra.mxu0 %v2063_v27  ;;  %v4331_v27 = vld [vmem:[#allocation2 + $0x120] ss:$16 sps:$4 sm:$0xff]  }
 0x305   :  { %v1724_v8 = vpop.f32.mrf.mxu1  ;;  %v2013_v62 = vpop.f32.mrf.mxu0  ;;  %2391 = vmatprep.subr.bf16.mxu0 %v4526_v40 }
 0x307   :  { %v4933_v5 = vpop.f32.mrf.mxu1  ;;  %v4935_v42 = vpop.f32.mrf.mxu0  ;;  %2183 = vmatmul.mubr.bf16.gmra.mxu1 %v4329_v51 }
 0x308   :  { %2190 = vmatprep.mubr.bf16.mxu1 %v4330_v39  ;;  %v4337_v39 = vld [vmem:[#allocation2 + $0x180] ss:$16 sps:$4 sm:$0xff]  }
 0x309   :  { %v1729_v1 = vpop.f32.mrf.mxu1  ;;  %v2018_v16 = vpop.f32.mrf.mxu0 }
 0x30a   :  { %v4338_v16 = vld [vmem:[#allocation2 + $0x1a4] ss:$16 sps:$4 sm:$0xff]  }
 0x30b   :  { %v1730_v56 = vpop.f32.mrf.mxu1  ;;  %v2019_v31 = vpop.f32.mrf.mxu0 }
 0x30d   :  { %v1732_v13 = vpop.f32.mrf.mxu1  ;;  %v2021_v37 = vpop.f32.mrf.mxu0 }
 0x30f   :  { %v1735_v25 = vpop.f32.mrf.mxu1  ;;  %v2024_v48 = vpop.f32.mrf.mxu0  ;;  %2191 = vmatmul.mubr.bf16.gmra.mxu1 %v4331_v27 }
 0x310   :  { %2198 = vmatprep.mubr.bf16.mxu1 %v4332_v55  ;;  %v2025_v27 = vadd.f32 %v2024_v48, %v1735_v25  ;;  %v2020_v55 = vadd.f32 %v2019_v31, %v1730_v56  ;;  %v2009_v25 = vadd.f32 %v4919_v6, %v4917_v9  ;;  %v2004_v56 = vadd.f32 %v4914_v45, %v4912_v52  ;;  %v4343_v9 = vld [vmem:[#allocation2 + $0x1e0] ss:$16 sps:$4 sm:$0xff]   ;;  %v4344_v52 = vld [vmem:[#allocation2 + $0x204] ss:$16 sps:$4 sm:$0xff]   ;;  %v4345_v45 = vld [vmem:[#allocation2 + $0x8] ss:$16 sps:$4 sm:$0xff]  }
 0x311   :  { %v1737_v53 = vpop.f32.mrf.mxu1  ;;  %v2026_v3 = vpop.f32.mrf.mxu0  ;;  %v4347_v6 = vld [vmem:[#allocation2 + $0x2c] ss:$16 sps:$4 sm:$0xff]   ;;  %v4349_v48 = vld [vmem:[#allocation2 + $0x28] ss:$16 sps:$4 sm:$0xff]  }
 0x312   :  { %v4339_v3 = vld [vmem:[#allocation2 + $0x1a0] ss:$16 sps:$4 sm:$0xff]  }
 0x313   :  { %v1738_v34 = vpop.f32.mrf.mxu1  ;;  %v2027_v7 = vpop.f32.mrf.mxu0 }
 0x314   :  { %v2028_v13 = vadd.f32 %v2027_v7, %v1738_v34  ;;  %v2012_v34 = vadd.f32 %v4927_v15, %v4925_v23  ;;  %v2073_v23 = vpack.c.bf16 %v2004_v56, %v4908_v41  ;;  %v4346_v41 = vld [vmem:[#allocation2 + $0x200] ss:$16 sps:$4 sm:$0xff]   ;;  %v4348_v15 = vld [vmem:[#allocation2 + $0x224] ss:$16 sps:$4 sm:$0xff]  }
 0x315   :  { %v1740_v17 = vpop.f32.mrf.mxu1  ;;  %v2029_v44 = vpop.f32.mrf.mxu0  ;;  %v4386_v56 = vld [vmem:[#allocation2 + $0x340] ss:$16 sps:$4 sm:$0xff]  }
 0x316   :  { %v2076_v53 = vpack.c.bf16 %v2028_v13, %v2025_v27  ;;  %v2017_v17 = vadd.f32 %v4935_v42, %v4933_v5  ;;  %v4340_v44 = vld [vmem:[#allocation2 + $0x1c4] ss:$16 sps:$4 sm:$0xff]   ;;  %v2074_v31 = vpack.c.bf16 %v2012_v34, %v2009_v25  ;;  %v4341_v5 = vld [vmem:[#allocation2 + $0x1c0] ss:$16 sps:$4 sm:$0xff]  }
 0x317   :  { %v1743_v21 = vpop.f32.mrf.mxu1  ;;  %v2032_v57 = vpop.f32.mrf.mxu0  ;;  %2199 = vmatmul.mubr.bf16.gmra.mxu1 %v4333_v19  ;;  %v4342_v42 = vld [vmem:[#allocation2 + $0x1e4] ss:$16 sps:$4 sm:$0xff]   ;;  %v4359_v19 = vld [vmem:[#allocation2 + $0x8c] ss:$16 sps:$4 sm:$0xff]  }
 0x318   :  { %2206 = vmatprep.mubr.bf16.mxu1 %v4334_v61  ;;  %v2033_v1 = vadd.f32 %v2032_v57, %v1743_v21  ;;  %v2075_v7 = vpack.c.bf16 %v2020_v55, %v2017_v17  ;;  %v4357_v21 = vld [vmem:[#allocation2 + $0x68] ss:$16 sps:$4 sm:$0xff]   ;;  %v4358_v57 = vld [vmem:[#allocation2 + $0x260] ss:$16 sps:$4 sm:$0xff]   ;;  %v4360_v61 = vld [vmem:[#allocation2 + $0x284] ss:$16 sps:$4 sm:$0xff]  }
 0x319   :  { %v1745_v50 = vpop.f32.mrf.mxu1  ;;  %v2034_v4 = vpop.f32.mrf.mxu0  ;;  %v4382_v55 = vld [vmem:[#allocation2 + $0x320] ss:$16 sps:$4 sm:$0xff]  }
 0x31a   :  { %v4361_v50 = vld [vmem:[#allocation2 + $0x88] ss:$16 sps:$4 sm:$0xff]   ;;  %v4362_v4 = vld [vmem:[#allocation2 + $0x280] ss:$16 sps:$4 sm:$0xff]  }
 0x31b   :  { %v1746_v58 = vpop.f32.mrf.mxu1  ;;  %v2035_v47 = vpop.f32.mrf.mxu0 }
 0x31c   :  { %v2036_v62 = vadd.f32 %v2035_v47, %v1746_v58  ;;  %v4363_v58 = vld [vmem:[#allocation2 + $0xac] ss:$16 sps:$4 sm:$0xff]   ;;  %v4364_v47 = vld [vmem:[#allocation2 + $0x2a4] ss:$16 sps:$4 sm:$0xff]  }
 0x31d   :  { %v1748_v11 = vpop.f32.mrf.mxu1  ;;  %v2037_v60 = vpop.f32.mrf.mxu0 }
 0x31e   :  { %v2077_v37 = vpack.c.bf16 %v2036_v62, %v2033_v1  ;;  %v4365_v11 = vld [vmem:[#allocation2 + $0xa8] ss:$16 sps:$4 sm:$0xff]   ;;  %v4366_v60 = vld [vmem:[#allocation2 + $0x2a0] ss:$16 sps:$4 sm:$0xff]  }
 0x31f   :  { %v1751_v22 = vpop.f32.mrf.mxu1  ;;  %v2040_v46 = vpop.f32.mrf.mxu0  ;;  %2207 = vmatmul.mubr.bf16.gmra.mxu1 %v4335_v49  ;;  %v4369_v49 = vld [vmem:[#allocation2 + $0xc8] ss:$16 sps:$4 sm:$0xff]   ;;  %v4378_v62 = vld [vmem:[#allocation2 + $0x300] ss:$16 sps:$4 sm:$0xff]  }
 0x320   :  { %2214 = vmatprep.mubr.bf16.mxu1 %v4336_v24  ;;  %v2041_v20 = vadd.f32 %v2040_v46, %v1751_v22  ;;  %v4367_v22 = vld [vmem:[#allocation2 + $0xcc] ss:$16 sps:$4 sm:$0xff]   ;;  %v4368_v46 = vld [vmem:[#allocation2 + $0x2c4] ss:$16 sps:$4 sm:$0xff]   ;;  %v4370_v24 = vld [vmem:[#allocation2 + $0x2c0] ss:$16 sps:$4 sm:$0xff]  }
 0x321   :  { %v1753_v32 = vpop.f32.mrf.mxu1  ;;  %v2042_v36 = vpop.f32.mrf.mxu0 }
 0x322   :  { %v4371_v32 = vld [vmem:[#allocation2 + $0xec] ss:$16 sps:$4 sm:$0xff]   ;;  %v4372_v36 = vld [vmem:[#allocation2 + $0x2e4] ss:$16 sps:$4 sm:$0xff]  }
 0x323   :  { %v1754_v38 = vpop.f32.mrf.mxu1  ;;  %v2043_v14 = vpop.f32.mrf.mxu0 }
 0x324   :  { %v2044_v26 = vadd.f32 %v2043_v14, %v1754_v38  ;;  %v4373_v38 = vld [vmem:[#allocation2 + $0xe8] ss:$16 sps:$4 sm:$0xff]   ;;  %v4374_v14 = vld [vmem:[#allocation2 + $0x2e0] ss:$16 sps:$4 sm:$0xff]  }
 0x325   :  { %v1756_v28 = vpop.f32.mrf.mxu1  ;;  %v2045_v8 = vpop.f32.mrf.mxu0 }
 0x326   :  { %v2078_v51 = vpack.c.bf16 %v2044_v26, %v2041_v20  ;;  %v4375_v20 = vld [vmem:[#allocation2 + $0x10c] ss:$16 sps:$4 sm:$0xff]   ;;  %v4376_v26 = vld [vmem:[#allocation2 + $0x304] ss:$16 sps:$4 sm:$0xff]   ;;  %v4377_v28 = vld [vmem:[#allocation2 + $0x108] ss:$16 sps:$4 sm:$0xff]  }
 0x327   :  { %2215 = vmatmul.mubr.bf16.gmra.mxu1 %v4337_v39  ;;  %v4380_v39 = vld [vmem:[#allocation2 + $0x324] ss:$16 sps:$4 sm:$0xff]  }
 0x328   :  { %2392 = vmatpush2.bf16.msra.mxu0 %v2078_v51  ;;  %2222 = vmatprep.mubr.bf16.mxu1 %v4338_v16  ;;  %v4379_v51 = vld [vmem:[#allocation2 + $0x12c] ss:$16 sps:$4 sm:$0xff]  }
 0x329   :  { %2393 = vmatprep.subr.bf16.mxu0 %v4526_v40 }
 0x32c   :  { %2394 = vmatpush2.bf16.msra.mxu0 %v2077_v37  ;;  %v4381_v37 = vld [vmem:[#allocation2 + $0x128] ss:$16 sps:$4 sm:$0xff]  }
 0x32d   :  { %2395 = vmatprep.subr.bf16.mxu0 %v4526_v40 }
 0x32f   :  { %2223 = vmatmul.mubr.bf16.gmra.mxu1 %v4339_v3  ;;  %v4384_v3 = vld [vmem:[#allocation2 + $0x344] ss:$16 sps:$4 sm:$0xff]  }
 0x330   :  { %2396 = vmatpush2.bf16.msra.mxu0 %v2076_v53  ;;  %2230 = vmatprep.mubr.bf16.mxu1 %v4340_v44  ;;  %v4383_v53 = vld [vmem:[#allocation2 + $0x14c] ss:$16 sps:$4 sm:$0xff]  }
 0x331   :  { %2397 = vmatprep.subr.bf16.mxu0 %v4526_v40 }
 0x334   :  { %2398 = vmatpush2.bf16.msra.mxu0 %v2075_v7  ;;  %v4385_v7 = vld [vmem:[#allocation2 + $0x148] ss:$16 sps:$4 sm:$0xff]  }
 0x335   :  { %2399 = vmatprep.subr.bf16.mxu0 %v4526_v40 }
 0x337   :  { %2231 = vmatmul.mubr.bf16.gmra.mxu1 %v4341_v5  ;;  %v4388_v5 = vld [vmem:[#allocation2 + $0x364] ss:$16 sps:$4 sm:$0xff]  }
 0x338   :  { %2400 = vmatpush2.bf16.msra.mxu0 %v2074_v31  ;;  %2238 = vmatprep.mubr.bf16.mxu1 %v4342_v42  ;;  %v4387_v31 = vld [vmem:[#allocation2 + $0x16c] ss:$16 sps:$4 sm:$0xff]  }
 0x339   :  { %2401 = vmatprep.subr.bf16.mxu0 %v4526_v40 }
 0x33c   :  { %2402 = vmatpush2.bf16.msra.mxu0 %v2073_v23 }
 0x33d   :  { %2403 = vmatprep.subr.bf16.mxu0 %v4526_v40 }
 0x33f   :  { %2239 = vmatmul.mubr.bf16.gmra.mxu1 %v4343_v9 }
 0x340   :  { %2404 = vmatpush2.bf16.msra.mxu0 %v2072_v29  ;;  %2246 = vmatprep.mubr.bf16.mxu1 %v4344_v52  ;;  %v4352_v29 = vld [vmem:[#allocation2 + $0x244] ss:$16 sps:$4 sm:$0xff]   ;;  %v4389_v52 = vld [vmem:[#allocation2 + $0x168] ss:$16 sps:$4 sm:$0xff]  }
 0x341   :  { %2405 = vmatprep.subr.bf16.mxu0 %v4526_v40  ;;  %v4353_v40 = vld [vmem:[#allocation2 + $0x48] ss:$16 sps:$4 sm:$0xff]  }
 0x344   :  { %2406 = vmatpush2.bf16.msra.mxu0 %v2071_v59  ;;  %v4356_v59 = vld [vmem:[#allocation2 + $0x264] ss:$16 sps:$4 sm:$0xff]  }
 0x347   :  { %2408 = vmatmul.mubr.bf16.vlgmr.msra.gmra.mxu0 %v4345_v45  ;;  %2247 = vmatmul.mubr.bf16.gmra.mxu1 %v4346_v41  ;;  %v4390_v41 = vld [vmem:[#allocation2 + $0x360] ss:$16 sps:$4 sm:$0xff]  }
 0x348   :  { %2415 = vmatprep.mubr.bf16.mxu0 %v4347_v6  ;;  %2254 = vmatprep.mubr.bf16.mxu1 %v4348_v15  ;;  %v4391_v6 = vld [vmem:[#allocation2 + $0x18c] ss:$16 sps:$4 sm:$0xff]   ;;  %v4392_v15 = vld [vmem:[#allocation2 + $0x384] ss:$16 sps:$4 sm:$0xff]  }
 0x34f   :  { %2416 = vmatmul.mubr.bf16.gmra.mxu0 %v4349_v48  ;;  %2255 = vmatmul.mubr.bf16.gmra.mxu1 %v4350_v63 }
 0x350   :  { %2423 = vmatprep.mubr.bf16.mxu0 %v4351_v43  ;;  %2262 = vmatprep.mubr.bf16.mxu1 %v4352_v29  ;;  %v4393_v29 = vld [vmem:[#allocation2 + $0x188] ss:$16 sps:$4 sm:$0xff]  }
 0x357   :  { %2424 = vmatmul.mubr.bf16.gmra.mxu0 %v4353_v40  ;;  %2263 = vmatmul.mubr.bf16.gmra.mxu1 %v4354_v18  ;;  %v4394_v18 = vld [vmem:[#allocation2 + $0x1ac] ss:$16 sps:$4 sm:$0xff]  }
 0x358   :  { %2431 = vmatprep.mubr.bf16.mxu0 %v4355_v30  ;;  %2270 = vmatprep.mubr.bf16.mxu1 %v4356_v59 }
 0x35f   :  { %2432 = vmatmul.mubr.bf16.gmra.mxu0 %v4357_v21  ;;  %2271 = vmatmul.mubr.bf16.gmra.mxu1 %v4358_v57  ;;  %v4395_v57 = vld [vmem:[#allocation2 + $0x1a8] ss:$16 sps:$4 sm:$0xff]  }
 0x360   :  { %2439 = vmatprep.mubr.bf16.mxu0 %v4359_v19  ;;  %2278 = vmatprep.mubr.bf16.mxu1 %v4360_v61  ;;  %v4396_v61 = vld [vmem:[#allocation2 + $0x1cc] ss:$16 sps:$4 sm:$0xff]  }
 0x367   :  { %2440 = vmatmul.mubr.bf16.gmra.mxu0 %v4361_v50  ;;  %2279 = vmatmul.mubr.bf16.gmra.mxu1 %v4362_v4 }
 0x368   :  { %2447 = vmatprep.mubr.bf16.mxu0 %v4363_v58  ;;  %2286 = vmatprep.mubr.bf16.mxu1 %v4364_v47  ;;  %v4397_v58 = vld [vmem:[#allocation2 + $0x1c8] ss:$16 sps:$4 sm:$0xff]   ;;  %v4398_v47 = vld [vmem:[#allocation2 + $0x1ec] ss:$16 sps:$4 sm:$0xff]  }
 0x36f   :  { %2448 = vmatmul.mubr.bf16.gmra.mxu0 %v4365_v11  ;;  %2287 = vmatmul.mubr.bf16.gmra.mxu1 %v4366_v60 }
 0x370   :  { %2455 = vmatprep.mubr.bf16.mxu0 %v4367_v22  ;;  %2294 = vmatprep.mubr.bf16.mxu1 %v4368_v46  ;;  %v4399_v22 = vld [vmem:[#allocation2 + $0x1e8] ss:$16 sps:$4 sm:$0xff]   ;;  %v4400_v46 = vld [vmem:[#allocation2 + $0x20c] ss:$16 sps:$4 sm:$0xff]  }
 0x377   :  { %2456 = vmatmul.mubr.bf16.gmra.mxu0 %v4369_v49  ;;  %2295 = vmatmul.mubr.bf16.gmra.mxu1 %v4370_v24 }
 0x378   :  { %2463 = vmatprep.mubr.bf16.mxu0 %v4371_v32  ;;  %2302 = vmatprep.mubr.bf16.mxu1 %v4372_v36  ;;  %v4401_v32 = vld [vmem:[#allocation2 + $0x208] ss:$16 sps:$4 sm:$0xff]  }
 0x37f   :  { %2464 = vmatmul.mubr.bf16.gmra.mxu0 %v4373_v38  ;;  %2303 = vmatmul.mubr.bf16.gmra.mxu1 %v4374_v14 }
 0x380   :  { %2471 = vmatprep.mubr.bf16.mxu0 %v4375_v20  ;;  %2310 = vmatprep.mubr.bf16.mxu1 %v4376_v26  ;;  %v4403_v26 = vld [vmem:[#allocation2 + $0x228] ss:$16 sps:$4 sm:$0xff]  }
 0x387   :  { %2472 = vmatmul.mubr.bf16.gmra.mxu0 %v4377_v28  ;;  %v4959_v8 = vpop.f32.mrf.mxu1  ;;  %2311 = vmatmul.mubr.bf16.gmra.mxu1 %v4378_v62 }
 0x388   :  { %2479 = vmatprep.mubr.bf16.mxu0 %v4379_v51  ;;  %2318 = vmatprep.mubr.bf16.mxu1 %v4380_v39 }
 0x389   :  { %v2122_v1 = vpop.f32.mrf.mxu1 }
 0x38a   :  { %v4405_v1 = vld [vmem:[#allocation2 + $0x248] ss:$16 sps:$4 sm:$0xff]  }
 0x38b   :  { %v4961_v16 = vpop.f32.mrf.mxu1 }
 0x38d   :  { %v2125_v13 = vpop.f32.mrf.mxu1 }
 0x38f   :  { %2480 = vmatmul.mubr.bf16.gmra.mxu0 %v4381_v37  ;;  %v4963_v27 = vpop.f32.mrf.mxu1  ;;  %2319 = vmatmul.mubr.bf16.gmra.mxu1 %v4382_v55  ;;  %v4406_v37 = vld [vmem:[#allocation2 + $0x26c] ss:$16 sps:$4 sm:$0xff]  }
 0x390   :  { %2487 = vmatprep.mubr.bf16.mxu0 %v4383_v53  ;;  %2326 = vmatprep.mubr.bf16.mxu1 %v4384_v3 }
 0x391   :  { %v2130_v17 = vpop.f32.mrf.mxu1 }
 0x392   :  { %v4407_v17 = vld [vmem:[#allocation2 + $0x268] ss:$16 sps:$4 sm:$0xff]  }
 0x393   :  { %v4965_v44 = vpop.f32.mrf.mxu1 }
 0x395   :  { %v2133_v34 = vpop.f32.mrf.mxu1 }
 0x397   :  { %2488 = vmatmul.mubr.bf16.gmra.mxu0 %v4385_v7  ;;  %v4967_v25 = vpop.f32.mrf.mxu1  ;;  %2327 = vmatmul.mubr.bf16.gmra.mxu1 %v4386_v56  ;;  %v4408_v7 = vld [vmem:[#allocation2 + $0x28c] ss:$16 sps:$4 sm:$0xff]  }
 0x398   :  { %2495 = vmatprep.mubr.bf16.mxu0 %v4387_v31  ;;  %2334 = vmatprep.mubr.bf16.mxu1 %v4388_v5 }
 0x399   :  { %v2138_v42 = vpop.f32.mrf.mxu1 }
 0x39a   :  { %v4409_v42 = vld [vmem:[#allocation2 + $0x288] ss:$16 sps:$4 sm:$0xff]  }
 0x39b   :  { %v4969_v23 = vpop.f32.mrf.mxu1 }
 0x39d   :  { %v2141_v9 = vpop.f32.mrf.mxu1 }
 0x39f   :  { %2496 = vmatmul.mubr.bf16.gmra.mxu0 %v4389_v52  ;;  %v4971_v45 = vpop.f32.mrf.mxu1  ;;  %2335 = vmatmul.mubr.bf16.gmra.mxu1 %v4390_v41  ;;  %v4410_v52 = vld [vmem:[#allocation2 + $0x2ac] ss:$16 sps:$4 sm:$0xff]  }
 0x3a0   :  { %2503 = vmatprep.mubr.bf16.mxu0 %v4391_v6  ;;  %2342 = vmatprep.mubr.bf16.mxu1 %v4392_v15 }
 0x3a1   :  { %v2146_v48 = vpop.f32.mrf.mxu1 }
 0x3a2   :  { %v4411_v48 = vld [vmem:[#allocation2 + $0x2a8] ss:$16 sps:$4 sm:$0xff]  }
 0x3a3   :  { %v4973_v63 = vpop.f32.mrf.mxu1 }
 0x3a5   :  { %v2149_v43 = vpop.f32.mrf.mxu1 }
 0x3a7   :  { %2504 = vmatmul.mubr.bf16.gmra.mxu0 %v4393_v29  ;;  %v4975_v40 = vpop.f32.mrf.mxu1  ;;  %2343 = vmatmul.mubr.bf16.gmra.mxu1 %v4744_v0  ;;  %v4412_v29 = vld [vmem:[#allocation2 + $0x2cc] ss:$16 sps:$4 sm:$0xff]  }
 0x3a8   :  { %2511 = vmatprep.mubr.bf16.mxu0 %v4394_v18  ;;  %2350 = vmatprep.mubr.bf16.mxu1 %v4746_v2 }
 0x3a9   :  { %v2154_v30 = vpop.f32.mrf.mxu1 }
 0x3ab   :  { %v4979_v59 = vpop.f32.mrf.mxu1 }
 0x3ad   :  { %v2157_v21 = vpop.f32.mrf.mxu1 }
 0x3af   :  { %2512 = vmatmul.mubr.bf16.gmra.mxu0 %v4395_v57  ;;  %v4981_v19 = vpop.f32.mrf.mxu1  ;;  %2351 = vmatmul.mubr.bf16.gmra.mxu1 %v4758_v10  ;;  %v4413_v57 = vld [vmem:[#allocation2 + $0x2c8] ss:$16 sps:$4 sm:$0xff]  }
 0x3b0   :  { %2519 = vmatprep.mubr.bf16.mxu0 %v4396_v61  ;;  %2358 = vmatprep.mubr.bf16.mxu1 %v4760_v12 }
 0x3b1   :  { %v2162_v50 = vpop.f32.mrf.mxu1 }
 0x3b2   :  { %v4414_v50 = vld [vmem:[#allocation2 + $0x2ec] ss:$16 sps:$4 sm:$0xff]  }
 0x3b3   :  { %v4985_v0 = vpop.f32.mrf.mxu1 }
 0x3b5   :  { %v2165_v4 = vpop.f32.mrf.mxu1 }
 0x3b7   :  { %2520 = vmatmul.mubr.bf16.gmra.mxu0 %v4397_v58  ;;  %v4987_v2 = vpop.f32.mrf.mxu1  ;;  %2359 = vmatmul.mubr.bf16.gmra.mxu1 %v4764_v33 }
 0x3b8   :  { %2527 = vmatprep.mubr.bf16.mxu0 %v4398_v47  ;;  %2366 = vmatprep.mubr.bf16.mxu1 %v4766_v35  ;;  %v4402_v35 = vld [vmem:[#allocation2 + $0x22c] ss:$16 sps:$4 sm:$0xff]  }
 0x3b9   :  { %v2170_v11 = vpop.f32.mrf.mxu1 }
 0x3ba   :  { %v4415_v11 = vld [vmem:[#allocation2 + $0x2e8] ss:$16 sps:$4 sm:$0xff]  }
 0x3bb   :  { %v4991_v10 = vpop.f32.mrf.mxu1 }
 0x3bd   :  { %v2173_v60 = vpop.f32.mrf.mxu1 }
 0x3be   :  { %v2664_v60 = vlaneseq }
 0x3bf   :  { %2528 = vmatmul.mubr.bf16.gmra.mxu0 %v4399_v22  ;;  %v4993_v12 = vpop.f32.mrf.mxu1  ;;  %2367 = vmatmul.mubr.bf16.gmra.mxu1 %v4770_v54  ;;  %v4404_v54 = vld [vmem:[#allocation2 + $0x24c] ss:$16 sps:$4 sm:$0xff]  }
 0x3c0   :  { %2535 = vmatprep.mubr.bf16.mxu0 %v4400_v46  ;;  %v4416_v46 = vld [vmem:[#allocation2 + $0x30c] ss:$16 sps:$4 sm:$0xff]  }
 0x3c1   :  { %v2178_v49 = vpop.f32.mrf.mxu1 }
 0x3c2   :  { %v5031_v49 = vld [vmem:[%s6009_s3] ss:$0 sm:$0xff] }
 0x3c3   :  { %v4996_v24 = vpop.f32.mrf.mxu1 }
 0x3c5   :  { %v2181_v33 = vpop.f32.mrf.mxu1 }
 0x3c7   :  { %2536 = vmatmul.mubr.bf16.gmra.mxu0 %v4401_v32  ;;  %v4998_v36 = vpop.f32.mrf.mxu1  ;;  %v5033_v32 = vand.u32 127, %v2664_v60  ;;  %v2137_v60 = vadd.f32 %v5031_v49, %v4967_v25  ;;  %v2140_v25 = vadd.f32 %v5031_v49, %v4969_v23 }
 0x3c8   :  { %2543 = vmatprep.mubr.bf16.mxu0 %v4402_v35 }
 0x3c9   :  { %v2186_v38 = vpop.f32.mrf.mxu1  ;;  %vm2666_vm0 = vcmp.lt.s32.totalorder %v5033_v32, 4 }
 0x3ca   :  { %v2121_v38 = vadd.f32 %v5031_v49, %v4959_v8 }
 0x3cb   :  { %v5000_v14 = vpop.f32.mrf.mxu1 }
 0x3cd   :  { %v2189_v20 = vpop.f32.mrf.mxu1 }
 0x3cf   :  { %2544 = vmatmul.mubr.bf16.gmra.mxu0 %v4403_v26  ;;  %v5002_v28 = vpop.f32.mrf.mxu1 }
 0x3d0   :  { %2551 = vmatprep.mubr.bf16.mxu0 %v4404_v54  ;;  %v4417_v54 = vld [vmem:[#allocation2 + $0x308] ss:$16 sps:$4 sm:$0xff]  }
 0x3d1   :  { %v2194_v62 = vpop.f32.mrf.mxu1 }
 0x3d3   :  { %v5004_v51 = vpop.f32.mrf.mxu1 }
 0x3d5   :  { %v2197_v39 = vpop.f32.mrf.mxu1 }
 0x3d7   :  { %2552 = vmatmul.mubr.bf16.gmra.mxu0 %v4405_v1  ;;  %v5006_v13 = vpop.f32.mrf.mxu1  ;;  %v4418_v1 = vld [vmem:[#allocation2 + $0x32c] ss:$16 sps:$4 sm:$0xff]  }
 0x3d8   :  { %2559 = vmatprep.mubr.bf16.mxu0 %v4406_v37 }
 0x3d9   :  { %v2202_v55 = vpop.f32.mrf.mxu1 }
 0x3db   :  { %v5008_v53 = vpop.f32.mrf.mxu1 }
 0x3dd   :  { %v2205_v3 = vpop.f32.mrf.mxu1 }
 0x3de   :  { %v2124_v3 = vadd.f32 %v5031_v49, %v4961_v16 }
 0x3df   :  { %2560 = vmatmul.mubr.bf16.gmra.mxu0 %v4407_v17  ;;  %v5010_v34 = vpop.f32.mrf.mxu1 }
 0x3e0   :  { %2567 = vmatprep.mubr.bf16.mxu0 %v4408_v7 }
 0x3e1   :  { %v2210_v56 = vpop.f32.mrf.mxu1 }
 0x3e3   :  { %v5012_v31 = vpop.f32.mrf.mxu1 }
 0x3e5   :  { %v2213_v5 = vpop.f32.mrf.mxu1 }
 0x3e6   :  { %v2129_v5 = vadd.f32 %v5031_v49, %v4963_v27  ;;  %v2132_v27 = vadd.f32 %v5031_v49, %v4965_v44 }
 0x3e7   :  { %2568 = vmatmul.mubr.bf16.gmra.mxu0 %v4409_v42  ;;  %v5014_v9 = vpop.f32.mrf.mxu1 }
 0x3e8   :  { %2575 = vmatprep.mubr.bf16.mxu0 %v4410_v52 }
 0x3e9   :  { %v2218_v41 = vpop.f32.mrf.mxu1 }
 0x3eb   :  { %v5016_v6 = vpop.f32.mrf.mxu1 }
 0x3ed   :  { %v2221_v15 = vpop.f32.mrf.mxu1 }
 0x3ee   :  { %v4419_v15 = vld [vmem:[#allocation2 + $0x328] ss:$16 sps:$4 sm:$0xff]  }
 0x3ef   :  { %2576 = vmatmul.mubr.bf16.gmra.mxu0 %v4411_v48  ;;  %v5018_v43 = vpop.f32.mrf.mxu1 }
 0x3f0   :  { %2583 = vmatprep.mubr.bf16.mxu0 %v4412_v29 }
 0x3f1   :  { %v2226_v18 = vpop.f32.mrf.mxu1 }
 0x3f2   :  { %v4420_v18 = vld [vmem:[#allocation2 + $0x34c] ss:$16 sps:$4 sm:$0xff]  }
 0x3f3   :  { %v5020_v30 = vpop.f32.mrf.mxu1 }
 0x3f5   :  { %v2229_v21 = vpop.f32.mrf.mxu1 }
 0x3f7   :  { %2584 = vmatmul.mubr.bf16.gmra.mxu0 %v4413_v57  ;;  %v5022_v61 = vpop.f32.mrf.mxu1 }
 0x3f8   :  { %2591 = vmatprep.mubr.bf16.mxu0 %v4414_v50 }
 0x3f9   :  { %v2234_v4 = vpop.f32.mrf.mxu1 }
 0x3fb   :  { %v5024_v58 = vpop.f32.mrf.mxu1 }
 0x3fd   :  { %v2237_v47 = vpop.f32.mrf.mxu1 }
 0x3ff   :  { %2592 = vmatmul.mubr.bf16.gmra.mxu0 %v4415_v11  ;;  %v5026_v22 = vpop.f32.mrf.mxu1 }
 0x400   :  { %2599 = vmatprep.mubr.bf16.mxu0 %v4416_v46 }
 0x401   :  { %v2242_v33 = vpop.f32.mrf.mxu1 }
 0x403   :  { %v5035_v35 = vpop.f32.mrf.mxu1 }
 0x405   :  { %v2245_v20 = vpop.f32.mrf.mxu1 }
 0x406   :  { %v4421_v20 = vld [vmem:[#allocation2 + $0x348] ss:$16 sps:$4 sm:$0xff]  }
 0x407   :  { %v2409_v26 = vpop.f32.mrf.mxu0  ;;  %2600 = vmatmul.mubr.bf16.gmra.mxu0 %v4417_v54  ;;  %v5040_v62 = vpop.f32.mrf.mxu1 }
 0x408   :  { %v2410_v39 = vadd.f32 %v2409_v26, %v2121_v38  ;;  %2607 = vmatprep.mubr.bf16.mxu0 %v4418_v1 }
 0x409   :  { %v2411_v37 = vpop.f32.mrf.mxu0  ;;  %v2250_v55 = vpop.f32.mrf.mxu1 }
 0x40a   :  { %v5046_v17 = vsel %vm2666_vm0, %v2410_v39, -1e+30  ;;  %v4422_v39 = vld [vmem:[#allocation2 + $0x36c] ss:$16 sps:$4 sm:$0xff]  }
 0x40b   :  { %v2412_v8 = vpop.f32.mrf.mxu0  ;;  %2731 = vmax.xlane.f32.xlu0 %v5046_v17  ;;  %v5049_v7 = vpop.f32.mrf.mxu1 }
 0x40c   :  { %v2413_v56 = vadd.f32 %v2412_v8, %v2124_v3 }
 0x40d   :  { %v2414_v42 = vpop.f32.mrf.mxu0  ;;  %v2253_v52 = vpop.f32.mrf.mxu1 }
 0x40e   :  { %v5055_v41 = vsel %vm2666_vm0, %v2413_v56, -1e+30 }
 0x40f   :  { %v2417_v16 = vpop.f32.mrf.mxu0  ;;  %2608 = vmatmul.mubr.bf16.gmra.mxu0 %v4419_v15  ;;  %2733 = vmax.xlane.f32.xlu0 %v5055_v41  ;;  %v5058_v48 = vpop.f32.mrf.mxu1  ;;  %v4423_v15 = vld [vmem:[#allocation2 + $0x368] ss:$16 sps:$4 sm:$0xff]  }
 0x410   :  { %v2418_v29 = vadd.f32 %v2417_v16, %v2129_v5  ;;  %2615 = vmatprep.mubr.bf16.mxu0 %v4420_v18  ;;  %v2145_v5 = vadd.f32 %v5031_v49, %v4971_v45  ;;  %v2148_v45 = vadd.f32 %v5031_v49, %v4973_v63 }
 0x411   :  { %v2419_v21 = vpop.f32.mrf.mxu0  ;;  %v2258_v57 = vpop.f32.mrf.mxu1 }
 0x412   :  { %v5064_v50 = vsel %vm2666_vm0, %v2418_v29, -1e+30  ;;  %v4424_v21 = vld [vmem:[#allocation2 + $0x38c] ss:$16 sps:$4 sm:$0xff]  }
 0x413   :  { %v2420_v4 = vpop.f32.mrf.mxu0  ;;  %2735 = vmax.xlane.f32.xlu1 %v5064_v50  ;;  %v5067_v47 = vpop.f32.mrf.mxu1 }
 0x414   :  { %v2421_v11 = vadd.f32 %v2420_v4, %v2132_v27 }
 0x415   :  { %v2422_v46 = vpop.f32.mrf.mxu0  ;;  %v2261_v33 = vpop.f32.mrf.mxu1 }
 0x416   :  { %v5073_v38 = vsel %vm2666_vm0, %v2421_v11, -1e+30  ;;  %v2153_v33 = vadd.f32 %v5031_v49, %v4975_v40  ;;  %v2156_v40 = vadd.f32 %v5031_v49, %v4979_v59 }
 0x417   :  { %v2425_v44 = vpop.f32.mrf.mxu0  ;;  %2616 = vmatmul.mubr.bf16.gmra.mxu0 %v4421_v20  ;;  %2737 = vmax.xlane.f32.xlu1 %v5073_v38  ;;  %v5076_v26 = vpop.f32.mrf.mxu1 }
 0x418   :  { %v2426_v54 = vadd.f32 %v2425_v44, %v2137_v60  ;;  %2623 = vmatprep.mubr.bf16.mxu0 %v4422_v39  ;;  %v4425_v39 = vld [vmem:[#allocation2 + $0x388] ss:$16 sps:$4 sm:$0xff]  }
 0x419   :  { %v2427_v1 = vpop.f32.mrf.mxu0  ;;  %v2266_v37 = vpop.f32.mrf.mxu1 }
 0x41a   :  { %v5082_v55 = vsel %vm2666_vm0, %v2426_v54, -1e+30 }
 0x41b   :  { %v2428_v3 = vpop.f32.mrf.mxu0  ;;  %2739 = vmax.xlane.f32.xlu0 %v5082_v55  ;;  %v5085_v8 = vpop.f32.mrf.mxu1 }
 0x41c   :  { %v2429_v56 = vadd.f32 %v2428_v3, %v2140_v25  ;;  %v4426_v25 = vld [vmem:[#allocation2 + $0x3ac] ss:$16 sps:$4 sm:$0xff]  }
 0x41d   :  { %v2430_v42 = vpop.f32.mrf.mxu0  ;;  %v2269_v52 = vpop.f32.mrf.mxu1 }
 0x41e   :  { %v5091_v16 = vsel %vm2666_vm0, %v2429_v56, -1e+30 }
 0x41f   :  { %v2433_v23 = vpop.f32.mrf.mxu0  ;;  %2624 = vmatmul.mubr.bf16.gmra.mxu0 %v4423_v15  ;;  %2741 = vmax.xlane.f32.xlu1 %v5091_v16  ;;  %v5094_v29 = vpop.f32.mrf.mxu1  ;;  %v2161_v15 = vadd.f32 %v5031_v49, %v4981_v19  ;;  %v2164_v19 = vadd.f32 %v5031_v49, %v4985_v0 }
 0x420   :  { %v2434_v18 = vadd.f32 %v2433_v23, %v2145_v5  ;;  %2631 = vmatprep.mubr.bf16.mxu0 %v4424_v21 }
 0x421   :  { %v2435_v57 = vpop.f32.mrf.mxu0  ;;  %v2274_v27 = vpop.f32.mrf.mxu1 }
 0x422   :  { %v5100_v4 = vsel %vm2666_vm0, %v2434_v18, -1e+30  ;;  %v4427_v27 = vld [vmem:[#allocation2 + $0x3a8] ss:$16 sps:$4 sm:$0xff]  }
 0x423   :  { %v2436_v11 = vpop.f32.mrf.mxu0  ;;  %2743 = vmax.xlane.f32.xlu0 %v5100_v4  ;;  %v5103_v60 = vpop.f32.mrf.mxu1 }
 0x424   :  { %v2437_v46 = vadd.f32 %v2436_v11, %v2148_v45 }
 0x425   :  { %v2438_v44 = vpop.f32.mrf.mxu0  ;;  %v2277_v20 = vpop.f32.mrf.mxu1 }
 0x426   :  { %v5109_v54 = vsel %vm2666_vm0, %v2437_v46, -1e+30  ;;  %v4428_v46 = vld [vmem:[#allocation2 + $0x3cc] ss:$16 sps:$4 sm:$0xff]  }
 0x427   :  { %v2441_v63 = vpop.f32.mrf.mxu0  ;;  %2632 = vmatmul.mubr.bf16.gmra.mxu0 %v4425_v39  ;;  %2745 = vmax.xlane.f32.xlu1 %v5109_v54  ;;  %v5112_v1 = vpop.f32.mrf.mxu1 }
 0x428   :  { %v2442_v37 = vadd.f32 %v2441_v63, %v2153_v33  ;;  %2639 = vmatprep.mubr.bf16.mxu0 %v4426_v25  ;;  %v2169_v25 = vadd.f32 %v5031_v49, %v4987_v2  ;;  %v2172_v2 = vadd.f32 %v5031_v49, %v4991_v10 }
 0x429   :  { %v2443_v3 = vpop.f32.mrf.mxu0  ;;  %v2282_v56 = vpop.f32.mrf.mxu1 }
 0x42a   :  { %v5118_v5 = vsel %vm2666_vm0, %v2442_v37, -1e+30 }
 0x42b   :  { %v2444_v42 = vpop.f32.mrf.mxu0  ;;  %2747 = vmax.xlane.f32.xlu0 %v5118_v5  ;;  %v5121_v52 = vpop.f32.mrf.mxu1 }
 0x42c   :  { %v2445_v23 = vadd.f32 %v2444_v42, %v2156_v40  ;;  %v4429_v42 = vld [vmem:[#allocation2 + $0x3c8] ss:$16 sps:$4 sm:$0xff]  }
 0x42d   :  { %v2446_v18 = vpop.f32.mrf.mxu0  ;;  %v2285_v21 = vpop.f32.mrf.mxu1 }
 0x42e   :  { %v5127_v57 = vsel %vm2666_vm0, %v2445_v23, -1e+30  ;;  %v4430_v18 = vld [vmem:[#allocation2 + $0x3ec] ss:$16 sps:$4 sm:$0xff]  }
 0x42f   :  { %v2449_v59 = vpop.f32.mrf.mxu0  ;;  %2640 = vmatmul.mubr.bf16.gmra.mxu0 %v4427_v27  ;;  %2749 = vmax.xlane.f32.xlu1 %v5127_v57  ;;  %v5130_v45 = vpop.f32.mrf.mxu1 }
 0x430   :  { %v2450_v11 = vadd.f32 %v2449_v59, %v2161_v15  ;;  %2647 = vmatprep.mubr.bf16.mxu0 %v4428_v46 }
 0x431   :  { %v2451_v33 = vpop.f32.mrf.mxu0  ;;  %v2290_v44 = vpop.f32.mrf.mxu1 }
 0x432   :  { %v5136_v20 = vsel %vm2666_vm0, %v2450_v11, -1e+30  ;;  %v2177_v44 = vadd.f32 %v5031_v49, %v4993_v12 }
 0x433   :  { %v2452_v63 = vpop.f32.mrf.mxu0  ;;  %2751 = vmax.xlane.f32.xlu0 %v5136_v20  ;;  %v5139_v39 = vpop.f32.mrf.mxu1 }
 0x434   :  { %v2453_v37 = vadd.f32 %v2452_v63, %v2164_v19 }
 0x435   :  { %v2454_v3 = vpop.f32.mrf.mxu0  ;;  %v2293_v56 = vpop.f32.mrf.mxu1 }
 0x436   :  { %v5145_v40 = vsel %vm2666_vm0, %v2453_v37, -1e+30 }
 0x437   :  { %v2457_v0 = vpop.f32.mrf.mxu0  ;;  %2648 = vmatmul.mubr.bf16.gmra.mxu0 %v4429_v42  ;;  %2753 = vmax.xlane.f32.xlu1 %v5145_v40  ;;  %v5148_v23 = vpop.f32.mrf.mxu1 }
 0x438   :  { %v2458_v15 = vadd.f32 %v2457_v0, %v2169_v25  ;;  %2655 = vmatprep.mubr.bf16.mxu0 %v4430_v18  ;;  %v4431_v25 = vld [vmem:[#allocation2 + $0x3e8] ss:$16 sps:$4 sm:$0xff]  }
 0x439   :  { %v2459_v21 = vpop.f32.mrf.mxu0  ;;  %v2298_v59 = vpop.f32.mrf.mxu1 }
 0x43a   :  { %v5154_v27 = vsel %vm2666_vm0, %v2458_v15, -1e+30  ;;  %v2180_v15 = vadd.f32 %v5031_v49, %v4996_v24 }
 0x43b   :  { %v2460_v11 = vpop.f32.mrf.mxu0  ;;  %2755 = vmax.xlane.f32.xlu0 %v5154_v27  ;;  %v5157_v46 = vpop.f32.mrf.mxu1 }
 0x43c   :  { %v2461_v33 = vadd.f32 %v2460_v11, %v2172_v2  ;;  %v2185_v2 = vadd.f32 %v5031_v49, %v4998_v36 }
 0x43d   :  { %v2462_v19 = vpop.f32.mrf.mxu0  ;;  %v2301_v63 = vpop.f32.mrf.mxu1 }
 0x43e   :  { %v5163_v37 = vsel %vm2666_vm0, %v2461_v33, -1e+30 }
 0x43f   :  { %v2465_v10 = vpop.f32.mrf.mxu0  ;;  %2656 = vmatmul.mubr.bf16.gmra.mxu0 %v4431_v25  ;;  %2757 = vmax.xlane.f32.xlu1 %v5163_v37  ;;  %v5166_v3 = vpop.f32.mrf.mxu1 }
 0x440   :  { %v2466_v56 = vadd.f32 %v2465_v10, %v2177_v44 }
 0x441   :  { %v2467_v0 = vpop.f32.mrf.mxu0  ;;  %v2306_v42 = vpop.f32.mrf.mxu1 }
 0x442   :  { %v5172_v12 = vsel %vm2666_vm0, %v2466_v56, -1e+30  ;;  %v2188_v56 = vadd.f32 %v5031_v49, %v5000_v14 }
 0x443   :  { %v2468_v18 = vpop.f32.mrf.mxu0  ;;  %2759 = vmax.xlane.f32.xlu0 %v5172_v12  ;;  %v5175_v21 = vpop.f32.mrf.mxu1 }
 0x444   :  { %v2469_v59 = vadd.f32 %v2468_v18, %v2180_v15  ;;  %v2193_v18 = vadd.f32 %v5031_v49, %v5002_v28 }
 0x445   :  { %v2470_v11 = vpop.f32.mrf.mxu0  ;;  %v2309_v33 = vpop.f32.mrf.mxu1 }
 0x446   :  { %v5181_v44 = vsel %vm2666_vm0, %v2469_v59, -1e+30 }
 0x447   :  { %v2473_v24 = vpop.f32.mrf.mxu0  ;;  %2761 = vmax.xlane.f32.xlu1 %v5181_v44  ;;  %v5184_v19 = vpop.f32.mrf.mxu1 }
 0x448   :  { %v2474_v63 = vadd.f32 %v2473_v24, %v2185_v2 }
 0x449   :  { %v2475_v10 = vpop.f32.mrf.mxu0  ;;  %v2314_v25 = vpop.f32.mrf.mxu1 }
 0x44a   :  { %v5190_v36 = vsel %vm2666_vm0, %v2474_v63, -1e+30  ;;  %v2196_v25 = vadd.f32 %v5031_v49, %v5004_v51 }
 0x44b   :  { %v2476_v0 = vpop.f32.mrf.mxu0  ;;  %2763 = vmax.xlane.f32.xlu0 %v5190_v36  ;;  %v5193_v42 = vpop.f32.mrf.mxu1 }
 0x44c   :  { %v2477_v15 = vadd.f32 %v2476_v0, %v2188_v56 }
 0x44d   :  { %v2478_v59 = vpop.f32.mrf.mxu0  ;;  %v2317_v2 = vpop.f32.mrf.mxu1 }
 0x44e   :  { %v5199_v11 = vsel %vm2666_vm0, %v2477_v15, -1e+30  ;;  %v2201_v59 = vadd.f32 %v5031_v49, %v5006_v13 }
 0x44f   :  { %v2481_v14 = vpop.f32.mrf.mxu0  ;;  %2765 = vmax.xlane.f32.xlu1 %v5199_v11  ;;  %v5202_v33 = vpop.f32.mrf.mxu1 }
 0x450   :  { %v2482_v24 = vadd.f32 %v2481_v14, %v2193_v18 }
 0x451   :  { %v2483_v63 = vpop.f32.mrf.mxu0  ;;  %v2322_v10 = vpop.f32.mrf.mxu1 }
 0x452   :  { %v5208_v28 = vsel %vm2666_vm0, %v2482_v24, -1e+30 }
 0x453   :  { %6038 = vst [vmem:[#allocation12_spill] sm:$0xff] %v5208_v28  ;;  %v2484_v56 = vpop.f32.mrf.mxu0  ;;  %2767 = vmax.xlane.f32.xlu0 %v5208_v28  ;;  %v5211_v0 = vpop.f32.mrf.mxu1 }
 0x454   :  { %v2485_v15 = vadd.f32 %v2484_v56, %v2196_v25  ;;  %v2204_v25 = vadd.f32 %v5031_v49, %v5008_v53 }
 0x455   :  { %v2486_v2 = vpop.f32.mrf.mxu0  ;;  %v2325_v18 = vpop.f32.mrf.mxu1 }
 0x456   :  { %v5217_v14 = vsel %vm2666_vm0, %v2485_v15, -1e+30  ;;  %v2209_v18 = vadd.f32 %v5031_v49, %v5010_v34 }
 0x457   :  { %6039 = vst [vmem:[#allocation13_spill] sm:$0xff] %v5217_v14  ;;  %v2489_v51 = vpop.f32.mrf.mxu0  ;;  %2769 = vmax.xlane.f32.xlu1 %v5217_v14  ;;  %v5220_v24 = vpop.f32.mrf.mxu1 }
 0x458   :  { %v2490_v63 = vadd.f32 %v2489_v51, %v2201_v59 }
 0x459   :  { %v2491_v10 = vpop.f32.mrf.mxu0  ;;  %v2330_v28 = vpop.f32.mrf.mxu1 }
 0x45a   :  { %v5226_v13 = vsel %vm2666_vm0, %v2490_v63, -1e+30 }
 0x45b   :  { %6040 = vst [vmem:[#allocation14_spill] sm:$0xff] %v5226_v13  ;;  %v2492_v56 = vpop.f32.mrf.mxu0  ;;  %2771 = vmax.xlane.f32.xlu0 %v5226_v13  ;;  %v5229_v15 = vpop.f32.mrf.mxu1 }
 0x45c   :  { %v2493_v2 = vadd.f32 %v2492_v56, %v2204_v25  ;;  %v2212_v25 = vadd.f32 %v5031_v49, %v5012_v31 }
 0x45d   :  { %v2494_v14 = vpop.f32.mrf.mxu0  ;;  %v2333_v59 = vpop.f32.mrf.mxu1 }
 0x45e   :  { %v5235_v28 = vsel %vm2666_vm0, %v2493_v2, -1e+30  ;;  %v2217_v59 = vadd.f32 %v5031_v49, %v5014_v9 }
 0x45f   :  { %6041 = vst [vmem:[#allocation15_spill] sm:$0xff] %v5235_v28  ;;  %v2497_v53 = vpop.f32.mrf.mxu0  ;;  %2773 = vmax.xlane.f32.xlu1 %v5235_v28  ;;  %v5238_v51 = vpop.f32.mrf.mxu1 }
 0x460   :  { %v2498_v63 = vadd.f32 %v2497_v53, %v2209_v18 }
 0x461   :  { %v2499_v10 = vpop.f32.mrf.mxu0  ;;  %v2338_v13 = vpop.f32.mrf.mxu1 }
 0x462   :  { %v5244_v34 = vsel %vm2666_vm0, %v2498_v63, -1e+30 }
 0x463   :  { %6042 = vst [vmem:[#allocation16_spill] sm:$0xff] %v5244_v34  ;;  %v2500_v14 = vpop.f32.mrf.mxu0  ;;  %2775 = vmax.xlane.f32.xlu0 %v5244_v34  ;;  %v5247_v56 = vpop.f32.mrf.mxu1 }
 0x464   :  { %v2501_v2 = vadd.f32 %v2500_v14, %v2212_v25  ;;  %v2220_v25 = vadd.f32 %v5031_v49, %v5016_v6 }
 0x465   :  { %v2502_v28 = vpop.f32.mrf.mxu0  ;;  %v2341_v18 = vpop.f32.mrf.mxu1 }
 0x466   :  { %v5253_v13 = vsel %vm2666_vm0, %v2501_v2, -1e+30  ;;  %v2225_v18 = vadd.f32 %v5031_v49, %v5018_v43 }
 0x467   :  { %6043 = vst [vmem:[#allocation17_spill] sm:$0xff] %v5253_v13  ;;  %v2505_v31 = vpop.f32.mrf.mxu0  ;;  %2777 = vmax.xlane.f32.xlu1 %v5253_v13  ;;  %v5256_v53 = vpop.f32.mrf.mxu1 }
 0x468   :  { %v2506_v63 = vadd.f32 %v2505_v31, %v2217_v59 }
 0x469   :  { %v2507_v10 = vpop.f32.mrf.mxu0  ;;  %v2346_v34 = vpop.f32.mrf.mxu1 }
 0x46a   :  { %v5262_v9 = vsel %vm2666_vm0, %v2506_v63, -1e+30 }
 0x46b   :  { %6044 = vst [vmem:[#allocation18_spill] sm:$0xff] %v5262_v9  ;;  %v2508_v28 = vpop.f32.mrf.mxu0  ;;  %2779 = vmax.xlane.f32.xlu0 %v5262_v9  ;;  %v5265_v14 = vpop.f32.mrf.mxu1 }
 0x46c   :  { %v2509_v2 = vadd.f32 %v2508_v28, %v2220_v25  ;;  %v2228_v25 = vadd.f32 %v5031_v49, %v5020_v30 }
 0x46d   :  { %v2510_v13 = vpop.f32.mrf.mxu0  ;;  %v2349_v59 = vpop.f32.mrf.mxu1 }
 0x46e   :  { %v5271_v34 = vsel %vm2666_vm0, %v2509_v2, -1e+30  ;;  %v2233_v59 = vadd.f32 %v5031_v49, %v5022_v61 }
 0x46f   :  { %6045 = vst [vmem:[#allocation19_spill] sm:$0xff] %v5271_v34  ;;  %v2513_v6 = vpop.f32.mrf.mxu0  ;;  %2781 = vmax.xlane.f32.xlu1 %v5271_v34  ;;  %v5274_v31 = vpop.f32.mrf.mxu1 }
 0x470   :  { %v2514_v63 = vadd.f32 %v2513_v6, %v2225_v18 }
 0x471   :  { %v2515_v10 = vpop.f32.mrf.mxu0  ;;  %v2354_v9 = vpop.f32.mrf.mxu1 }
 0x472   :  { %v5280_v43 = vsel %vm2666_vm0, %v2514_v63, -1e+30 }
 0x473   :  { %6046 = vst [vmem:[#allocation20_spill] sm:$0xff] %v5280_v43  ;;  %v2516_v13 = vpop.f32.mrf.mxu0  ;;  %2783 = vmax.xlane.f32.xlu0 %v5280_v43  ;;  %v5283_v28 = vpop.f32.mrf.mxu1 }
 0x474   :  { %v2517_v2 = vadd.f32 %v2516_v13, %v2228_v25  ;;  %v2236_v25 = vadd.f32 %v5031_v49, %v5024_v58 }
 0x475   :  { %v2518_v34 = vpop.f32.mrf.mxu0  ;;  %v2357_v18 = vpop.f32.mrf.mxu1 }
 0x476   :  { %v5289_v9 = vsel %vm2666_vm0, %v2517_v2, -1e+30  ;;  %v2241_v18 = vadd.f32 %v5031_v49, %v5026_v22 }
 0x477   :  { %6047 = vst [vmem:[#allocation21_spill] sm:$0xff] %v5289_v9  ;;  %v2521_v30 = vpop.f32.mrf.mxu0  ;;  %2785 = vmax.xlane.f32.xlu1 %v5289_v9  ;;  %v5292_v6 = vpop.f32.mrf.mxu1 }
 0x478   :  { %v2522_v63 = vadd.f32 %v2521_v30, %v2233_v59 }
 0x479   :  { %v2523_v10 = vpop.f32.mrf.mxu0  ;;  %v2362_v43 = vpop.f32.mrf.mxu1 }
 0x47a   :  { %v5298_v61 = vsel %vm2666_vm0, %v2522_v63, -1e+30 }
 0x47b   :  { %6048 = vst [vmem:[#allocation22_spill] sm:$0xff] %v5298_v61  ;;  %v2524_v34 = vpop.f32.mrf.mxu0  ;;  %2787 = vmax.xlane.f32.xlu0 %v5298_v61  ;;  %v5301_v13 = vpop.f32.mrf.mxu1 }
 0x47c   :  { %v2525_v2 = vadd.f32 %v2524_v34, %v2236_v25  ;;  %v2244_v25 = vadd.f32 %v5031_v49, %v5035_v35 }
 0x47d   :  { %v2526_v9 = vpop.f32.mrf.mxu0  ;;  %v2365_v59 = vpop.f32.mrf.mxu1 }
 0x47e   :  { %v5307_v43 = vsel %vm2666_vm0, %v2525_v2, -1e+30  ;;  %v2249_v59 = vadd.f32 %v5031_v49, %v5040_v62 }
 0x47f   :  { %6049 = vst [vmem:[#allocation23_spill] sm:$0xff] %v5307_v43  ;;  %v2529_v58 = vpop.f32.mrf.mxu0  ;;  %2789 = vmax.xlane.f32.xlu1 %v5307_v43  ;;  %v5310_v30 = vpop.f32.mrf.mxu1 }
 0x480   :  { %v2530_v63 = vadd.f32 %v2529_v58, %v2241_v18 }
 0x481   :  { %v2531_v10 = vpop.f32.mrf.mxu0  ;;  %v2370_v61 = vpop.f32.mrf.mxu1 }
 0x482   :  { %v5316_v22 = vsel %vm2666_vm0, %v2530_v63, -1e+30  ;;  %v2252_v10 = vadd.f32 %v5031_v49, %v5049_v7 }
 0x483   :  { %v2532_v9 = vpop.f32.mrf.mxu0  ;;  %2791 = vmax.xlane.f32.xlu0 %v5316_v22  ;;  %v5319_v34 = vpop.f32.mrf.mxu1 }
 0x484   :  { %v2533_v2 = vadd.f32 %v2532_v9, %v2244_v25 }
 0x485   :  { %v2534_v43 = vpop.f32.mrf.mxu0  ;;  %v2373_v18 = vpop.f32.mrf.mxu1 }
 0x486   :  { %v5325_v61 = vsel %vm2666_vm0, %v2533_v2, -1e+30  ;;  %v2257_v43 = vadd.f32 %v5031_v49, %v5058_v48 }
 0x487   :  { %v2537_v35 = vpop.f32.mrf.mxu0  ;;  %2793 = vmax.xlane.f32.xlu1 %v5325_v61 }
 0x488   :  { %v2538_v58 = vadd.f32 %v2537_v35, %v2249_v59 }
 0x489   :  { %v2539_v63 = vpop.f32.mrf.mxu0 }
 0x48a   :  { %v5332_v25 = vsel %vm2666_vm0, %v2538_v58, -1e+30  ;;  %v2260_v58 = vadd.f32 %v5031_v49, %v5067_v47 }
 0x48b   :  { %v2540_v9 = vpop.f32.mrf.mxu0  ;;  %2795 = vmax.xlane.f32.xlu0 %v5332_v25 }
 0x48c   :  { %v2541_v62 = vadd.f32 %v2540_v9, %v2252_v10 }
 0x48d   :  { %v2542_v2 = vpop.f32.mrf.mxu0 }
 0x48e   :  { %v5339_v18 = vsel %vm2666_vm0, %v2541_v62, -1e+30  ;;  %v2265_v62 = vadd.f32 %v5031_v49, %v5076_v26 }
 0x48f   :  { %v2545_v59 = vpop.f32.mrf.mxu0  ;;  %2797 = vmax.xlane.f32.xlu1 %v5339_v18 }
 0x490   :  { %v2546_v7 = vadd.f32 %v2545_v59, %v2257_v43 }
 0x491   :  { %v2547_v35 = vpop.f32.mrf.mxu0 }
 0x492   :  { %v5346_v63 = vsel %vm2666_vm0, %v2546_v7, -1e+30 }
 0x493   :  { %6050 = vst [vmem:[#allocation24_spill] sm:$0xff] %v5346_v63  ;;  %v2548_v10 = vpop.f32.mrf.mxu0  ;;  %2799 = vmax.xlane.f32.xlu0 %v5346_v63 }
 0x494   :  { %v2549_v48 = vadd.f32 %v2548_v10, %v2260_v58  ;;  %v2732_v9 = vpop.xlane.xlu0 %2731 }
 0x495   :  { %v5352_v2 = vsub.f32 %v5046_v17, %v2732_v9  ;;  %v2550_v43 = vpop.f32.mrf.mxu0  ;;  %v2268_v17 = vadd.f32 %v5031_v49, %v5085_v8 }
 0x496   :  { %v5356_v59 = vsel %vm2666_vm0, %v2549_v48, -1e+30 }
 0x497   :  { %v2923_v47 = vmul.f32 1.442695, %v5352_v2  ;;  %v2553_v7 = vpop.f32.mrf.mxu0  ;;  %2801 = vmax.xlane.f32.xlu1 %v5356_v59 }
 0x498   :  { %v2554_v35 = vadd.f32 %v2553_v7, %v2265_v62  ;;  %v2734_v63 = vpop.xlane.xlu0 %2733 }
 0x499   :  { %4065 = vpow2.f32 %v2923_v47  ;;  %v5361_v58 = vsub.f32 %v5055_v41, %v2734_v63  ;;  %v2555_v26 = vpop.f32.mrf.mxu0  ;;  %v2273_v47 = vadd.f32 %v5031_v49, %v5094_v29 }
 0x49a   :  { %v5367_v10 = vsel %vm2666_vm0, %v2554_v35, -1e+30 }
 0x49b   :  { %v2925_v48 = vmul.f32 1.442695, %v5361_v58  ;;  %v2556_v9 = vpop.f32.mrf.mxu0  ;;  %2803 = vmax.xlane.f32.xlu0 %v5367_v10 }
 0x49c   :  { %v2557_v43 = vadd.f32 %v2556_v9, %v2268_v17  ;;  %v2736_v62 = vpop.xlane.xlu1 %2735 }
 0x49d   :  { %4067 = vpow2.f32 %v2925_v48  ;;  %v5374_v41 = vsub.f32 %v5064_v50, %v2736_v62  ;;  %v2558_v63 = vpop.f32.mrf.mxu0  ;;  %v2276_v50 = vadd.f32 %v5031_v49, %v5103_v60 }
 0x49e   :  { %v5378_v8 = vsel %vm2666_vm0, %v2557_v43, -1e+30 }
 0x49f   :  { %v2927_v7 = vmul.f32 1.442695, %v5374_v41  ;;  %v2561_v35 = vpop.f32.mrf.mxu0  ;;  %2805 = vmax.xlane.f32.xlu1 %v5378_v8 }
 0x4a0   :  { %v2562_v26 = vadd.f32 %v2561_v35, %v2273_v47  ;;  %v2738_v17 = vpop.xlane.xlu1 %2737 }
 0x4a1   :  { %4069 = vpow2.f32 %v2927_v7  ;;  %v5383_v9 = vsub.f32 %v5073_v38, %v2738_v17  ;;  %v2563_v29 = vpop.f32.mrf.mxu0  ;;  %v2281_v7 = vadd.f32 %v5031_v49, %v5112_v1 }
 0x4a2   :  { %v5389_v48 = vsel %vm2666_vm0, %v2562_v26, -1e+30 }
 0x4a3   :  { %v2929_v43 = vmul.f32 1.442695, %v5383_v9  ;;  %v2564_v62 = vpop.f32.mrf.mxu0  ;;  %2807 = vmax.xlane.f32.xlu0 %v5389_v48 }
 0x4a4   :  { %v2565_v63 = vadd.f32 %v2564_v62, %v2276_v50  ;;  %v2740_v47 = vpop.xlane.xlu0 %2739 }
 0x4a5   :  { %4071 = vpow2.f32 %v2929_v43  ;;  %v5396_v38 = vsub.f32 %v5082_v55, %v2740_v47  ;;  %v2566_v35 = vpop.f32.mrf.mxu0  ;;  %v2284_v47 = vadd.f32 %v5031_v49, %v5121_v52 }
 0x4a6   :  { %v4066_v60 = vpop.eup %4065  ;;  %v5400_v26 = vsel %vm2666_vm0, %v2565_v63, -1e+30 }
 0x4a7   :  { %6051 = vst [vmem:[#allocation25_spill] sm:$0xff] %v5396_v38  ;;  %v2931_v17 = vmul.f32 1.442695, %v5396_v38  ;;  %v2569_v29 = vpop.f32.mrf.mxu0  ;;  %2809 = vmax.xlane.f32.xlu1 %v5400_v26  ;;  %3051 = vadd.xlane.f32.xlu0 %v4066_v60 }
 0x4a8   :  { %v2570_v50 = vadd.f32 %v2569_v29, %v2281_v7  ;;  %v2742_v62 = vpop.xlane.xlu1 %2741 }
 0x4a9   :  { %4073 = vpow2.f32 %v2931_v17  ;;  %v5405_v1 = vsub.f32 %v5091_v16, %v2742_v62  ;;  %v2571_v55 = vpop.f32.mrf.mxu0  ;;  %v2289_v16 = vadd.f32 %v5031_v49, %v5130_v45 }
 0x4aa   :  { %v4068_v43 = vpop.eup %4067  ;;  %v5411_v63 = vsel %vm2666_vm0, %v2570_v50, -1e+30 }
 0x4ab   :  { %v2933_v35 = vmul.f32 1.442695, %v5405_v1  ;;  %v2572_v38 = vpop.f32.mrf.mxu0  ;;  %2811 = vmax.xlane.f32.xlu0 %v5411_v63  ;;  %3053 = vadd.xlane.f32.xlu1 %v4068_v43 }
 0x4ac   :  { %v2573_v7 = vadd.f32 %v2572_v38, %v2284_v47  ;;  %v2744_v60 = vpop.xlane.xlu0 %2743 }
 0x4ad   :  { %4075 = vpow2.f32 %v2933_v35  ;;  %v5418_v17 = vsub.f32 %v5100_v4, %v2744_v60  ;;  %v2574_v52 = vpop.f32.mrf.mxu0  ;;  %v2292_v35 = vadd.f32 %v5031_v49, %v5139_v39 }
 0x4ae   :  { %v4070_v29 = vpop.eup %4069  ;;  %v5422_v50 = vsel %vm2666_vm0, %v2573_v7, -1e+30 }
 0x4af   :  { %v2935_v62 = vmul.f32 1.442695, %v5418_v17  ;;  %v2577_v55 = vpop.f32.mrf.mxu0  ;;  %3055 = vadd.xlane.f32.xlu0 %v4070_v29  ;;  %2813 = vmax.xlane.f32.xlu1 %v5422_v50 }
 0x4b0   :  { %v2578_v38 = vadd.f32 %v2577_v55, %v2289_v16  ;;  %v2746_v43 = vpop.xlane.xlu1 %2745 }
 0x4b1   :  { %4077 = vpow2.f32 %v2935_v62  ;;  %v5427_v45 = vsub.f32 %v5109_v54, %v2746_v43  ;;  %v2579_v4 = vpop.f32.mrf.mxu0  ;;  %v2297_v54 = vadd.f32 %v5031_v49, %v5148_v23 }
 0x4b2   :  { %v4072_v47 = vpop.eup %4071  ;;  %v5433_v7 = vsel %vm2666_vm0, %v2578_v38, -1e+30 }
 0x4b3   :  { %v2937_v60 = vmul.f32 1.442695, %v5427_v45  ;;  %v2580_v52 = vpop.f32.mrf.mxu0  ;;  %2815 = vmax.xlane.f32.xlu0 %v5433_v7  ;;  %3057 = vadd.xlane.f32.xlu1 %v4072_v47 }
 0x4b4   :  { %v2581_v16 = vadd.f32 %v2580_v52, %v2292_v35  ;;  %v2748_v29 = vpop.xlane.xlu0 %2747  ;;  %v2300_v52 = vadd.f32 %v5031_v49, %v5157_v46 }
 0x4b5   :  { %4079 = vpow2.f32 %v2937_v60  ;;  %v5440_v62 = vsub.f32 %v5118_v5, %v2748_v29  ;;  %v2582_v39 = vpop.f32.mrf.mxu0 }
 0x4b6   :  { %v4074_v55 = vpop.eup %4073  ;;  %v5444_v38 = vsel %vm2666_vm0, %v2581_v16, -1e+30 }
 0x4b7   :  { %v2939_v43 = vmul.f32 1.442695, %v5440_v62  ;;  %v2585_v4 = vpop.f32.mrf.mxu0  ;;  %2817 = vmax.xlane.f32.xlu1 %v5444_v38  ;;  %3059 = vadd.xlane.f32.xlu0 %v4074_v55 }
 0x4b8   :  { %v2586_v47 = vadd.f32 %v2585_v4, %v2297_v54  ;;  %v2750_v35 = vpop.xlane.xlu1 %2749 }
 0x4b9   :  { %4081 = vpow2.f32 %v2939_v43  ;;  %v5449_v23 = vsub.f32 %v5127_v57, %v2750_v35  ;;  %v2587_v5 = vpop.f32.mrf.mxu0  ;;  %v2305_v57 = vadd.f32 %v5031_v49, %v5166_v3 }
 0x4ba   :  { %v4076_v60 = vpop.eup %4075  ;;  %v5455_v16 = vsel %vm2666_vm0, %v2586_v47, -1e+30 }
 0x4bb   :  { %v2941_v29 = vmul.f32 1.442695, %v5449_v23  ;;  %v2588_v39 = vpop.f32.mrf.mxu0  ;;  %3061 = vadd.xlane.f32.xlu1 %v4076_v60  ;;  %2819 = vmax.xlane.f32.xlu0 %v5455_v16 }
 0x4bc   :  { %v2589_v54 = vadd.f32 %v2588_v39, %v2300_v52  ;;  %v2752_v55 = vpop.xlane.xlu0 %2751  ;;  %v2308_v39 = vadd.f32 %v5031_v49, %v5175_v21 }
 0x4bd   :  { %4083 = vpow2.f32 %v2941_v29  ;;  %v5462_v43 = vsub.f32 %v5136_v20, %v2752_v55  ;;  %v2590_v46 = vpop.f32.mrf.mxu0 }
 0x4be   :  { %v4078_v4 = vpop.eup %4077  ;;  %v5466_v47 = vsel %vm2666_vm0, %v2589_v54, -1e+30 }
 0x4bf   :  { %v2943_v35 = vmul.f32 1.442695, %v5462_v43  ;;  %v2593_v5 = vpop.f32.mrf.mxu0  ;;  %2821 = vmax.xlane.f32.xlu1 %v5466_v47  ;;  %3063 = vadd.xlane.f32.xlu0 %v4078_v4 }
 0x4c0   :  { %v2594_v60 = vadd.f32 %v2593_v5, %v2305_v57  ;;  %v2754_v52 = vpop.xlane.xlu1 %2753 }
 0x4c1   :  { %4085 = vpow2.f32 %v2943_v35  ;;  %v5471_v3 = vsub.f32 %v5145_v40, %v2754_v52  ;;  %v2595_v20 = vpop.f32.mrf.mxu0  ;;  %v2313_v40 = vadd.f32 %v5031_v49, %v5184_v19 }
 0x4c2   :  { %v4080_v29 = vpop.eup %4079  ;;  %v5477_v54 = vsel %vm2666_vm0, %v2594_v60, -1e+30 }
 0x4c3   :  { %v2945_v55 = vmul.f32 1.442695, %v5471_v3  ;;  %v2596_v46 = vpop.f32.mrf.mxu0  ;;  %3065 = vadd.xlane.f32.xlu1 %v4080_v29  ;;  %2823 = vmax.xlane.f32.xlu0 %v5477_v54 }
 0x4c4   :  { %v2597_v57 = vadd.f32 %v2596_v46, %v2308_v39  ;;  %v2756_v4 = vpop.xlane.xlu0 %2755  ;;  %v2316_v46 = vadd.f32 %v5031_v49, %v5193_v42 }
 0x4c5   :  { %4087 = vpow2.f32 %v2945_v55  ;;  %v5484_v35 = vsub.f32 %v5154_v27, %v2756_v4  ;;  %v2598_v21 = vpop.f32.mrf.mxu0 }
 0x4c6   :  { %v4082_v5 = vpop.eup %4081  ;;  %v5488_v60 = vsel %vm2666_vm0, %v2597_v57, -1e+30 }
 0x4c7   :  { %v2947_v52 = vmul.f32 1.442695, %v5484_v35  ;;  %v2601_v20 = vpop.f32.mrf.mxu0  ;;  %2825 = vmax.xlane.f32.xlu1 %v5488_v60  ;;  %3067 = vadd.xlane.f32.xlu0 %v4082_v5 }
 0x4c8   :  { %v2602_v29 = vadd.f32 %v2601_v20, %v2313_v40  ;;  %v2758_v39 = vpop.xlane.xlu1 %2757 }
 0x4c9   :  { %4089 = vpow2.f32 %v2947_v52  ;;  %v5493_v19 = vsub.f32 %v5163_v37, %v2758_v39  ;;  %v2603_v27 = vpop.f32.mrf.mxu0  ;;  %v2321_v37 = vadd.f32 %v5031_v49, %v5202_v33 }
 0x4ca   :  { %v4084_v55 = vpop.eup %4083  ;;  %v5499_v57 = vsel %vm2666_vm0, %v2602_v29, -1e+30 }
 0x4cb   :  { %v2949_v4 = vmul.f32 1.442695, %v5493_v19  ;;  %v2604_v21 = vpop.f32.mrf.mxu0  ;;  %3069 = vadd.xlane.f32.xlu1 %v4084_v55  ;;  %2827 = vmax.xlane.f32.xlu0 %v5499_v57 }
 0x4cc   :  { %v2605_v40 = vadd.f32 %v2604_v21, %v2316_v46  ;;  %v2760_v5 = vpop.xlane.xlu0 %2759  ;;  %v2324_v21 = vadd.f32 %v5031_v49, %v5211_v0 }
 0x4cd   :  { %4091 = vpow2.f32 %v2949_v4  ;;  %v5506_v52 = vsub.f32 %v5172_v12, %v2760_v5  ;;  %v2606_v42 = vpop.f32.mrf.mxu0 }
 0x4ce   :  { %v4086_v20 = vpop.eup %4085  ;;  %v5510_v29 = vsel %vm2666_vm0, %v2605_v40, -1e+30 }
 0x4cf   :  { %v2951_v39 = vmul.f32 1.442695, %v5506_v52  ;;  %v2609_v27 = vpop.f32.mrf.mxu0  ;;  %2829 = vmax.xlane.f32.xlu1 %v5510_v29  ;;  %3071 = vadd.xlane.f32.xlu0 %v4086_v20 }
 0x4d0   :  { %v2610_v55 = vadd.f32 %v2609_v27, %v2321_v37  ;;  %v2762_v46 = vpop.xlane.xlu1 %2761 }
 0x4d1   :  { %4093 = vpow2.f32 %v2951_v39  ;;  %v5515_v33 = vsub.f32 %v5181_v44, %v2762_v46  ;;  %v2611_v12 = vpop.f32.mrf.mxu0  ;;  %v2329_v44 = vadd.f32 %v5031_v49, %v5220_v24 }
 0x4d2   :  { %v4088_v4 = vpop.eup %4087  ;;  %v5521_v40 = vsel %vm2666_vm0, %v2610_v55, -1e+30 }
 0x4d3   :  { %6052 = vst [vmem:[#allocation26_spill] sm:$0xff] %v5515_v33  ;;  %v2953_v5 = vmul.f32 1.442695, %v5515_v33  ;;  %v2612_v42 = vpop.f32.mrf.mxu0  ;;  %3073 = vadd.xlane.f32.xlu1 %v4088_v4  ;;  %2831 = vmax.xlane.f32.xlu0 %v5521_v40 }
 0x4d4   :  { %v2613_v37 = vadd.f32 %v2612_v42, %v2324_v21  ;;  %v2764_v20 = vpop.xlane.xlu0 %2763  ;;  %v2332_v42 = vadd.f32 %v5031_v49, %v5229_v15 }
 0x4d5   :  { %4095 = vpow2.f32 %v2953_v5  ;;  %v5528_v39 = vsub.f32 %v5190_v36, %v2764_v20  ;;  %v2614_v0 = vpop.f32.mrf.mxu0 }
 0x4d6   :  { %v4090_v27 = vpop.eup %4089  ;;  %v5532_v55 = vsel %vm2666_vm0, %v2613_v37, -1e+30 }
 0x4d7   :  { %6053 = vst [vmem:[#allocation27_spill] sm:$0xff] %v5528_v39  ;;  %v2955_v46 = vmul.f32 1.442695, %v5528_v39  ;;  %v2617_v12 = vpop.f32.mrf.mxu0  ;;  %2833 = vmax.xlane.f32.xlu1 %v5532_v55  ;;  %3075 = vadd.xlane.f32.xlu0 %v4090_v27 }
 0x4d8   :  { %v2618_v4 = vadd.f32 %v2617_v12, %v2329_v44  ;;  %v2766_v21 = vpop.xlane.xlu1 %2765 }
 0x4d9   :  { %4097 = vpow2.f32 %v2955_v46  ;;  %v5537_v24 = vsub.f32 %v5199_v11, %v2766_v21  ;;  %v2619_v36 = vpop.f32.mrf.mxu0  ;;  %v2337_v11 = vadd.f32 %v5031_v49, %v5238_v51  ;;  %v6055_v46 = vld [vmem:[#allocation12_spill] sm:$0xff]  ;;  %v6057_v49 = vld [vmem:[#allocation13_spill] sm:$0xff] }
 0x4da   :  { %v4092_v5 = vpop.eup %4091  ;;  %v5543_v37 = vsel %vm2666_vm0, %v2618_v4, -1e+30 }
 0x4db   :  { %6054 = vst [vmem:[#allocation28_spill] sm:$0xff] %v5537_v24  ;;  %v2957_v20 = vmul.f32 1.442695, %v5537_v24  ;;  %v2620_v0 = vpop.f32.mrf.mxu0  ;;  %3077 = vadd.xlane.f32.xlu1 %v4092_v5  ;;  %2835 = vmax.xlane.f32.xlu0 %v5543_v37 }
 0x4dc   :  { %v2621_v44 = vadd.f32 %v2620_v0, %v2332_v42  ;;  %v2768_v27 = vpop.xlane.xlu0 %2767 }
 0x4dd   :  { %4099 = vpow2.f32 %v2957_v20  ;;  %v5550_v12 = vsub.f32 %v6055_v46, %v2768_v27  ;;  %v2622_v15 = vpop.f32.mrf.mxu0  ;;  %v5564_v46 = vld [vmem:[%s6009_s3] ss:$0 sm:$0xff]  ;;  %s4527_s3 = smov [#allocation8]  }
 0x4de   :  { %v4094_v21 = vpop.eup %4093  ;;  %v5554_v4 = vsel %vm2666_vm0, %v2621_v44, -1e+30  ;;  %v2340_v44 = vadd.f32 %v5564_v46, %v5247_v56  ;;  %s3504_s9 = sshll.u32 %s4527_s3, 4  ;;  %s3505_s9 = int_to_ptr.vmem [resolvable:$true] %s3504_s9 }
 0x4df   :  { %6056 = vst [vmem:[#allocation12_spill] sm:$0xff] %v5550_v12  ;;  %v2959_v36 = vmul.f32 1.442695, %v5550_v12  ;;  %v2625_v5 = vpop.f32.mrf.mxu0  ;;  %2837 = vmax.xlane.f32.xlu1 %v5554_v4  ;;  %3079 = vadd.xlane.f32.xlu0 %v4094_v21  ;;  %s4493_s10 = scalar_lea.vmem %s3505_s9, 8192  ;;  %p4498_p2 = scmp.lt.s32.totalorder %s3505_s9, %s3505_s9 }
 0x4e0   :  { %v2626_v42 = vadd.f32 %v2625_v5, %v2337_v11  ;;  %v2770_v0 = vpop.xlane.xlu1 %2769  ;;  %v2345_v5 = vadd.f32 %v5564_v46, %v5256_v53  ;;  %p4494_p1 = scmp.ne.s32.totalorder %s3505_s9, %s4493_s10  ;;  %p4499_p3 = scmp.lt.s32.totalorder %s4493_s10, %s4493_s10 }
 0x4e1   :  { %4101 = vpow2.f32 %v2959_v36  ;;  %v5559_v51 = vsub.f32 %v6057_v49, %v2770_v0  ;;  %v2627_v20 = vpop.f32.mrf.mxu0 }
 0x4e2   :  { %v4096_v27 = vpop.eup %4095  ;;  %v5570_v15 = vsel %vm2666_vm0, %v2626_v42, -1e+30  ;;  %p4500_p4 = por %p4499_p3, %p4498_p2 }
 0x4e3   :  { %6058 = vst [vmem:[#allocation13_spill] sm:$0xff] %v5559_v51  ;;  %v2961_v11 = vmul.f32 1.442695, %v5559_v51  ;;  %v2628_v21 = vpop.f32.mrf.mxu0  ;;  %3081 = vadd.xlane.f32.xlu1 %v4096_v27  ;;  %2839 = vmax.xlane.f32.xlu0 %v5570_v15 }
 0x4e4   :  { %v2629_v36 = vadd.f32 %v2628_v21, %v2340_v44  ;;  %v2348_v44 = vadd.f32 %v5564_v46, %v5265_v14  ;;  %p4501_p5 = pnand %p4500_p4, %p4494_p1 }
 0x4e5   :  { %4103 = vpow2.f32 %v2961_v11  ;;  %v2630_v0 = vpop.f32.mrf.mxu0 }
 0x4e6   :  { %v4098_v49 = vpop.eup %4097  ;;  %v5578_v56 = vsel %vm2666_vm0, %v2629_v36, -1e+30  ;;  %v2353_v36 = vadd.f32 %v5564_v46, %v5274_v31  ;;  %v2356_v31 = vadd.f32 %v5564_v46, %v5283_v28  ;;  %v6064_v28 = vld [vmem:[#allocation16_spill] sm:$0xff] }
 0x4e7   :  { %v2633_v20 = vpop.f32.mrf.mxu0  ;;  %2841 = vmax.xlane.f32.xlu1 %v5578_v56  ;;  %3083 = vadd.xlane.f32.xlu0 %v4098_v49 }
 0x4e8   :  { %v2634_v42 = vadd.f32 %v2633_v20, %v2345_v5  ;;  %v2772_v5 = vpop.xlane.xlu0 %2771 }
 0x4e9   :  { %v2635_v51 = vpop.f32.mrf.mxu0 }
 0x4ea   :  { %v4100_v27 = vpop.eup %4099  ;;  %v5585_v53 = vsel %vm2666_vm0, %v2634_v42, -1e+30 }
 0x4eb   :  { %v2636_v11 = vpop.f32.mrf.mxu0  ;;  %3085 = vadd.xlane.f32.xlu1 %v4100_v27  ;;  %2843 = vmax.xlane.f32.xlu0 %v5585_v53  ;;  %v6059_v27 = vld [vmem:[#allocation14_spill] sm:$0xff] }
 0x4ec   :  { %v2637_v21 = vadd.f32 %v2636_v11, %v2348_v44  ;;  %v5596_v12 = vsub.f32 %v6059_v27, %v2772_v5  ;;  %v2774_v44 = vpop.xlane.xlu1 %2773  ;;  %v6062_v5 = vld [vmem:[#allocation15_spill] sm:$0xff] }
 0x4ed   :  { %v2638_v0 = vpop.f32.mrf.mxu0 }
 0x4ee   :  { %v4102_v49 = vpop.eup %4101  ;;  %v5592_v51 = vsel %vm2666_vm0, %v2637_v21, -1e+30  ;;  %6060 = vst [vmem:[#allocation14_spill] sm:$0xff] %v5596_v12  ;;  %v2776_v21 = vpop.xlane.xlu0 %2775 }
 0x4ef   :  { %v2641_v14 = vpop.f32.mrf.mxu0  ;;  %2845 = vmax.xlane.f32.xlu1 %v5592_v51  ;;  %3087 = vadd.xlane.f32.xlu0 %v4102_v49  ;;  %v5612_v39 = vsub.f32 %v6064_v28, %v2776_v21 }
 0x4f0   :  { %v2642_v20 = vadd.f32 %v2641_v14, %v2353_v36  ;;  %v2361_v36 = vadd.f32 %v5564_v46, %v5292_v6  ;;  %v5608_v14 = vsub.f32 %v6062_v5, %v2774_v44  ;;  %v6067_v44 = vld [vmem:[#allocation17_spill] sm:$0xff] }
 0x4f1   :  { %v2643_v42 = vpop.f32.mrf.mxu0  ;;  %6065 = vst [vmem:[#allocation16_spill] sm:$0xff] %v5612_v39  ;;  %v2967_v5 = vmul.f32 1.442695, %v5612_v39 }
 0x4f2   :  { %v4104_v11 = vpop.eup %4103  ;;  %v5602_v0 = vsel %vm2666_vm0, %v2642_v20, -1e+30  ;;  %6063 = vst [vmem:[#allocation15_spill] sm:$0xff] %v5608_v14  ;;  %v2963_v42 = vmul.f32 1.442695, %v5596_v12  ;;  %v2778_v20 = vpop.xlane.xlu1 %2777 }
 0x4f3   :  { %6061 = vst [vmem:[#allocation29_spill] sm:$0xff] %v5602_v0  ;;  %v2644_v24 = vpop.f32.mrf.mxu0  ;;  %3089 = vadd.xlane.f32.xlu1 %v4104_v11  ;;  %2847 = vmax.xlane.f32.xlu0 %v5602_v0  ;;  %v2965_v6 = vmul.f32 1.442695, %v5608_v14 }
 0x4f4   :  { %v2645_v49 = vadd.f32 %v2644_v24, %v2356_v31  ;;  %v2780_v11 = vpop.xlane.xlu0 %2779  ;;  %v5621_v31 = vsub.f32 %v6067_v44, %v2778_v20  ;;  %4105 = vpow2.f32 %v2963_v42 }
 0x4f5   :  { %v2646_v27 = vpop.f32.mrf.mxu0  ;;  %4107 = vpow2.f32 %v2965_v6 }
 0x4f6   :  { %v5616_v33 = vsel %vm2666_vm0, %v2645_v49, -1e+30  ;;  %v6068_v27 = vld [vmem:[#allocation18_spill] sm:$0xff]  ;;  %v2364_v49 = vadd.f32 %v5564_v46, %v5301_v13  ;;  %v2969_v20 = vmul.f32 1.442695, %v5621_v31  ;;  %4109 = vpow2.f32 %v2967_v5 }
 0x4f7   :  { %6066 = vst [vmem:[#allocation30_spill] sm:$0xff] %v5616_v33  ;;  %v2649_v0 = vpop.f32.mrf.mxu0  ;;  %2849 = vmax.xlane.f32.xlu1 %v5616_v33  ;;  %v5625_v28 = vsub.f32 %v6068_v27, %v2780_v11  ;;  %v6069_v11 = vld [vmem:[#allocation19_spill] sm:$0xff] }
 0x4f8   :  { %v2650_v24 = vadd.f32 %v2649_v0, %v2361_v36  ;;  %v2782_v12 = vpop.xlane.xlu1 %2781  ;;  %v2369_v36 = vadd.f32 %v5564_v46, %v5310_v30  ;;  %4111 = vpow2.f32 %v2969_v20 }
 0x4f9   :  { %v2651_v21 = vpop.f32.mrf.mxu0  ;;  %v5638_v44 = vsub.f32 %v6069_v11, %v2782_v12  ;;  %v2971_v13 = vmul.f32 1.442695, %v5625_v28  ;;  %v6071_v11 = vld [vmem:[#allocation21_spill] sm:$0xff] }
 0x4fa   :  { %v5631_v33 = vsel %vm2666_vm0, %v2650_v24, -1e+30  ;;  %v6070_v24 = vld [vmem:[#allocation20_spill] sm:$0xff] }
 0x4fb   :  { %v2652_v0 = vpop.f32.mrf.mxu0  ;;  %2851 = vmax.xlane.f32.xlu0 %v5631_v33  ;;  %v2973_v12 = vmul.f32 1.442695, %v5638_v44  ;;  %4113 = vpow2.f32 %v2971_v13 }
 0x4fc   :  { %v2653_v42 = vadd.f32 %v2652_v0, %v2364_v49  ;;  %v2784_v21 = vpop.xlane.xlu0 %2783 }
 0x4fd   :  { %v2654_v27 = vpop.f32.mrf.mxu0  ;;  %v5642_v39 = vsub.f32 %v6070_v24, %v2784_v21  ;;  %v2372_v21 = vadd.f32 %v5564_v46, %v5319_v34  ;;  %4115 = vpow2.f32 %v2973_v12 }
 0x4fe   :  { %v5646_v14 = vsel %vm2666_vm0, %v2653_v42, -1e+30 }
 0x4ff   :  { %v2657_v30 = vpop.f32.mrf.mxu0  ;;  %2853 = vmax.xlane.f32.xlu1 %v5646_v14  ;;  %v2975_v5 = vmul.f32 1.442695, %v5642_v39 }
 0x500   :  { %v2658_v6 = vadd.f32 %v2657_v30, %v2369_v36  ;;  %v2786_v49 = vpop.xlane.xlu1 %2785  ;;  %v6072_v30 = vld [vmem:[#allocation22_spill] sm:$0xff] }
 0x501   :  { %v2659_v0 = vpop.f32.mrf.mxu0  ;;  %v5652_v27 = vsub.f32 %v6071_v11, %v2786_v49  ;;  %4117 = vpow2.f32 %v2975_v5  ;;  %v4106_v11 = vpop.eup %4105 }
 0x502   :  { %v5658_v42 = vsel %vm2666_vm0, %v2658_v6, -1e+30  ;;  %v4108_v12 = vpop.eup %4107 }
 0x503   :  { %v2660_v24 = vpop.f32.mrf.mxu0  ;;  %2855 = vmax.xlane.f32.xlu0 %v5658_v42  ;;  %v2977_v20 = vmul.f32 1.442695, %v5652_v27 }
 0x504   :  { %v2661_v36 = vadd.f32 %v2660_v24, %v2372_v21  ;;  %v2788_v13 = vpop.xlane.xlu0 %2787  ;;  %v6074_v21 = vld [vmem:[#allocation23_spill] sm:$0xff]  ;;  %v4110_v24 = vpop.eup %4109 }
 0x505   :  { %v5663_v0 = vsub.f32 %v6072_v30, %v2788_v13  ;;  %v2662_v49 = vpop.f32.mrf.mxu0  ;;  %4119 = vpow2.f32 %v2977_v20 }
 0x506   :  { %v5667_v34 = vsel %vm2666_vm0, %v2661_v36, -1e+30  ;;  %v4112_v36 = vpop.eup %4111 }
 0x507   :  { %6073 = vst [vmem:[#allocation17_spill] sm:$0xff] %v5663_v0  ;;  %v2979_v46 = vmul.f32 1.442695, %v5663_v0  ;;  %2857 = vmax.xlane.f32.xlu1 %v5667_v34  ;;  %3091 = vadd.xlane.f32.xlu0 %v4106_v11 }
 0x508   :  { %v2790_v6 = vpop.xlane.xlu1 %2789  ;;  %v4114_v0 = vpop.eup %4113 }
 0x509   :  { %4121 = vpow2.f32 %v2979_v46  ;;  %v5672_v5 = vsub.f32 %v6074_v21, %v2790_v6 }
 0x50a   :  { %v4116_v46 = vpop.eup %4115 }
 0x50b   :  { %v2981_v13 = vmul.f32 1.442695, %v5672_v5  ;;  %3093 = vadd.xlane.f32.xlu1 %v4108_v12  ;;  %3095 = vadd.xlane.f32.xlu0 %v4110_v24 }
 0x50c   :  { %v2792_v30 = vpop.xlane.xlu0 %2791 }
 0x50d   :  { %4123 = vpow2.f32 %v2981_v13  ;;  %v5676_v49 = vsub.f32 %v5316_v22, %v2792_v30 }
 0x50e   :  { %v4118_v21 = vpop.eup %4117 }
 0x50f   :  { %v2983_v20 = vmul.f32 1.442695, %v5676_v49  ;;  %3097 = vadd.xlane.f32.xlu1 %v4112_v36  ;;  %3099 = vadd.xlane.f32.xlu0 %v4114_v0 }
 0x510   :  { %v2794_v11 = vpop.xlane.xlu1 %2793 }
 0x511   :  { %4125 = vpow2.f32 %v2983_v20  ;;  %v5680_v6 = vsub.f32 %v5325_v61, %v2794_v11 }
 0x512   :  { %v4120_v13 = vpop.eup %4119 }
 0x513   :  { %v2985_v12 = vmul.f32 1.442695, %v5680_v6  ;;  %3101 = vadd.xlane.f32.xlu1 %v4116_v46  ;;  %3103 = vadd.xlane.f32.xlu0 %v4118_v21  ;;  %v6075_v21 = vld [vmem:[#allocation24_spill] sm:$0xff] }
 0x514   :  { %v2796_v24 = vpop.xlane.xlu0 %2795 }
 0x515   :  { %4127 = vpow2.f32 %v2985_v12  ;;  %v5684_v22 = vsub.f32 %v5332_v25, %v2796_v24 }
 0x516   :  { %v4122_v30 = vpop.eup %4121 }
 0x517   :  { %v2987_v0 = vmul.f32 1.442695, %v5684_v22  ;;  %3105 = vadd.xlane.f32.xlu1 %v4120_v13  ;;  %3107 = vadd.xlane.f32.xlu0 %v4122_v30 }
 0x518   :  { %v2798_v36 = vpop.xlane.xlu1 %2797 }
 0x519   :  { %4129 = vpow2.f32 %v2987_v0  ;;  %v5688_v61 = vsub.f32 %v5339_v18, %v2798_v36 }
 0x51a   :  { %v4124_v20 = vpop.eup %4123 }
 0x51b   :  { %v2989_v11 = vmul.f32 1.442695, %v5688_v61  ;;  %3109 = vadd.xlane.f32.xlu1 %v4124_v20 }
 0x51c   :  { %v2800_v46 = vpop.xlane.xlu0 %2799 }
 0x51d   :  { %4131 = vpow2.f32 %v2989_v11  ;;  %v5692_v12 = vsub.f32 %v6075_v21, %v2800_v46 }
 0x51e   :  { %v4126_v25 = vpop.eup %4125 }
 0x51f   :  { %v2991_v24 = vmul.f32 1.442695, %v5692_v12  ;;  %3111 = vadd.xlane.f32.xlu0 %v4126_v25 }
 0x520   :  { %v2802_v13 = vpop.xlane.xlu1 %2801 }
 0x521   :  { %4133 = vpow2.f32 %v2991_v24  ;;  %v5696_v30 = vsub.f32 %v5356_v59, %v2802_v13 }
 0x522   :  { %v4128_v18 = vpop.eup %4127 }
 0x523   :  { %v2993_v0 = vmul.f32 1.442695, %v5696_v30  ;;  %3113 = vadd.xlane.f32.xlu1 %v4128_v18 }
 0x524   :  { %v2804_v36 = vpop.xlane.xlu0 %2803 }
 0x525   :  { %4135 = vpow2.f32 %v2993_v0  ;;  %v5700_v20 = vsub.f32 %v5367_v10, %v2804_v36 }
 0x526   :  { %v4130_v11 = vpop.eup %4129 }
 0x527   :  { %v2995_v46 = vmul.f32 1.442695, %v5700_v20  ;;  %3115 = vadd.xlane.f32.xlu0 %v4130_v11 }
 0x528   :  { %v2806_v21 = vpop.xlane.xlu1 %2805 }
 0x529   :  { %4137 = vpow2.f32 %v2995_v46  ;;  %v5704_v25 = vsub.f32 %v5378_v8, %v2806_v21 }
 0x52a   :  { %v4132_v59 = vpop.eup %4131 }
 0x52b   :  { %v2997_v24 = vmul.f32 1.442695, %v5704_v25  ;;  %3117 = vadd.xlane.f32.xlu1 %v4132_v59 }
 0x52c   :  { %v2808_v13 = vpop.xlane.xlu0 %2807 }
 0x52d   :  { %4139 = vpow2.f32 %v2997_v24  ;;  %v5708_v18 = vsub.f32 %v5389_v48, %v2808_v13 }
 0x52e   :  { %v4134_v10 = vpop.eup %4133 }
 0x52f   :  { %6076 = vst [vmem:[#allocation18_spill] sm:$0xff] %v5708_v18  ;;  %v2999_v0 = vmul.f32 1.442695, %v5708_v18  ;;  %3119 = vadd.xlane.f32.xlu0 %v4134_v10 }
 0x530   :  { %v2810_v36 = vpop.xlane.xlu1 %2809  ;;  %v3052_v11 = vpop.xlane.xlu0 %3051 }
 0x531   :  { %4141 = vpow2.f32 %v2999_v0  ;;  %v5712_v46 = vsub.f32 %v5400_v26, %v2810_v36 }
 0x532   :  { %v4136_v8 = vpop.eup %4135  ;;  %4143 = vlog2.f32 %v3052_v11 }
 0x533   :  { %v3001_v21 = vmul.f32 1.442695, %v5712_v46  ;;  %3121 = vadd.xlane.f32.xlu1 %v4136_v8 }
 0x534   :  { %v3054_v59 = vpop.xlane.xlu1 %3053  ;;  %v2812_v24 = vpop.xlane.xlu0 %2811 }
 0x535   :  { %4145 = vpow2.f32 %v3001_v21  ;;  %v5716_v48 = vsub.f32 %v5411_v63, %v2812_v24 }
 0x536   :  { %v4138_v13 = vpop.eup %4137  ;;  %4147 = vlog2.f32 %v3054_v59 }
 0x537   :  { %v3003_v10 = vmul.f32 1.442695, %v5716_v48  ;;  %3123 = vadd.xlane.f32.xlu0 %v4138_v13 }
 0x538   :  { %v2814_v0 = vpop.xlane.xlu1 %2813  ;;  %v3056_v18 = vpop.xlane.xlu0 %3055 }
 0x539   :  { %4149 = vpow2.f32 %v3003_v10  ;;  %v5720_v26 = vsub.f32 %v5422_v50, %v2814_v0 }
 0x53a   :  { %v4140_v36 = vpop.eup %4139  ;;  %4151 = vlog2.f32 %v3056_v18 }
 0x53b   :  { %6077 = vst [vmem:[#allocation19_spill] sm:$0xff] %v5720_v26  ;;  %v3005_v11 = vmul.f32 1.442695, %v5720_v26  ;;  %3125 = vadd.xlane.f32.xlu1 %v4140_v36 }
 0x53c   :  { %v3058_v8 = vpop.xlane.xlu1 %3057  ;;  %v2816_v21 = vpop.xlane.xlu0 %2815 }
 0x53d   :  { %4153 = vpow2.f32 %v3005_v11  ;;  %v5724_v63 = vsub.f32 %v5433_v7, %v2816_v21 }
 0x53e   :  { %v4142_v59 = vpop.eup %4141  ;;  %4155 = vlog2.f32 %v3058_v8 }
 0x53f   :  { %v4144_v24 = vpop.eup %4143  ;;  %v3007_v13 = vmul.f32 1.442695, %v5724_v63  ;;  %3127 = vadd.xlane.f32.xlu0 %v4142_v59 }
 0x540   :  { %v3180_v10 = vmul.f32 0.6931472, %v4144_v24  ;;  %v2818_v50 = vpop.xlane.xlu1 %2817  ;;  %v3060_v0 = vpop.xlane.xlu0 %3059 }
 0x541   :  { %4157 = vpow2.f32 %v3007_v13  ;;  %v5728_v18 = vsub.f32 %v5444_v38, %v2818_v50 }
 0x542   :  { %v4146_v36 = vpop.eup %4145  ;;  %v3307_v26 = vsub.f32 %v5352_v2, %v3180_v10  ;;  %4159 = vlog2.f32 %v3060_v0 }
 0x543   :  { %v4148_v11 = vpop.eup %4147  ;;  %v3009_v7 = vmul.f32 1.442695, %v5728_v18  ;;  %3129 = vadd.xlane.f32.xlu1 %v4146_v36 }
 0x544   :  { %v3371_v8 = vsel %vm2666_vm0, %v3307_v26, 0.0  ;;  %v3182_v21 = vmul.f32 0.6931472, %v4148_v11  ;;  %v3062_v59 = vpop.xlane.xlu1 %3061  ;;  %v2820_v24 = vpop.xlane.xlu0 %2819 }
 0x545   :  { %3435 = vst [vmem:[#allocation8] sm:$0xff] %v3371_v8  ;;  %4161 = vpow2.f32 %v3009_v7  ;;  %v5735_v13 = vsub.f32 %v5455_v16, %v2820_v24 }
 0x546   :  { %v4150_v38 = vpop.eup %4149  ;;  %v3308_v50 = vsub.f32 %v5361_v58, %v3182_v21  ;;  %4163 = vlog2.f32 %v3062_v59 }
 0x547   :  { %v4152_v2 = vpop.eup %4151  ;;  %v3011_v10 = vmul.f32 1.442695, %v5735_v13  ;;  %3131 = vadd.xlane.f32.xlu0 %v4150_v38 }
 0x548   :  { %v3372_v0 = vsel %vm2666_vm0, %v3308_v50, 0.0  ;;  %v3184_v26 = vmul.f32 0.6931472, %v4152_v2  ;;  %v2822_v36 = vpop.xlane.xlu1 %2821  ;;  %v3064_v11 = vpop.xlane.xlu0 %3063 }
 0x549   :  { %3436 = vst [vmem:[#allocation8 + $0x8] sm:$0xff] %v3372_v0  ;;  %4165 = vpow2.f32 %v3011_v10  ;;  %v5742_v7 = vsub.f32 %v5466_v47, %v2822_v36 }
 0x54a   :  { %v4154_v16 = vpop.eup %4153  ;;  %v3309_v8 = vsub.f32 %v5374_v41, %v3184_v26  ;;  %4167 = vlog2.f32 %v3064_v11 }
 0x54b   :  { %v4156_v58 = vpop.eup %4155  ;;  %v3013_v21 = vmul.f32 1.442695, %v5742_v7  ;;  %3133 = vadd.xlane.f32.xlu1 %v4154_v16 }
 0x54c   :  { %v3373_v59 = vsel %vm2666_vm0, %v3309_v8, 0.0  ;;  %v3186_v24 = vmul.f32 0.6931472, %v4156_v58  ;;  %v3066_v38 = vpop.xlane.xlu1 %3065  ;;  %v2824_v50 = vpop.xlane.xlu0 %2823  ;;  %v6078_v58 = vld [vmem:[#allocation25_spill] sm:$0xff] }
 0x54d   :  { %3437 = vst [vmem:[#allocation8 + $0x10] sm:$0xff] %v3373_v59  ;;  %4169 = vpow2.f32 %v3013_v21  ;;  %v5749_v2 = vsub.f32 %v5477_v54, %v2824_v50 }
 0x54e   :  { %v4158_v47 = vpop.eup %4157  ;;  %v3310_v10 = vsub.f32 %v5383_v9, %v3186_v24  ;;  %4171 = vlog2.f32 %v3066_v38 }
 0x54f   :  { %v4160_v41 = vpop.eup %4159  ;;  %v3015_v0 = vmul.f32 1.442695, %v5749_v2  ;;  %3135 = vadd.xlane.f32.xlu0 %v4158_v47 }
 0x550   :  { %v3374_v26 = vsel %vm2666_vm0, %v3310_v10, 0.0  ;;  %v3188_v36 = vmul.f32 0.6931472, %v4160_v41  ;;  %v2826_v11 = vpop.xlane.xlu1 %2825  ;;  %v3068_v16 = vpop.xlane.xlu0 %3067 }
 0x551   :  { %3438 = vst [vmem:[#allocation8 + $0x18] sm:$0xff] %v3374_v26  ;;  %4173 = vpow2.f32 %v3015_v0  ;;  %v5756_v8 = vsub.f32 %v5488_v60, %v2826_v11 }
 0x552   :  { %v4162_v54 = vpop.eup %4161  ;;  %v3311_v21 = vsub.f32 %v6078_v58, %v3188_v36  ;;  %4175 = vlog2.f32 %v3068_v16 }
 0x553   :  { %v4164_v9 = vpop.eup %4163  ;;  %v3017_v59 = vmul.f32 1.442695, %v5756_v8  ;;  %3137 = vadd.xlane.f32.xlu1 %v4162_v54 }
 0x554   :  { %v3375_v24 = vsel %vm2666_vm0, %v3311_v21, 0.0  ;;  %v3190_v38 = vmul.f32 0.6931472, %v4164_v9  ;;  %v3070_v50 = vpop.xlane.xlu1 %3069  ;;  %v2828_v47 = vpop.xlane.xlu0 %2827 }
 0x555   :  { %3439 = vst [vmem:[#allocation8 + $0x20] sm:$0xff] %v3375_v24  ;;  %4177 = vpow2.f32 %v3017_v59  ;;  %v5763_v10 = vsub.f32 %v5499_v57, %v2828_v47 }
 0x556   :  { %v4166_v60 = vpop.eup %4165  ;;  %v3312_v41 = vsub.f32 %v5405_v1, %v3190_v38  ;;  %4179 = vlog2.f32 %v3070_v50 }
 0x557   :  { %v4168_v0 = vpop.eup %4167  ;;  %v3019_v26 = vmul.f32 1.442695, %v5763_v10  ;;  %3139 = vadd.xlane.f32.xlu0 %v4166_v60 }
 0x558   :  { %v3376_v36 = vsel %vm2666_vm0, %v3312_v41, 0.0  ;;  %v3192_v11 = vmul.f32 0.6931472, %v4168_v0  ;;  %v2830_v16 = vpop.xlane.xlu1 %2829  ;;  %v3072_v54 = vpop.xlane.xlu0 %3071 }
 0x559   :  { %3440 = vst [vmem:[#allocation8 + $0x28] sm:$0xff] %v3376_v36  ;;  %4181 = vpow2.f32 %v3019_v26  ;;  %v5770_v58 = vsub.f32 %v5510_v29, %v2830_v16 }
 0x55a   :  { %v4170_v57 = vpop.eup %4169  ;;  %v3313_v21 = vsub.f32 %v5418_v17, %v3192_v11  ;;  %4183 = vlog2.f32 %v3072_v54 }
 0x55b   :  { %v4172_v1 = vpop.eup %4171  ;;  %v3021_v9 = vmul.f32 1.442695, %v5770_v58  ;;  %3141 = vadd.xlane.f32.xlu1 %v4170_v57 }
 0x55c   :  { %v3377_v59 = vsel %vm2666_vm0, %v3313_v21, 0.0  ;;  %v3194_v24 = vmul.f32 0.6931472, %v4172_v1  ;;  %v3074_v38 = vpop.xlane.xlu1 %3073  ;;  %v2832_v50 = vpop.xlane.xlu0 %2831 }
 0x55d   :  { %3441 = vst [vmem:[#allocation8 + $0x30] sm:$0xff] %v3377_v59  ;;  %4185 = vpow2.f32 %v3021_v9  ;;  %v5777_v47 = vsub.f32 %v5521_v40, %v2832_v50 }
 0x55e   :  { %v4174_v29 = vpop.eup %4173  ;;  %v3314_v60 = vsub.f32 %v5427_v45, %v3194_v24  ;;  %4187 = vlog2.f32 %v3074_v38 }
 0x55f   :  { %v4176_v17 = vpop.eup %4175  ;;  %v3023_v41 = vmul.f32 1.442695, %v5777_v47  ;;  %3143 = vadd.xlane.f32.xlu0 %v4174_v29 }
 0x560   :  { %v3378_v0 = vsel %vm2666_vm0, %v3314_v60, 0.0  ;;  %v3196_v26 = vmul.f32 0.6931472, %v4176_v17  ;;  %v2834_v36 = vpop.xlane.xlu1 %2833  ;;  %v3076_v11 = vpop.xlane.xlu0 %3075 }
 0x561   :  { %3442 = vst [vmem:[#allocation8 + $0x38] sm:$0xff] %v3378_v0  ;;  %4189 = vpow2.f32 %v3023_v41  ;;  %v5784_v16 = vsub.f32 %v5532_v55, %v2834_v36 }
 0x562   :  { %v4178_v40 = vpop.eup %4177  ;;  %v3315_v54 = vsub.f32 %v5440_v62, %v3196_v26  ;;  %4191 = vlog2.f32 %v3076_v11 }
 0x563   :  { %v4180_v45 = vpop.eup %4179  ;;  %v3025_v57 = vmul.f32 1.442695, %v5784_v16  ;;  %3145 = vadd.xlane.f32.xlu1 %v4178_v40 }
 0x564   :  { %v3379_v21 = vsel %vm2666_vm0, %v3315_v54, 0.0  ;;  %v3198_v1 = vmul.f32 0.6931472, %v4180_v45  ;;  %v3078_v9 = vpop.xlane.xlu1 %3077  ;;  %v2836_v59 = vpop.xlane.xlu0 %2835 }
 0x565   :  { %3443 = vst [vmem:[#allocation8 + $0x40] sm:$0xff] %v3379_v21  ;;  %4193 = vpow2.f32 %v3025_v57  ;;  %v5791_v24 = vsub.f32 %v5543_v37, %v2836_v59 }
 0x566   :  { %v4182_v55 = vpop.eup %4181  ;;  %v3316_v38 = vsub.f32 %v5449_v23, %v3198_v1  ;;  %4195 = vlog2.f32 %v3078_v9 }
 0x567   :  { %v4184_v62 = vpop.eup %4183  ;;  %v3027_v50 = vmul.f32 1.442695, %v5791_v24  ;;  %3147 = vadd.xlane.f32.xlu0 %v4182_v55 }
 0x568   :  { %v3380_v29 = vsel %vm2666_vm0, %v3316_v38, 0.0  ;;  %v3200_v60 = vmul.f32 0.6931472, %v4184_v62  ;;  %v2838_v17 = vpop.xlane.xlu1 %2837  ;;  %v3080_v41 = vpop.xlane.xlu0 %3079 }
 0x569   :  { %3444 = vst [vmem:[#allocation8 + $0x48] sm:$0xff] %v3380_v29  ;;  %4197 = vpow2.f32 %v3027_v50  ;;  %v5798_v0 = vsub.f32 %v5554_v4, %v2838_v17 }
 0x56a   :  { %v4186_v37 = vpop.eup %4185  ;;  %v3317_v26 = vsub.f32 %v5462_v43, %v3200_v60  ;;  %4199 = vlog2.f32 %v3080_v41 }
 0x56b   :  { %v4188_v23 = vpop.eup %4187  ;;  %v3029_v36 = vmul.f32 1.442695, %v5798_v0  ;;  %3149 = vadd.xlane.f32.xlu1 %v4186_v37 }
 0x56c   :  { %v3381_v11 = vsel %vm2666_vm0, %v3317_v26, 0.0  ;;  %v3202_v40 = vmul.f32 0.6931472, %v4188_v23  ;;  %v3082_v54 = vpop.xlane.xlu1 %3081  ;;  %v2840_v45 = vpop.xlane.xlu0 %2839 }
 0x56d   :  { %3445 = vst [vmem:[#allocation8 + $0x50] sm:$0xff] %v3381_v11  ;;  %4201 = vpow2.f32 %v3029_v36  ;;  %v5805_v57 = vsub.f32 %v5570_v15, %v2840_v45 }
 0x56e   :  { %v4190_v4 = vpop.eup %4189  ;;  %v3318_v21 = vsub.f32 %v5471_v3, %v3202_v40  ;;  %4203 = vlog2.f32 %v3082_v54 }
 0x56f   :  { %v4192_v43 = vpop.eup %4191  ;;  %v3031_v1 = vmul.f32 1.442695, %v5805_v57  ;;  %3151 = vadd.xlane.f32.xlu0 %v4190_v4 }
 0x570   :  { %v3382_v9 = vsel %vm2666_vm0, %v3318_v21, 0.0  ;;  %v3204_v59 = vmul.f32 0.6931472, %v4192_v43  ;;  %v2842_v55 = vpop.xlane.xlu1 %2841  ;;  %v3084_v38 = vpop.xlane.xlu0 %3083 }
 0x571   :  { %3446 = vst [vmem:[#allocation8 + $0x58] sm:$0xff] %v3382_v9  ;;  %4205 = vpow2.f32 %v3031_v1  ;;  %v5812_v62 = vsub.f32 %v5578_v56, %v2842_v55 }
 0x572   :  { %v4194_v15 = vpop.eup %4193  ;;  %v3319_v50 = vsub.f32 %v5484_v35, %v3204_v59  ;;  %4207 = vlog2.f32 %v3084_v38  ;;  %v6079_v38 = vld [vmem:[#allocation29_spill] sm:$0xff] }
 0x573   :  { %v4196_v3 = vpop.eup %4195  ;;  %v3033_v29 = vmul.f32 1.442695, %v5812_v62  ;;  %3153 = vadd.xlane.f32.xlu1 %v4194_v15 }
 0x574   :  { %v3383_v60 = vsel %vm2666_vm0, %v3319_v50, 0.0  ;;  %v3206_v17 = vmul.f32 0.6931472, %v4196_v3  ;;  %v3086_v41 = vpop.xlane.xlu1 %3085  ;;  %v2844_v37 = vpop.xlane.xlu0 %2843  ;;  %v6080_v50 = vld [vmem:[#allocation26_spill] sm:$0xff] }
 0x575   :  { %3447 = vst [vmem:[#allocation8 + $0x60] sm:$0xff] %v3383_v60  ;;  %4209 = vpow2.f32 %v3033_v29  ;;  %v5819_v26 = vsub.f32 %v5585_v53, %v2844_v37  ;;  %v6081_v37 = vld [vmem:[#allocation30_spill] sm:$0xff] }
 0x576   :  { %v4198_v56 = vpop.eup %4197  ;;  %v3320_v23 = vsub.f32 %v5493_v19, %v3206_v17  ;;  %4211 = vlog2.f32 %v3086_v41 }
 0x577   :  { %v4200_v35 = vpop.eup %4199  ;;  %v3035_v36 = vmul.f32 1.442695, %v5819_v26  ;;  %3155 = vadd.xlane.f32.xlu0 %v4198_v56 }
 0x578   :  { %v3384_v11 = vsel %vm2666_vm0, %v3320_v23, 0.0  ;;  %v3208_v40 = vmul.f32 0.6931472, %v4200_v35  ;;  %v2846_v54 = vpop.xlane.xlu1 %2845  ;;  %v3088_v45 = vpop.xlane.xlu0 %3087  ;;  %v6082_v35 = vld [vmem:[#allocation27_spill] sm:$0xff] }
 0x579   :  { %3448 = vst [vmem:[#allocation8 + $0x68] sm:$0xff] %v3384_v11  ;;  %4213 = vpow2.f32 %v3035_v36  ;;  %v5826_v4 = vsub.f32 %v5592_v51, %v2846_v54 }
 0x57a   :  { %v4202_v53 = vpop.eup %4201  ;;  %v3321_v21 = vsub.f32 %v5506_v52, %v3208_v40  ;;  %4215 = vlog2.f32 %v3088_v45 }
 0x57b   :  { %v4204_v19 = vpop.eup %4203  ;;  %v3037_v43 = vmul.f32 1.442695, %v5826_v4  ;;  %3157 = vadd.xlane.f32.xlu1 %v4202_v53 }
 0x57c   :  { %v3385_v1 = vsel %vm2666_vm0, %v3321_v21, 0.0  ;;  %v3210_v9 = vmul.f32 0.6931472, %v4204_v19  ;;  %v3090_v59 = vpop.xlane.xlu1 %3089  ;;  %v2848_v55 = vpop.xlane.xlu0 %2847 }
 0x57d   :  { %3449 = vst [vmem:[#allocation8 + $0x70] sm:$0xff] %v3385_v1  ;;  %4217 = vpow2.f32 %v3037_v43  ;;  %v5833_v15 = vsub.f32 %v6079_v38, %v2848_v55  ;;  %v6083_v43 = vld [vmem:[#allocation28_spill] sm:$0xff] }
 0x57e   :  { %v4206_v51 = vpop.eup %4205  ;;  %v3322_v3 = vsub.f32 %v6080_v50, %v3210_v9  ;;  %4219 = vlog2.f32 %v3090_v59 }
 0x57f   :  { %v4208_v52 = vpop.eup %4207  ;;  %v3039_v29 = vmul.f32 1.442695, %v5833_v15  ;;  %3159 = vadd.xlane.f32.xlu0 %v4206_v51 }
 0x580   :  { %v3386_v60 = vsel %vm2666_vm0, %v3322_v3, 0.0  ;;  %v3212_v17 = vmul.f32 0.6931472, %v4208_v52  ;;  %v2850_v41 = vpop.xlane.xlu1 %2849 }
 0x581   :  { %3450 = vst [vmem:[#allocation8 + $0x78] sm:$0xff] %v3386_v60  ;;  %4221 = vpow2.f32 %v3039_v29  ;;  %v5840_v56 = vsub.f32 %v6081_v37, %v2850_v41 }
 0x582   :  { %v4210_v23 = vpop.eup %4209  ;;  %v3323_v36 = vsub.f32 %v6082_v35, %v3212_v17 }
 0x583   :  { %v4212_v11 = vpop.eup %4211  ;;  %v3041_v40 = vmul.f32 1.442695, %v5840_v56  ;;  %3161 = vadd.xlane.f32.xlu1 %v4210_v23 }
 0x584   :  { %v3387_v54 = vsel %vm2666_vm0, %v3323_v36, 0.0  ;;  %v3214_v45 = vmul.f32 0.6931472, %v4212_v11  ;;  %v2852_v53 = vpop.xlane.xlu0 %2851 }
 0x585   :  { %3451 = vst [vmem:[#allocation8 + $0x80] sm:$0xff] %v3387_v54  ;;  %4223 = vpow2.f32 %v3041_v40  ;;  %v5847_v21 = vsub.f32 %v5631_v33, %v2852_v53  ;;  %v6084_v33 = vld [vmem:[#allocation12_spill] sm:$0xff] }
 0x586   :  { %v4214_v19 = vpop.eup %4213  ;;  %v3324_v1 = vsub.f32 %v6083_v43, %v3214_v45 }
 0x587   :  { %v4216_v9 = vpop.eup %4215  ;;  %v3043_v59 = vmul.f32 1.442695, %v5847_v21  ;;  %3163 = vadd.xlane.f32.xlu0 %v4214_v19 }
 0x588   :  { %v3388_v55 = vsel %vm2666_vm0, %v3324_v1, 0.0  ;;  %v3216_v38 = vmul.f32 0.6931472, %v4216_v9  ;;  %v2854_v51 = vpop.xlane.xlu1 %2853 }
 0x589   :  { %3452 = vst [vmem:[#allocation8 + $0x88] sm:$0xff] %v3388_v55  ;;  %4225 = vpow2.f32 %v3043_v59  ;;  %v5854_v50 = vsub.f32 %v5646_v14, %v2854_v51  ;;  %v6085_v14 = vld [vmem:[#allocation13_spill] sm:$0xff] }
 0x58a   :  { %v4218_v3 = vpop.eup %4217  ;;  %v3325_v52 = vsub.f32 %v6084_v33, %v3216_v38 }
 0x58b   :  { %v4220_v29 = vpop.eup %4219  ;;  %v3045_v60 = vmul.f32 1.442695, %v5854_v50  ;;  %3165 = vadd.xlane.f32.xlu1 %v4218_v3 }
 0x58c   :  { %v3389_v17 = vsel %vm2666_vm0, %v3325_v52, 0.0  ;;  %v3218_v41 = vmul.f32 0.6931472, %v4220_v29  ;;  %v2856_v37 = vpop.xlane.xlu0 %2855 }
 0x58d   :  { %3453 = vst [vmem:[#allocation8 + $0x90] sm:$0xff] %v3389_v17  ;;  %4227 = vpow2.f32 %v3045_v60  ;;  %v5861_v23 = vsub.f32 %v5658_v42, %v2856_v37 }
 0x58e   :  { %v4222_v35 = vpop.eup %4221  ;;  %v3326_v36 = vsub.f32 %v6085_v14, %v3218_v41  ;;  %v6086_v41 = vld [vmem:[#allocation14_spill] sm:$0xff] }
 0x58f   :  { %v3047_v11 = vmul.f32 1.442695, %v5861_v23  ;;  %3167 = vadd.xlane.f32.xlu0 %v4222_v35 }
 0x590   :  { %v3390_v40 = vsel %vm2666_vm0, %v3326_v36, 0.0  ;;  %v2858_v54 = vpop.xlane.xlu1 %2857  ;;  %v3092_v45 = vpop.xlane.xlu0 %3091 }
 0x591   :  { %3454 = vst [vmem:[#allocation8 + $0x98] sm:$0xff] %v3390_v40  ;;  %4229 = vpow2.f32 %v3047_v11  ;;  %v5868_v53 = vsub.f32 %v5667_v34, %v2858_v54 }
 0x592   :  { %v4224_v19 = vpop.eup %4223  ;;  %4231 = vlog2.f32 %v3092_v45 }
 0x593   :  { %v3049_v42 = vmul.f32 1.442695, %v5868_v53  ;;  %3169 = vadd.xlane.f32.xlu1 %v4224_v19  ;;  %v6087_v19 = vld [vmem:[#allocation15_spill] sm:$0xff] }
 0x594   :  { %v3094_v43 = vpop.xlane.xlu1 %3093  ;;  %v3096_v1 = vpop.xlane.xlu0 %3095 }
 0x595   :  { %4233 = vpow2.f32 %v3049_v42 }
 0x596   :  { %v4226_v9 = vpop.eup %4225  ;;  %4235 = vlog2.f32 %v3094_v43 }
 0x597   :  { %4237 = vlog2.f32 %v3096_v1  ;;  %3171 = vadd.xlane.f32.xlu0 %v4226_v9  ;;  %v6088_v1 = vld [vmem:[#allocation16_spill] sm:$0xff] }
 0x598   :  { %v3098_v59 = vpop.xlane.xlu1 %3097  ;;  %v3100_v55 = vpop.xlane.xlu0 %3099 }
 0x599   :  { %4239 = vlog2.f32 %v3098_v59 }
 0x59a   :  { %v4228_v38 = vpop.eup %4227  ;;  %4241 = vlog2.f32 %v3100_v55 }
 0x59b   :  { %3173 = vadd.xlane.f32.xlu1 %v4228_v38 }
 0x59c   :  { %v3102_v34 = vpop.xlane.xlu1 %3101  ;;  %v3104_v51 = vpop.xlane.xlu0 %3103 }
 0x59d   :  { %4243 = vlog2.f32 %v3102_v34 }
 0x59e   :  { %v4230_v3 = vpop.eup %4229  ;;  %4245 = vlog2.f32 %v3104_v51 }
 0x59f   :  { %v4232_v33 = vpop.eup %4231  ;;  %3175 = vadd.xlane.f32.xlu0 %v4230_v3 }
 0x5a0   :  { %v3220_v52 = vmul.f32 0.6931472, %v4232_v33  ;;  %v3106_v29 = vpop.xlane.xlu1 %3105  ;;  %v3108_v60 = vpop.xlane.xlu0 %3107 }
 0x5a1   :  { %4247 = vlog2.f32 %v3106_v29 }
 0x5a2   :  { %v4234_v17 = vpop.eup %4233  ;;  %v3327_v37 = vsub.f32 %v6086_v41, %v3220_v52  ;;  %4249 = vlog2.f32 %v3108_v60 }
 0x5a3   :  { %v4236_v35 = vpop.eup %4235  ;;  %3177 = vadd.xlane.f32.xlu1 %v4234_v17 }
 0x5a4   :  { %v4238_v14 = vpop.eup %4237  ;;  %v3391_v36 = vsel %vm2666_vm0, %v3327_v37, 0.0  ;;  %v3222_v11 = vmul.f32 0.6931472, %v4236_v35  ;;  %v3110_v40 = vpop.xlane.xlu1 %3109 }
 0x5a5   :  { %3455 = vst [vmem:[#allocation8 + $0xa0] sm:$0xff] %v3391_v36  ;;  %v3224_v54 = vmul.f32 0.6931472, %v4238_v14  ;;  %4251 = vlog2.f32 %v3110_v40 }
 0x5a6   :  { %v4240_v45 = vpop.eup %4239  ;;  %v3328_v42 = vsub.f32 %v6087_v19, %v3222_v11 }
 0x5a7   :  { %v4242_v43 = vpop.eup %4241  ;;  %v3329_v9 = vsub.f32 %v6088_v1, %v3224_v54  ;;  %v3226_v59 = vmul.f32 0.6931472, %v4240_v45 }
 0x5a8   :  { %v3392_v55 = vsel %vm2666_vm0, %v3328_v42, 0.0  ;;  %v3228_v38 = vmul.f32 0.6931472, %v4242_v43  ;;  %v3112_v34 = vpop.xlane.xlu0 %3111  ;;  %v6089_v43 = vld [vmem:[#allocation17_spill] sm:$0xff] }
 0x5a9   :  { %3456 = vst [vmem:[#allocation8 + $0xa8] sm:$0xff] %v3392_v55  ;;  %v3393_v51 = vsel %vm2666_vm0, %v3329_v9, 0.0  ;;  %v3330_v3 = vsub.f32 %v5621_v31, %v3226_v59  ;;  %4253 = vlog2.f32 %v3112_v34 }
 0x5aa   :  { %v4244_v33 = vpop.eup %4243  ;;  %3457 = vst [vmem:[#allocation8 + $0xb0] sm:$0xff] %v3393_v51  ;;  %v3331_v52 = vsub.f32 %v5625_v28, %v3228_v38 }
 0x5ab   :  { %v4246_v29 = vpop.eup %4245  ;;  %v3394_v60 = vsel %vm2666_vm0, %v3330_v3, 0.0  ;;  %v3230_v17 = vmul.f32 0.6931472, %v4244_v33 }
 0x5ac   :  { %3458 = vst [vmem:[#allocation8 + $0xb8] sm:$0xff] %v3394_v60  ;;  %v3395_v41 = vsel %vm2666_vm0, %v3331_v52, 0.0  ;;  %v3232_v37 = vmul.f32 0.6931472, %v4246_v29  ;;  %v3114_v35 = vpop.xlane.xlu1 %3113 }
 0x5ad   :  { %3459 = vst [vmem:[#allocation8 + $0xc0] sm:$0xff] %v3395_v41  ;;  %v3332_v14 = vsub.f32 %v5638_v44, %v3230_v17  ;;  %4255 = vlog2.f32 %v3114_v35 }
 0x5ae   :  { %v4248_v31 = vpop.eup %4247  ;;  %v3333_v36 = vsub.f32 %v5642_v39, %v3232_v37 }
 0x5af   :  { %v4250_v11 = vpop.eup %4249  ;;  %v3396_v28 = vsel %vm2666_vm0, %v3332_v14, 0.0  ;;  %v3234_v40 = vmul.f32 0.6931472, %v4248_v31 }
 0x5b0   :  { %3460 = vst [vmem:[#allocation8 + $0xc8] sm:$0xff] %v3396_v28  ;;  %v3397_v54 = vsel %vm2666_vm0, %v3333_v36, 0.0  ;;  %v3236_v45 = vmul.f32 0.6931472, %v4250_v11  ;;  %v3116_v19 = vpop.xlane.xlu0 %3115 }
 0x5b1   :  { %3461 = vst [vmem:[#allocation8 + $0xd0] sm:$0xff] %v3397_v54  ;;  %v3334_v42 = vsub.f32 %v5652_v27, %v3234_v40  ;;  %4257 = vlog2.f32 %v3116_v19 }
 0x5b2   :  { %v4252_v44 = vpop.eup %4251  ;;  %v3335_v1 = vsub.f32 %v6089_v43, %v3236_v45 }
 0x5b3   :  { %v3398_v39 = vsel %vm2666_vm0, %v3334_v42, 0.0  ;;  %v3238_v9 = vmul.f32 0.6931472, %v4252_v44 }
 0x5b4   :  { %3462 = vst [vmem:[#allocation8 + $0xd8] sm:$0xff] %v3398_v39  ;;  %v3399_v59 = vsel %vm2666_vm0, %v3335_v1, 0.0  ;;  %v3118_v55 = vpop.xlane.xlu1 %3117 }
 0x5b5   :  { %3463 = vst [vmem:[#allocation8 + $0xe0] sm:$0xff] %v3399_v59  ;;  %v3336_v38 = vsub.f32 %v5672_v5, %v3238_v9  ;;  %4259 = vlog2.f32 %v3118_v55 }
 0x5b6   :  { %v4254_v34 = vpop.eup %4253 }
 0x5b7   :  { %v3400_v27 = vsel %vm2666_vm0, %v3336_v38, 0.0  ;;  %v3240_v51 = vmul.f32 0.6931472, %v4254_v34 }
 0x5b8   :  { %3464 = vst [vmem:[#allocation8 + $0xe8] sm:$0xff] %v3400_v27  ;;  %v3120_v3 = vpop.xlane.xlu0 %3119 }
 0x5b9   :  { %v3337_v33 = vsub.f32 %v5676_v49, %v3240_v51  ;;  %4261 = vlog2.f32 %v3120_v3 }
 0x5ba   :  { %v4256_v52 = vpop.eup %4255 }
 0x5bb   :  { %v3401_v29 = vsel %vm2666_vm0, %v3337_v33, 0.0  ;;  %v3242_v60 = vmul.f32 0.6931472, %v4256_v52 }
 0x5bc   :  { %3465 = vst [vmem:[#allocation8 + $0xf0] sm:$0xff] %v3401_v29  ;;  %v3122_v17 = vpop.xlane.xlu1 %3121 }
 0x5bd   :  { %v3338_v5 = vsub.f32 %v5680_v6, %v3242_v60  ;;  %4263 = vlog2.f32 %v3122_v17  ;;  %v6090_v60 = vld [vmem:[#allocation18_spill] sm:$0xff] }
 0x5be   :  { %v4258_v41 = vpop.eup %4257 }
 0x5bf   :  { %v3402_v37 = vsel %vm2666_vm0, %v3338_v5, 0.0  ;;  %v3244_v35 = vmul.f32 0.6931472, %v4258_v41 }
 0x5c0   :  { %3466 = vst [vmem:[#allocation8 + $0xf8] sm:$0xff] %v3402_v37  ;;  %v3124_v14 = vpop.xlane.xlu0 %3123 }
 0x5c1   :  { %v3339_v49 = vsub.f32 %v5684_v22, %v3244_v35  ;;  %4265 = vlog2.f32 %v3124_v14 }
 0x5c2   :  { %v4260_v31 = vpop.eup %4259 }
 0x5c3   :  { %v3403_v36 = vsel %vm2666_vm0, %v3339_v49, 0.0  ;;  %v3246_v11 = vmul.f32 0.6931472, %v4260_v31 }
 0x5c4   :  { %3467 = vst [vmem:[#allocation8 + $0x100] sm:$0xff] %v3403_v36  ;;  %v3126_v28 = vpop.xlane.xlu1 %3125 }
 0x5c5   :  { %v3340_v6 = vsub.f32 %v5688_v61, %v3246_v11  ;;  %4267 = vlog2.f32 %v3126_v28 }
 0x5c6   :  { %v4262_v40 = vpop.eup %4261 }
 0x5c7   :  { %v3404_v54 = vsel %vm2666_vm0, %v3340_v6, 0.0  ;;  %v3248_v45 = vmul.f32 0.6931472, %v4262_v40 }
 0x5c8   :  { %3468 = vst [vmem:[#allocation8 + $0x108] sm:$0xff] %v3404_v54  ;;  %v3128_v19 = vpop.xlane.xlu0 %3127  ;;  %v6091_v54 = vld [vmem:[#allocation19_spill] sm:$0xff] }
 0x5c9   :  { %v3341_v22 = vsub.f32 %v5692_v12, %v3248_v45  ;;  %4269 = vlog2.f32 %v3128_v19 }
 0x5ca   :  { %v4264_v42 = vpop.eup %4263 }
 0x5cb   :  { %v3405_v44 = vsel %vm2666_vm0, %v3341_v22, 0.0  ;;  %v3250_v43 = vmul.f32 0.6931472, %v4264_v42 }
 0x5cc   :  { %3469 = vst [vmem:[#allocation8 + $0x110] sm:$0xff] %v3405_v44  ;;  %v3130_v1 = vpop.xlane.xlu1 %3129 }
 0x5cd   :  { %v3342_v61 = vsub.f32 %v5696_v30, %v3250_v43  ;;  %4271 = vlog2.f32 %v3130_v1 }
 0x5ce   :  { %v4266_v39 = vpop.eup %4265 }
 0x5cf   :  { %v3406_v9 = vsel %vm2666_vm0, %v3342_v61, 0.0  ;;  %v3252_v59 = vmul.f32 0.6931472, %v4266_v39 }
 0x5d0   :  { %3470 = vst [vmem:[#allocation8 + $0x118] sm:$0xff] %v3406_v9  ;;  %v3132_v55 = vpop.xlane.xlu0 %3131 }
 0x5d1   :  { %v3343_v12 = vsub.f32 %v5700_v20, %v3252_v59  ;;  %4273 = vlog2.f32 %v3132_v55 }
 0x5d2   :  { %v4268_v38 = vpop.eup %4267 }
 0x5d3   :  { %v3407_v34 = vsel %vm2666_vm0, %v3343_v12, 0.0  ;;  %v3254_v27 = vmul.f32 0.6931472, %v4268_v38 }
 0x5d4   :  { %3471 = vst [vmem:[#allocation8 + $0x120] sm:$0xff] %v3407_v34  ;;  %v3134_v51 = vpop.xlane.xlu1 %3133 }
 0x5d5   :  { %v3344_v30 = vsub.f32 %v5704_v25, %v3254_v27  ;;  %4275 = vlog2.f32 %v3134_v51 }
 0x5d6   :  { %v4270_v3 = vpop.eup %4269 }
 0x5d7   :  { %v3408_v33 = vsel %vm2666_vm0, %v3344_v30, 0.0  ;;  %v3256_v52 = vmul.f32 0.6931472, %v4270_v3 }
 0x5d8   :  { %3472 = vst [vmem:[#allocation8 + $0x128] sm:$0xff] %v3408_v33  ;;  %v3136_v29 = vpop.xlane.xlu0 %3135 }
 0x5d9   :  { %v3345_v20 = vsub.f32 %v6090_v60, %v3256_v52  ;;  %4277 = vlog2.f32 %v3136_v29 }
 0x5da   :  { %v4272_v17 = vpop.eup %4271 }
 0x5db   :  { %v3409_v5 = vsel %vm2666_vm0, %v3345_v20, 0.0  ;;  %v3258_v41 = vmul.f32 0.6931472, %v4272_v17 }
 0x5dc   :  { %3473 = vst [vmem:[#allocation8 + $0x130] sm:$0xff] %v3409_v5  ;;  %v3138_v37 = vpop.xlane.xlu1 %3137 }
 0x5dd   :  { %v3346_v25 = vsub.f32 %v5712_v46, %v3258_v41  ;;  %4279 = vlog2.f32 %v3138_v37 }
 0x5de   :  { %v4274_v35 = vpop.eup %4273 }
 0x5df   :  { %v3410_v14 = vsel %vm2666_vm0, %v3346_v25, 0.0  ;;  %v3260_v49 = vmul.f32 0.6931472, %v4274_v35 }
 0x5e0   :  { %3474 = vst [vmem:[#allocation8 + $0x138] sm:$0xff] %v3410_v14  ;;  %v3140_v31 = vpop.xlane.xlu0 %3139 }
 0x5e1   :  { %v3347_v36 = vsub.f32 %v5716_v48, %v3260_v49  ;;  %4281 = vlog2.f32 %v3140_v31 }
 0x5e2   :  { %v4276_v11 = vpop.eup %4275 }
 0x5e3   :  { %v3411_v28 = vsel %vm2666_vm0, %v3347_v36, 0.0  ;;  %v3262_v6 = vmul.f32 0.6931472, %v4276_v11 }
 0x5e4   :  { %3475 = vst [vmem:[#allocation8 + $0x140] sm:$0xff] %v3411_v28  ;;  %v3142_v40 = vpop.xlane.xlu1 %3141 }
 0x5e5   :  { %v3348_v46 = vsub.f32 %v6091_v54, %v3262_v6  ;;  %4283 = vlog2.f32 %v3142_v40 }
 0x5e6   :  { %v4278_v45 = vpop.eup %4277 }
 0x5e7   :  { %v3412_v19 = vsel %vm2666_vm0, %v3348_v46, 0.0  ;;  %v3264_v22 = vmul.f32 0.6931472, %v4278_v45 }
 0x5e8   :  { %3476 = vst [vmem:[#allocation8 + $0x148] sm:$0xff] %v3412_v19  ;;  %v3144_v42 = vpop.xlane.xlu0 %3143 }
 0x5e9   :  { %v3349_v48 = vsub.f32 %v5724_v63, %v3264_v22  ;;  %4285 = vlog2.f32 %v3144_v42 }
 0x5ea   :  { %v4280_v44 = vpop.eup %4279 }
 0x5eb   :  { %v3413_v43 = vsel %vm2666_vm0, %v3349_v48, 0.0  ;;  %v3266_v1 = vmul.f32 0.6931472, %v4280_v44 }
 0x5ec   :  { %3477 = vst [vmem:[#allocation8 + $0x150] sm:$0xff] %v3413_v43  ;;  %v3146_v61 = vpop.xlane.xlu1 %3145 }
 0x5ed   :  { %v3350_v39 = vsub.f32 %v5728_v18, %v3266_v1  ;;  %4287 = vlog2.f32 %v3146_v61 }
 0x5ee   :  { %v4282_v9 = vpop.eup %4281 }
 0x5ef   :  { %v3414_v59 = vsel %vm2666_vm0, %v3350_v39, 0.0  ;;  %v3268_v55 = vmul.f32 0.6931472, %v4282_v9 }
 0x5f0   :  { %3478 = vst [vmem:[#allocation8 + $0x158] sm:$0xff] %v3414_v59  ;;  %v3148_v12 = vpop.xlane.xlu0 %3147 }
 0x5f1   :  { %v3351_v63 = vsub.f32 %v5735_v13, %v3268_v55  ;;  %4289 = vlog2.f32 %v3148_v12 }
 0x5f2   :  { %v4284_v38 = vpop.eup %4283 }
 0x5f3   :  { %v3415_v34 = vsel %vm2666_vm0, %v3351_v63, 0.0  ;;  %v3270_v27 = vmul.f32 0.6931472, %v4284_v38 }
 0x5f4   :  { %3479 = vst [vmem:[#allocation8 + $0x160] sm:$0xff] %v3415_v34  ;;  %v3150_v51 = vpop.xlane.xlu1 %3149 }
 0x5f5   :  { %v3352_v18 = vsub.f32 %v5742_v7, %v3270_v27  ;;  %4291 = vlog2.f32 %v3150_v51 }
 0x5f6   :  { %v4286_v30 = vpop.eup %4285 }
 0x5f7   :  { %v3416_v3 = vsel %vm2666_vm0, %v3352_v18, 0.0  ;;  %v3272_v33 = vmul.f32 0.6931472, %v4286_v30 }
 0x5f8   :  { %3480 = vst [vmem:[#allocation8 + $0x168] sm:$0xff] %v3416_v3  ;;  %v3152_v52 = vpop.xlane.xlu0 %3151 }
 0x5f9   :  { %v3353_v13 = vsub.f32 %v5749_v2, %v3272_v33  ;;  %4293 = vlog2.f32 %v3152_v52 }
 0x5fa   :  { %v4288_v29 = vpop.eup %4287 }
 0x5fb   :  { %v3417_v60 = vsel %vm2666_vm0, %v3353_v13, 0.0  ;;  %v3274_v20 = vmul.f32 0.6931472, %v4288_v29 }
 0x5fc   :  { %3481 = vst [vmem:[#allocation8 + $0x170] sm:$0xff] %v3417_v60  ;;  %v3154_v17 = vpop.xlane.xlu1 %3153 }
 0x5fd   :  { %v3354_v7 = vsub.f32 %v5756_v8, %v3274_v20  ;;  %4295 = vlog2.f32 %v3154_v17 }
 0x5fe   :  { %v4290_v5 = vpop.eup %4289 }
 0x5ff   :  { %v3418_v41 = vsel %vm2666_vm0, %v3354_v7, 0.0  ;;  %v3276_v37 = vmul.f32 0.6931472, %v4290_v5 }
 0x600   :  { %3482 = vst [vmem:[#allocation8 + $0x178] sm:$0xff] %v3418_v41  ;;  %v3156_v25 = vpop.xlane.xlu0 %3155 }
 0x601   :  { %v3355_v2 = vsub.f32 %v5763_v10, %v3276_v37  ;;  %4297 = vlog2.f32 %v3156_v25 }
 0x602   :  { %v4292_v35 = vpop.eup %4291 }
 0x603   :  { %v3419_v14 = vsel %vm2666_vm0, %v3355_v2, 0.0  ;;  %v3278_v49 = vmul.f32 0.6931472, %v4292_v35 }
 0x604   :  { %3483 = vst [vmem:[#allocation8 + $0x180] sm:$0xff] %v3419_v14  ;;  %v3158_v31 = vpop.xlane.xlu1 %3157 }
 0x605   :  { %v3356_v8 = vsub.f32 %v5770_v58, %v3278_v49  ;;  %4299 = vlog2.f32 %v3158_v31 }
 0x606   :  { %v4294_v36 = vpop.eup %4293 }
 0x607   :  { %v3420_v11 = vsel %vm2666_vm0, %v3356_v8, 0.0  ;;  %v3280_v28 = vmul.f32 0.6931472, %v4294_v36 }
 0x608   :  { %3484 = vst [vmem:[#allocation8 + $0x188] sm:$0xff] %v3420_v11  ;;  %v3160_v6 = vpop.xlane.xlu0 %3159 }
 0x609   :  { %v3357_v10 = vsub.f32 %v5777_v47, %v3280_v28  ;;  %4301 = vlog2.f32 %v3160_v6 }
 0x60a   :  { %v4296_v40 = vpop.eup %4295 }
 0x60b   :  { %v3421_v54 = vsel %vm2666_vm0, %v3357_v10, 0.0  ;;  %v3282_v46 = vmul.f32 0.6931472, %v4296_v40 }
 0x60c   :  { %3485 = vst [vmem:[#allocation8 + $0x190] sm:$0xff] %v3421_v54  ;;  %v3162_v45 = vpop.xlane.xlu1 %3161 }
 0x60d   :  { %v3358_v58 = vsub.f32 %v5784_v16, %v3282_v46  ;;  %4303 = vlog2.f32 %v3162_v45 }
 0x60e   :  { %v4298_v19 = vpop.eup %4297 }
 0x60f   :  { %v3422_v22 = vsel %vm2666_vm0, %v3358_v58, 0.0  ;;  %v3284_v42 = vmul.f32 0.6931472, %v4298_v19 }
 0x610   :  { %3486 = vst [vmem:[#allocation8 + $0x198] sm:$0xff] %v3422_v22  ;;  %v3164_v48 = vpop.xlane.xlu0 %3163 }
 0x611   :  { %v3359_v47 = vsub.f32 %v5791_v24, %v3284_v42  ;;  %4305 = vlog2.f32 %v3164_v48 }
 0x612   :  { %v4300_v44 = vpop.eup %4299 }
 0x613   :  { %v3423_v43 = vsel %vm2666_vm0, %v3359_v47, 0.0  ;;  %v3286_v1 = vmul.f32 0.6931472, %v4300_v44 }
 0x614   :  { %3487 = vst [vmem:[#allocation8 + $0x1a0] sm:$0xff] %v3423_v43  ;;  %v3166_v61 = vpop.xlane.xlu1 %3165 }
 0x615   :  { %v3360_v16 = vsub.f32 %v5798_v0, %v3286_v1  ;;  %4307 = vlog2.f32 %v3166_v61 }
 0x616   :  { %v4302_v39 = vpop.eup %4301 }
 0x617   :  { %v3424_v9 = vsel %vm2666_vm0, %v3360_v16, 0.0  ;;  %v3288_v59 = vmul.f32 0.6931472, %v4302_v39 }
 0x618   :  { %3488 = vst [vmem:[#allocation8 + $0x1a8] sm:$0xff] %v3424_v9  ;;  %v3168_v55 = vpop.xlane.xlu0 %3167 }
 0x619   :  { %v3361_v24 = vsub.f32 %v5805_v57, %v3288_v59  ;;  %4309 = vlog2.f32 %v3168_v55 }
 0x61a   :  { %v4304_v12 = vpop.eup %4303 }
 0x61b   :  { %v3425_v63 = vsel %vm2666_vm0, %v3361_v24, 0.0  ;;  %v3290_v38 = vmul.f32 0.6931472, %v4304_v12 }
 0x61c   :  { %3489 = vst [vmem:[#allocation8 + $0x1b0] sm:$0xff] %v3425_v63  ;;  %v3170_v34 = vpop.xlane.xlu1 %3169 }
 0x61d   :  { %v3362_v0 = vsub.f32 %v5812_v62, %v3290_v38  ;;  %4311 = vlog2.f32 %v3170_v34 }
 0x61e   :  { %v4306_v27 = vpop.eup %4305 }
 0x61f   :  { %v3426_v51 = vsel %vm2666_vm0, %v3362_v0, 0.0  ;;  %v3292_v18 = vmul.f32 0.6931472, %v4306_v27 }
 0x620   :  { %3490 = vst [vmem:[#allocation8 + $0x1b8] sm:$0xff] %v3426_v51  ;;  %v3172_v30 = vpop.xlane.xlu0 %3171 }
 0x621   :  { %v3363_v57 = vsub.f32 %v5819_v26, %v3292_v18  ;;  %4313 = vlog2.f32 %v3172_v30 }
 0x622   :  { %v4308_v3 = vpop.eup %4307 }
 0x623   :  { %v3427_v33 = vsel %vm2666_vm0, %v3363_v57, 0.0  ;;  %v3294_v52 = vmul.f32 0.6931472, %v4308_v3 }
 0x624   :  { %3491 = vst [vmem:[#allocation8 + $0x1c0] sm:$0xff] %v3427_v33  ;;  %v3174_v13 = vpop.xlane.xlu1 %3173 }
 0x625   :  { %v3364_v62 = vsub.f32 %v5826_v4, %v3294_v52  ;;  %4315 = vlog2.f32 %v3174_v13 }
 0x626   :  { %v4310_v29 = vpop.eup %4309 }
 0x627   :  { %v3428_v60 = vsel %vm2666_vm0, %v3364_v62, 0.0  ;;  %v3296_v20 = vmul.f32 0.6931472, %v4310_v29 }
 0x628   :  { %3492 = vst [vmem:[#allocation8 + $0x1c8] sm:$0xff] %v3428_v60  ;;  %v3176_v17 = vpop.xlane.xlu0 %3175 }
 0x629   :  { %v3365_v26 = vsub.f32 %v5833_v15, %v3296_v20  ;;  %4317 = vlog2.f32 %v3176_v17 }
 0x62a   :  { %v4312_v7 = vpop.eup %4311 }
 0x62b   :  { %v3429_v5 = vsel %vm2666_vm0, %v3365_v26, 0.0  ;;  %v3298_v41 = vmul.f32 0.6931472, %v4312_v7 }
 0x62c   :  { %3493 = vst [vmem:[#allocation8 + $0x1d0] sm:$0xff] %v3429_v5  ;;  %v3178_v37 = vpop.xlane.xlu1 %3177 }
 0x62d   :  { %v3366_v4 = vsub.f32 %v5840_v56, %v3298_v41  ;;  %4319 = vlog2.f32 %v3178_v37 }
 0x62e   :  { %v4314_v25 = vpop.eup %4313 }
 0x62f   :  { %v3430_v2 = vsel %vm2666_vm0, %v3366_v4, 0.0  ;;  %v3300_v35 = vmul.f32 0.6931472, %v4314_v25 }
 0x630   :  { %3494 = vst [vmem:[#allocation8 + $0x1d8] sm:$0xff] %v3430_v2 }
 0x631   :  { %v3367_v14 = vsub.f32 %v5847_v21, %v3300_v35 }
 0x632   :  { %v4316_v15 = vpop.eup %4315 }
 0x633   :  { %v3431_v49 = vsel %vm2666_vm0, %v3367_v14, 0.0  ;;  %v3302_v31 = vmul.f32 0.6931472, %v4316_v15 }
 0x634   :  { %3495 = vst [vmem:[#allocation8 + $0x1e0] sm:$0xff] %v3431_v49 }
 0x635   :  { %v3368_v8 = vsub.f32 %v5854_v50, %v3302_v31 }
 0x636   :  { %v4318_v36 = vpop.eup %4317 }
 0x637   :  { %v3432_v56 = vsel %vm2666_vm0, %v3368_v8, 0.0  ;;  %v3304_v11 = vmul.f32 0.6931472, %v4318_v36 }
 0x638   :  { %3496 = vst [vmem:[#allocation8 + $0x1e8] sm:$0xff] %v3432_v56 }
 0x639   :  { %v3369_v28 = vsub.f32 %v5861_v23, %v3304_v11 }
 0x63a   :  { %v4320_v6 = vpop.eup %4319 }
 0x63b   :  { %v3433_v21 = vsel %vm2666_vm0, %v3369_v28, 0.0  ;;  %v3306_v10 = vmul.f32 0.6931472, %v4320_v6 }
 0x63c   :  { %3497 = vst [vmem:[#allocation8 + $0x1f0] sm:$0xff] %v3433_v21 }
 0x63d   :  { %v3370_v40 = vsub.f32 %v5868_v53, %v3306_v10 }
 0x63f   :  { %v3434_v50 = vsel %vm2666_vm0, %v3370_v40, 0.0 }
 0x640   :  { %3498 = vst [vmem:[#allocation8 + $0x1f8] sm:$0xff] %v3434_v50 }
 0x641   :  { %4504 = shalt.err (!%p4501_p5)
}
 0x642   :  { %s4528_s11 = smov 128   ;;  %s4529_s12 = smov 8  }
 0x643   :  { %3510 = dma.vmem_to_hbm [thread:$0]  %s3505_s9, 8192, %s6010_s4, [#allocation4], %s4528_s11, %s4528_s11, %s4529_s12  }
 0x644   :  { %4517 = dma.done.wait [#allocation4], 8192  }
 0x645   :  { %4518 = vsyncadd [#allocation4], 4294959104 }
 0x646   :  { %3514 = vsyncpa [#allocation3], 1 }
 0x647   :  { %3515 = vsyncpa [#allocation6], 1 }
 0x648   :  { %3516 = vsyncpa [#allocation4], 1 }

</bundles_post_ra>
